<compile_context>
chip_gen: v7x
topology: tpu7x:2x2x1
jax: 0.10.0
libtpu: 0.0.40
codegen_flags: <defaults>
</compile_context>

<pallas_src>
import functools

import jax
import jax.numpy as jnp
from jax.experimental import pallas as pl
from jax.experimental.pallas import tpu as pltpu


# ----------------------------------------------------------------------------
# Fused VAE forward kernel (one batch block per grid step)
# ----------------------------------------------------------------------------

def _vae_fused_kernel(x_ref, encw_ref, encb_ref, mlw_ref, mlb_ref, eps_ref,
                      l2fw_ref, l2fb_ref, decw_ref, decb_ref,
                      xrec_ref, ml_ref,
                      xcol_ref, henc_ref, decrows_ref, ypad_ref,
                      *, B, H, W, C_IN, C_FEAT, Z):
    f32 = jnp.float32
    bf16 = jnp.bfloat16
    WCI = W * C_IN      # lanes of one image row   (w, c_in)
    WCF = W * C_FEAT    # lanes of one feature row (w, c_feat)

    # ---- encoder conv Conv2d(C_in, C_feat, 3, pad=1) + ReLU -----------------
    # kh-only im2col assembled in VMEM: xcol[:, h, kh*WCI:(kh+1)*WCI] holds the
    # input row h+kh-1 (zero at the H borders); the W-border zero padding is
    # absorbed by the banded weights.  One matmul with K = 3*WCI.
    zrow = jnp.zeros((B, WCI), f32)
    xcol_ref[:, :, WCI:2 * WCI] = x_ref[...]                         # kh = 1
    xcol_ref[:, 1:H, 0:WCI] = x_ref[:, 0:H - 1, :]                   # kh = 0
    xcol_ref[:, 0, 0:WCI] = zrow
    xcol_ref[:, 0:H - 1, 2 * WCI:3 * WCI] = x_ref[:, 1:H, :]         # kh = 2
    xcol_ref[:, H - 1, 2 * WCI:3 * WCI] = zrow

    henc = jnp.dot(xcol_ref[...].astype(bf16).reshape(B * H, 3 * WCI),
                   encw_ref[...], preferred_element_type=f32)
    henc = jnp.maximum(henc + encb_ref[...], 0.0).astype(bf16)       # (B*H, WCF)
    henc_ref[...] = henc.reshape(B, H, WCF)                          # single store

    # ---- merged mu | log_var projection: per-h accumulation (no flatten) ----
    ml = jnp.zeros((B, 2 * Z), f32)
    for h in range(H):
        ml = ml + jnp.dot(henc_ref[:, h, :], mlw_ref[h],
                          preferred_element_type=f32)
    ml = ml + mlb_ref[...]
    ml_ref[...] = ml                                                 # (B, 2Z)

    # ---- reparameterization --------------------------------------------------
    mu = ml[:, :Z]
    logvar = ml[:, Z:]
    zlat = (mu + eps_ref[...] * jnp.exp(0.5 * logvar)).astype(bf16)  # (B, Z)

    # ---- latent_to_features: write decoder-conv input rows directly ---------
    for h in range(H):
        row = jnp.dot(zlat, l2fw_ref[h],
                      preferred_element_type=f32) + l2fb_ref[h]      # (B, WCF)
        decrows_ref[:, h, :] = row

    # ---- decoder conv Conv2d(C_feat, C_in, 3, pad=1) + tanh -----------------
    # One matmul with N = 3*WCI; the three kh contributions are combined with
    # H-shifted adds through a padded VMEM slab (shifted-offset reads).
    yd = jnp.dot(decrows_ref[...].astype(bf16).reshape(B * H, WCF),
                 decw_ref[...], preferred_element_type=f32)          # (B*H, 3*WCI)
    zrow3 = jnp.zeros((B, 3 * WCI), f32)
    ypad_ref[:, 0, :] = zrow3
    ypad_ref[:, H + 1, :] = zrow3
    ypad_ref[:, 1:H + 1, :] = yd.reshape(B, H, 3 * WCI)
    pre = (ypad_ref[:, 0:H, 0:WCI]                      # kh=0 term: Y0[h-1]
           + ypad_ref[:, 1:H + 1, WCI:2 * WCI]          # kh=1 term: Y1[h]
           + ypad_ref[:, 2:H + 2, 2 * WCI:3 * WCI])     # kh=2 term: Y2[h+1]
    xrec_ref[...] = jnp.tanh(pre + decb_ref[...]).reshape(B * H, WCI)


# ----------------------------------------------------------------------------
# Parameter init (PyTorch layout) + one-time repack for the fused kernel
# ----------------------------------------------------------------------------

def _uniform(key, shape, fan_in):
    bound = 1.0 / jnp.sqrt(jnp.float32(fan_in))
    return jax.random.uniform(key, shape, jnp.float32, -bound, bound)


def _conv3x3_banded(weight, width):
    """PyTorch conv weight (C_out, C_in, 3, 3) -> (3, width*C_in, width*C_out)
    banded matmul weights realizing a stride-1 'same' conv along W (zero pad at
    the W boundaries is represented by omitted bands)."""
    wk = jnp.transpose(weight, (2, 3, 1, 0))          # (kh, kw, C_in, C_out)
    mats = []
    for kh in range(3):
        m = sum(jnp.kron(jnp.eye(width, width, k=1 - kw, dtype=weight.dtype),
                         wk[kh, kw])
                for kw in range(3))
        mats.append(m)
    return jnp.stack(mats)


def _chw_to_hwc_perm(c, h, w):
    """perm[j] = PyTorch .view(B,-1) (C,H,W) flat index of the feature that
    sits at NHWC flat position j inside the kernel."""
    hh, ww, cc = jnp.meshgrid(jnp.arange(h), jnp.arange(w), jnp.arange(c),
                              indexing="ij")
    return (cc * (h * w) + hh * w + ww).reshape(-1)


def init_vae_params(key, c_in, c_feat, h, w, z_dim):
    """Parameters exactly as the PyTorch module would hold them
    (Linear weights stored (in, out))."""
    nf = c_feat * h * w
    ks = jax.random.split(key, 10)
    return {
        "enc_w": _uniform(ks[0], (c_feat, c_in, 3, 3), c_in * 9),
        "enc_b": _uniform(ks[1], (c_feat,), c_in * 9),
        "mean_w": _uniform(ks[2], (nf, z_dim), nf),
        "mean_b": _uniform(ks[3], (z_dim,), nf),
        "logvar_w": _uniform(ks[4], (nf, z_dim), nf),
        "logvar_b": _uniform(ks[5], (z_dim,), nf),
        "l2f_w": _uniform(ks[6], (z_dim, nf), z_dim),
        "l2f_b": _uniform(ks[7], (nf,), z_dim),
        "dec_w": _uniform(ks[8], (c_in, c_feat, 3, 3), c_feat * 9),
        "dec_b": _uniform(ks[9], (c_in,), c_feat * 9),
    }


def prepare_kernel_params(params, c_in, c_feat, h, w, z_dim):
    """One-time host-side repack: kh-stacked banded conv weights, merged and
    per-h-reshaped mu|log_var projection, per-h latent_to_features weights,
    NHWC feature ordering, lane-tiled biases.  MXU operands in bf16, biases
    f32 (epilogues stay f32)."""
    wci = w * c_in
    wcf = w * c_feat
    perm = _chw_to_hwc_perm(c_feat, h, w)      # NHWC pos -> PyTorch (C,H,W) pos

    enc_band = _conv3x3_banded(params["enc_w"], w)            # (3, wci, wcf)
    dec_band = _conv3x3_banded(params["dec_w"], w)            # (3, wcf, wci)

    ml_w = jnp.concatenate([params["mean_w"], params["logvar_w"]], axis=1)[perm, :]
    ml_b = jnp.concatenate([params["mean_b"], params["logvar_b"]]).reshape(1, 2 * z_dim)
    l2f_w = params["l2f_w"][:, perm]                          # (z, nf) NHWC cols
    l2f_b = params["l2f_b"][perm]

    return {
        # encoder: rows stacked kh-major -> single K = 3*wci matmul
        "enc_w": enc_band.reshape(3 * wci, wcf).astype(jnp.bfloat16),
        "enc_b": jnp.tile(params["enc_b"], w).reshape(1, wcf),
        # mu|log_var: (H, wcf, 2z) for per-h accumulation
        "ml_w": ml_w.reshape(h, wcf, 2 * z_dim).astype(jnp.bfloat16),
        "ml_b": ml_b,
        # latent_to_features: (H, z, wcf) + (H, 1, wcf) for direct row writes
        "l2f_w": l2f_w.reshape(z_dim, h, wcf).transpose(1, 0, 2).astype(jnp.bfloat16),
        "l2f_b": l2f_b.reshape(h, 1, wcf),
        # decoder: columns stacked kh-major -> single N = 3*wci matmul
        "dec_w": jnp.concatenate([dec_band[0], dec_band[1], dec_band[2]],
                                 axis=1).astype(jnp.bfloat16),
        "dec_b": jnp.tile(params["dec_b"], w).reshape(1, wci),
    }


# ----------------------------------------------------------------------------
# Forward (mirrors VAE.forward: returns x_reconstructed, mu, log_sigma2)
# ----------------------------------------------------------------------------

def _pick_batch_block(b):
    # 16 samples/block -> M = 16*H = 256 conv-matmul rows (full v6e/v7x MXU).
    for cand in (16, 8):
        if b % cand == 0:
            return cand
    return b


def vae_forward(kparams, x, eps):
    B, C_IN, H, W = x.shape
    WCI = W * C_IN
    WCF = kparams["enc_w"].shape[1]
    C_FEAT = WCF // W
    Z = eps.shape[1]

    # NCHW -> NHWC rows=(b,h), lanes=(w,c): the only host-side glue.
    x3d = jnp.transpose(x, (0, 2, 3, 1)).reshape(B, H, WCI).astype(jnp.float32)

    bb = _pick_batch_block(B)
    nb = B // bb

    kernel = functools.partial(_vae_fused_kernel, B=bb, H=H, W=W,
                               C_IN=C_IN, C_FEAT=C_FEAT, Z=Z)

    bcast2 = lambda i: (0, 0)
    bcast3 = lambda i: (0, 0, 0)

    xrec2d, ml = pl.pallas_call(
        kernel,
        grid=(nb,),
        out_shape=(
            jax.ShapeDtypeStruct((B * H, WCI), jnp.float32),
            jax.ShapeDtypeStruct((B, 2 * Z), jnp.float32),
        ),
        in_specs=[
            pl.BlockSpec((bb, H, WCI), lambda i: (i, 0, 0)),          # x rows
            pl.BlockSpec(kparams["enc_w"].shape, bcast2),
            pl.BlockSpec(kparams["enc_b"].shape, bcast2),
            pl.BlockSpec(kparams["ml_w"].shape, bcast3),
            pl.BlockSpec(kparams["ml_b"].shape, bcast2),
            pl.BlockSpec((bb, Z), lambda i: (i, 0)),                  # eps
            pl.BlockSpec(kparams["l2f_w"].shape, bcast3),
            pl.BlockSpec(kparams["l2f_b"].shape, bcast3),
            pl.BlockSpec(kparams["dec_w"].shape, bcast2),
            pl.BlockSpec(kparams["dec_b"].shape, bcast2),
        ],
        out_specs=(
            pl.BlockSpec((bb * H, WCI), lambda i: (i, 0)),
            pl.BlockSpec((bb, 2 * Z), lambda i: (i, 0)),
        ),
        scratch_shapes=[
            pltpu.VMEM((bb, H, 3 * WCI), jnp.float32),      # kh-im2col'd input
            pltpu.VMEM((bb, H, WCF), jnp.bfloat16),         # encoder features
            pltpu.VMEM((bb, H, WCF), jnp.float32),          # decoder conv input rows
            pltpu.VMEM((bb, H + 2, 3 * WCI), jnp.float32),  # padded kh contributions
        ],
        compiler_params=pltpu.CompilerParams(
            dimension_semantics=("parallel",),
            # per-block footprint is <~1 MiB at 16 samples/block, so 32 MiB is
            # safely within v5e/v6e (128 MiB) and v7x (64 MiB) VMEM.
            vmem_limit_bytes=32 * 1024 * 1024,
        ),
    )(x3d, kparams["enc_w"], kparams["enc_b"], kparams["ml_w"], kparams["ml_b"],
      eps, kparams["l2f_w"], kparams["l2f_b"], kparams["dec_w"], kparams["dec_b"])

    x_rec = xrec2d.reshape(B, H, W, C_IN).transpose(0, 3, 1, 2)   # back to NCHW
    mu = ml[:, :Z]
    log_sigma2 = ml[:, Z:]
    return x_rec, mu, log_sigma2


# ----------------------------------------------------------------------------
# Main
# ----------------------------------------------------------------------------

if __name__ == "__main__":
    B, C_IN, H, W = 2, 4, 16, 16      # in_size = (4, 16, 16)
    C_FEAT = 8                        # encoder feature channels
    Z_DIM = 8

    root = jax.random.PRNGKey(0)
    k_param, k_x, k_eps = jax.random.split(root, 3)

    torch_layout_params = init_vae_params(k_param, C_IN, C_FEAT, H, W, Z_DIM)
    kparams = prepare_kernel_params(torch_layout_params, C_IN, C_FEAT, H, W, Z_DIM)

    x = jax.random.normal(k_x, (B, C_IN, H, W), jnp.float32)
    # TODO(synk): torch.randn_like draws eps inside encode(); here the noise is
    # drawn host-side and passed in (could use pltpu.prng_seed/prng_random_bits
    # inside the fused kernel instead).
    eps = jax.random.normal(k_eps, (B, Z_DIM), jnp.float32)

    fwd = jax.jit(vae_forward)
    x_rec, mu, log_sigma2 = fwd(kparams, x, eps)
    jax.block_until_ready((x_rec, mu, log_sigma2))

    assert x_rec.shape == x.shape
    assert mu.shape == (B, Z_DIM) and log_sigma2.shape == (B, Z_DIM)
    assert bool(jnp.all(jnp.isfinite(x_rec)))
    assert bool(jnp.all(jnp.abs(x_rec) <= 1.0))      # tanh output range
    print("KERNEL_OK")
</pallas_src>

<mosaic_0001>
module attributes {stable_mosaic.version = 11 : i64} {
  func.func @_vae_fused_kernel(%arg0: i32, %arg1: memref<2x16x64xf32, #tpu.memory_space<vmem>>, %arg2: memref<192x128xbf16, #tpu.memory_space<vmem>>, %arg3: memref<1x128xf32, #tpu.memory_space<vmem>>, %arg4: memref<16x128x16xbf16, #tpu.memory_space<vmem>>, %arg5: memref<1x16xf32, #tpu.memory_space<vmem>>, %arg6: memref<2x8xf32, #tpu.memory_space<vmem>>, %arg7: memref<16x8x128xbf16, #tpu.memory_space<vmem>>, %arg8: memref<16x1x128xf32, #tpu.memory_space<vmem>>, %arg9: memref<128x192xbf16, #tpu.memory_space<vmem>>, %arg10: memref<1x64xf32, #tpu.memory_space<vmem>>, %arg11: memref<32x64xf32, #tpu.memory_space<vmem>>, %arg12: memref<2x16xf32, #tpu.memory_space<vmem>>, %arg13: memref<2x16x192xf32, #tpu.memory_space<vmem>>, %arg14: memref<2x16x128xbf16, #tpu.memory_space<vmem>>, %arg15: memref<2x16x128xf32, #tpu.memory_space<vmem>>, %arg16: memref<2x18x192xf32, #tpu.memory_space<vmem>>) attributes {dimension_semantics = [#tpu.dimension_semantics<parallel>], iteration_bounds = array<i64: 1>, scalar_prefetch = 0 : i64, scratch_operands = 4 : i64, tpu.core_type = #tpu.core_type<tc>, window_params = [{transform_indices = @transform_0, window_bounds = array<i64: 2, 16, 64>}, {pipeline_mode = #tpu.pipeline_mode<synchronous>, transform_indices = @transform_1, window_bounds = array<i64: 192, 128>}, {pipeline_mode = #tpu.pipeline_mode<synchronous>, transform_indices = @transform_2, window_bounds = array<i64: 1, 128>}, {pipeline_mode = #tpu.pipeline_mode<synchronous>, transform_indices = @transform_3, window_bounds = array<i64: 16, 128, 16>}, {pipeline_mode = #tpu.pipeline_mode<synchronous>, transform_indices = @transform_4, window_bounds = array<i64: 1, 16>}, {transform_indices = @transform_5, window_bounds = array<i64: 2, 8>}, {pipeline_mode = #tpu.pipeline_mode<synchronous>, transform_indices = @transform_6, window_bounds = array<i64: 16, 8, 128>}, {pipeline_mode = #tpu.pipeline_mode<synchronous>, transform_indices = @transform_7, window_bounds = array<i64: 16, 1, 128>}, {pipeline_mode = #tpu.pipeline_mode<synchronous>, transform_indices = @transform_8, window_bounds = array<i64: 128, 192>}, {pipeline_mode = #tpu.pipeline_mode<synchronous>, transform_indices = @transform_9, window_bounds = array<i64: 1, 64>}, {transform_indices = @transform_10, window_bounds = array<i64: 32, 64>}, {transform_indices = @transform_11, window_bounds = array<i64: 2, 16>}]} {
    %cst = arith.constant 0.000000e+00 : f32
    %0 = vector.broadcast %cst : f32 to vector<2x64xf32>
    %c0 = arith.constant 0 : index
    %c0_0 = arith.constant 0 : index
    %c0_1 = arith.constant 0 : index
    %1 = vector.load %arg1[%c0, %c0_0, %c0_1] : memref<2x16x64xf32, #tpu.memory_space<vmem>>, vector<2x16x64xf32>
    %c0_2 = arith.constant 0 : index
    %c0_3 = arith.constant 0 : index
    %c64 = arith.constant 64 : index
    %2 = vector.load %arg13[%c0_2, %c0_3, %c64] : memref<2x16x192xf32, #tpu.memory_space<vmem>>, vector<2x16x64xf32>
    tpu.vector_store %arg13[%c0_2, %c0_3, %c64], %1 {strides = array<i32>} : memref<2x16x192xf32, #tpu.memory_space<vmem>>, vector<2x16x64xf32>,
    %c0_4 = arith.constant 0 : index
    %c0_5 = arith.constant 0 : index
    %c0_6 = arith.constant 0 : index
    %3 = vector.load %arg1[%c0_4, %c0_5, %c0_6] : memref<2x16x64xf32, #tpu.memory_space<vmem>>, vector<2x15x64xf32>
    %c0_7 = arith.constant 0 : index
    %c1 = arith.constant 1 : index
    %c0_8 = arith.constant 0 : index
    %4 = vector.load %arg13[%c0_7, %c1, %c0_8] : memref<2x16x192xf32, #tpu.memory_space<vmem>>, vector<2x15x64xf32>
    tpu.vector_store %arg13[%c0_7, %c1, %c0_8], %3 {strides = array<i32>} : memref<2x16x192xf32, #tpu.memory_space<vmem>>, vector<2x15x64xf32>,
    %c0_9 = arith.constant 0 : index
    %c0_10 = arith.constant 0 : index
    %c0_11 = arith.constant 0 : index
    %5 = vector.load %arg13[%c0_9, %c0_10, %c0_11] : memref<2x16x192xf32, #tpu.memory_space<vmem>>, vector<2x1x64xf32>
    %6 = vector.shape_cast %5 : vector<2x1x64xf32> to vector<2x64xf32>
    %7 = vector.shape_cast %0 : vector<2x64xf32> to vector<2x1x64xf32>
    tpu.vector_store %arg13[%c0_9, %c0_10, %c0_11], %7 {strides = array<i32>} : memref<2x16x192xf32, #tpu.memory_space<vmem>>, vector<2x1x64xf32>,
    %c0_12 = arith.constant 0 : index
    %c1_13 = arith.constant 1 : index
    %c0_14 = arith.constant 0 : index
    %8 = vector.load %arg1[%c0_12, %c1_13, %c0_14] : memref<2x16x64xf32, #tpu.memory_space<vmem>>, vector<2x15x64xf32>
    %c0_15 = arith.constant 0 : index
    %c0_16 = arith.constant 0 : index
    %c128 = arith.constant 128 : index
    %9 = vector.load %arg13[%c0_15, %c0_16, %c128] : memref<2x16x192xf32, #tpu.memory_space<vmem>>, vector<2x15x64xf32>
    tpu.vector_store %arg13[%c0_15, %c0_16, %c128], %8 {strides = array<i32>} : memref<2x16x192xf32, #tpu.memory_space<vmem>>, vector<2x15x64xf32>,
    %c0_17 = arith.constant 0 : index
    %c15 = arith.constant 15 : index
    %c128_18 = arith.constant 128 : index
    %10 = vector.load %arg13[%c0_17, %c15, %c128_18] : memref<2x16x192xf32, #tpu.memory_space<vmem>>, vector<2x1x64xf32>
    %11 = vector.shape_cast %10 : vector<2x1x64xf32> to vector<2x64xf32>
    %12 = vector.shape_cast %0 : vector<2x64xf32> to vector<2x1x64xf32>
    tpu.vector_store %arg13[%c0_17, %c15, %c128_18], %12 {strides = array<i32>} : memref<2x16x192xf32, #tpu.memory_space<vmem>>, vector<2x1x64xf32>,
    %c0_19 = arith.constant 0 : index
    %c0_20 = arith.constant 0 : index
    %c0_21 = arith.constant 0 : index
    %13 = vector.load %arg13[%c0_19, %c0_20, %c0_21] : memref<2x16x192xf32, #tpu.memory_space<vmem>>, vector<2x16x192xf32>
    %14 = arith.truncf %13 : vector<2x16x192xf32> to vector<2x16x192xbf16>
    %15 = vector.shape_cast %14 : vector<2x16x192xbf16> to vector<32x192xbf16>
    %c0_22 = arith.constant 0 : index
    %c0_23 = arith.constant 0 : index
    %16 = vector.load %arg2[%c0_22, %c0_23] : memref<192x128xbf16, #tpu.memory_space<vmem>>, vector<192x128xbf16>
    %cst_24 = arith.constant dense<0.000000e+00> : vector<32x128xf32>
    %17 = tpu.matmul %15, %16, %cst_24 {dimension_numbers = #tpu.dot_dimension_numbers<[1], [0], [0], [1], [0, 0, 1, 1], [], []>} : vector<32x192xbf16>, vector<192x128xbf16>, vector<32x128xf32> -> vector<32x128xf32>
    %c0_25 = arith.constant 0 : index
    %c0_26 = arith.constant 0 : index
    %18 = vector.load %arg3[%c0_25, %c0_26] : memref<1x128xf32, #tpu.memory_space<vmem>>, vector<1x128xf32>
    %19 = vector.broadcast %18 : vector<1x128xf32> to vector<32x128xf32>
    %20 = arith.addf %17, %19 : vector<32x128xf32>
    %cst_27 = arith.constant 0.000000e+00 : f32
    %21 = vector.broadcast %cst_27 : f32 to vector<32x128xf32>
    %22 = arith.maximumf %20, %21 : vector<32x128xf32>
    %23 = arith.truncf %22 : vector<32x128xf32> to vector<32x128xbf16>
    %24 = vector.shape_cast %23 : vector<32x128xbf16> to vector<2x16x128xbf16>
    %c0_28 = arith.constant 0 : index
    %c0_29 = arith.constant 0 : index
    %c0_30 = arith.constant 0 : index
    %25 = vector.load %arg14[%c0_28, %c0_29, %c0_30] : memref<2x16x128xbf16, #tpu.memory_space<vmem>>, vector<2x16x128xbf16>
    tpu.vector_store %arg14[%c0_28, %c0_29, %c0_30], %24 {strides = array<i32>} : memref<2x16x128xbf16, #tpu.memory_space<vmem>>, vector<2x16x128xbf16>,
    %cst_31 = arith.constant 0.000000e+00 : f32
    %26 = vector.broadcast %cst_31 : f32 to vector<2x16xf32>
    %c0_32 = arith.constant 0 : index
    %c0_33 = arith.constant 0 : index
    %c0_34 = arith.constant 0 : index
    %27 = vector.load %arg14[%c0_32, %c0_33, %c0_34] : memref<2x16x128xbf16, #tpu.memory_space<vmem>>, vector<2x1x128xbf16>
    %28 = vector.shape_cast %27 : vector<2x1x128xbf16> to vector<2x128xbf16>
    %c0_35 = arith.constant 0 : index
    %c0_36 = arith.constant 0 : index
    %c0_37 = arith.constant 0 : index
    %29 = vector.load %arg4[%c0_35, %c0_36, %c0_37] : memref<16x128x16xbf16, #tpu.memory_space<vmem>>, vector<1x128x16xbf16>
    %30 = vector.shape_cast %29 : vector<1x128x16xbf16> to vector<128x16xbf16>
    %cst_38 = arith.constant dense<0.000000e+00> : vector<2x16xf32>
    %31 = tpu.matmul %28, %30, %cst_38 {dimension_numbers = #tpu.dot_dimension_numbers<[1], [0], [0], [1], [0, 0, 1, 1], [], []>} : vector<2x128xbf16>, vector<128x16xbf16>, vector<2x16xf32> -> vector<2x16xf32>
    %32 = arith.addf %26, %31 : vector<2x16xf32>
    %c0_39 = arith.constant 0 : index
    %c1_40 = arith.constant 1 : index
    %c0_41 = arith.constant 0 : index
    %33 = vector.load %arg14[%c0_39, %c1_40, %c0_41] : memref<2x16x128xbf16, #tpu.memory_space<vmem>>, vector<2x1x128xbf16>
    %34 = vector.shape_cast %33 : vector<2x1x128xbf16> to vector<2x128xbf16>
    %c1_42 = arith.constant 1 : index
    %c0_43 = arith.constant 0 : index
    %c0_44 = arith.constant 0 : index
    %35 = vector.load %arg4[%c1_42, %c0_43, %c0_44] : memref<16x128x16xbf16, #tpu.memory_space<vmem>>, vector<1x128x16xbf16>
    %36 = vector.shape_cast %35 : vector<1x128x16xbf16> to vector<128x16xbf16>
    %cst_45 = arith.constant dense<0.000000e+00> : vector<2x16xf32>
    %37 = tpu.matmul %34, %36, %cst_45 {dimension_numbers = #tpu.dot_dimension_numbers<[1], [0], [0], [1], [0, 0, 1, 1], [], []>} : vector<2x128xbf16>, vector<128x16xbf16>, vector<2x16xf32> -> vector<2x16xf32>
    %38 = arith.addf %32, %37 : vector<2x16xf32>
    %c0_46 = arith.constant 0 : index
    %c2 = arith.constant 2 : index
    %c0_47 = arith.constant 0 : index
    %39 = vector.load %arg14[%c0_46, %c2, %c0_47] : memref<2x16x128xbf16, #tpu.memory_space<vmem>>, vector<2x1x128xbf16>
    %40 = vector.shape_cast %39 : vector<2x1x128xbf16> to vector<2x128xbf16>
    %c2_48 = arith.constant 2 : index
    %c0_49 = arith.constant 0 : index
    %c0_50 = arith.constant 0 : index
    %41 = vector.load %arg4[%c2_48, %c0_49, %c0_50] : memref<16x128x16xbf16, #tpu.memory_space<vmem>>, vector<1x128x16xbf16>
    %42 = vector.shape_cast %41 : vector<1x128x16xbf16> to vector<128x16xbf16>
    %cst_51 = arith.constant dense<0.000000e+00> : vector<2x16xf32>
    %43 = tpu.matmul %40, %42, %cst_51 {dimension_numbers = #tpu.dot_dimension_numbers<[1], [0], [0], [1], [0, 0, 1, 1], [], []>} : vector<2x128xbf16>, vector<128x16xbf16>, vector<2x16xf32> -> vector<2x16xf32>
    %44 = arith.addf %38, %43 : vector<2x16xf32>
    %c0_52 = arith.constant 0 : index
    %c3 = arith.constant 3 : index
    %c0_53 = arith.constant 0 : index
    %45 = vector.load %arg14[%c0_52, %c3, %c0_53] : memref<2x16x128xbf16, #tpu.memory_space<vmem>>, vector<2x1x128xbf16>
    %46 = vector.shape_cast %45 : vector<2x1x128xbf16> to vector<2x128xbf16>
    %c3_54 = arith.constant 3 : index
    %c0_55 = arith.constant 0 : index
    %c0_56 = arith.constant 0 : index
    %47 = vector.load %arg4[%c3_54, %c0_55, %c0_56] : memref<16x128x16xbf16, #tpu.memory_space<vmem>>, vector<1x128x16xbf16>
    %48 = vector.shape_cast %47 : vector<1x128x16xbf16> to vector<128x16xbf16>
    %cst_57 = arith.constant dense<0.000000e+00> : vector<2x16xf32>
    %49 = tpu.matmul %46, %48, %cst_57 {dimension_numbers = #tpu.dot_dimension_numbers<[1], [0], [0], [1], [0, 0, 1, 1], [], []>} : vector<2x128xbf16>, vector<128x16xbf16>, vector<2x16xf32> -> vector<2x16xf32>
    %50 = arith.addf %44, %49 : vector<2x16xf32>
    %c0_58 = arith.constant 0 : index
    %c4 = arith.constant 4 : index
    %c0_59 = arith.constant 0 : index
    %51 = vector.load %arg14[%c0_58, %c4, %c0_59] : memref<2x16x128xbf16, #tpu.memory_space<vmem>>, vector<2x1x128xbf16>
    %52 = vector.shape_cast %51 : vector<2x1x128xbf16> to vector<2x128xbf16>
    %c4_60 = arith.constant 4 : index
    %c0_61 = arith.constant 0 : index
    %c0_62 = arith.constant 0 : index
    %53 = vector.load %arg4[%c4_60, %c0_61, %c0_62] : memref<16x128x16xbf16, #tpu.memory_space<vmem>>, vector<1x128x16xbf16>
    %54 = vector.shape_cast %53 : vector<1x128x16xbf16> to vector<128x16xbf16>
    %cst_63 = arith.constant dense<0.000000e+00> : vector<2x16xf32>
    %55 = tpu.matmul %52, %54, %cst_63 {dimension_numbers = #tpu.dot_dimension_numbers<[1], [0], [0], [1], [0, 0, 1, 1], [], []>} : vector<2x128xbf16>, vector<128x16xbf16>, vector<2x16xf32> -> vector<2x16xf32>
    %56 = arith.addf %50, %55 : vector<2x16xf32>
    %c0_64 = arith.constant 0 : index
    %c5 = arith.constant 5 : index
    %c0_65 = arith.constant 0 : index
    %57 = vector.load %arg14[%c0_64, %c5, %c0_65] : memref<2x16x128xbf16, #tpu.memory_space<vmem>>, vector<2x1x128xbf16>
    %58 = vector.shape_cast %57 : vector<2x1x128xbf16> to vector<2x128xbf16>
    %c5_66 = arith.constant 5 : index
    %c0_67 = arith.constant 0 : index
    %c0_68 = arith.constant 0 : index
    %59 = vector.load %arg4[%c5_66, %c0_67, %c0_68] : memref<16x128x16xbf16, #tpu.memory_space<vmem>>, vector<1x128x16xbf16>
    %60 = vector.shape_cast %59 : vector<1x128x16xbf16> to vector<128x16xbf16>
    %cst_69 = arith.constant dense<0.000000e+00> : vector<2x16xf32>
    %61 = tpu.matmul %58, %60, %cst_69 {dimension_numbers = #tpu.dot_dimension_numbers<[1], [0], [0], [1], [0, 0, 1, 1], [], []>} : vector<2x128xbf16>, vector<128x16xbf16>, vector<2x16xf32> -> vector<2x16xf32>
    %62 = arith.addf %56, %61 : vector<2x16xf32>
    %c0_70 = arith.constant 0 : index
    %c6 = arith.constant 6 : index
    %c0_71 = arith.constant 0 : index
    %63 = vector.load %arg14[%c0_70, %c6, %c0_71] : memref<2x16x128xbf16, #tpu.memory_space<vmem>>, vector<2x1x128xbf16>
    %64 = vector.shape_cast %63 : vector<2x1x128xbf16> to vector<2x128xbf16>
    %c6_72 = arith.constant 6 : index
    %c0_73 = arith.constant 0 : index
    %c0_74 = arith.constant 0 : index
    %65 = vector.load %arg4[%c6_72, %c0_73, %c0_74] : memref<16x128x16xbf16, #tpu.memory_space<vmem>>, vector<1x128x16xbf16>
    %66 = vector.shape_cast %65 : vector<1x128x16xbf16> to vector<128x16xbf16>
    %cst_75 = arith.constant dense<0.000000e+00> : vector<2x16xf32>
    %67 = tpu.matmul %64, %66, %cst_75 {dimension_numbers = #tpu.dot_dimension_numbers<[1], [0], [0], [1], [0, 0, 1, 1], [], []>} : vector<2x128xbf16>, vector<128x16xbf16>, vector<2x16xf32> -> vector<2x16xf32>
    %68 = arith.addf %62, %67 : vector<2x16xf32>
    %c0_76 = arith.constant 0 : index
    %c7 = arith.constant 7 : index
    %c0_77 = arith.constant 0 : index
    %69 = vector.load %arg14[%c0_76, %c7, %c0_77] : memref<2x16x128xbf16, #tpu.memory_space<vmem>>, vector<2x1x128xbf16>
    %70 = vector.shape_cast %69 : vector<2x1x128xbf16> to vector<2x128xbf16>
    %c7_78 = arith.constant 7 : index
    %c0_79 = arith.constant 0 : index
    %c0_80 = arith.constant 0 : index
    %71 = vector.load %arg4[%c7_78, %c0_79, %c0_80] : memref<16x128x16xbf16, #tpu.memory_space<vmem>>, vector<1x128x16xbf16>
    %72 = vector.shape_cast %71 : vector<1x128x16xbf16> to vector<128x16xbf16>
    %cst_81 = arith.constant dense<0.000000e+00> : vector<2x16xf32>
    %73 = tpu.matmul %70, %72, %cst_81 {dimension_numbers = #tpu.dot_dimension_numbers<[1], [0], [0], [1], [0, 0, 1, 1], [], []>} : vector<2x128xbf16>, vector<128x16xbf16>, vector<2x16xf32> -> vector<2x16xf32>
    %74 = arith.addf %68, %73 : vector<2x16xf32>
    %c0_82 = arith.constant 0 : index
    %c8 = arith.constant 8 : index
    %c0_83 = arith.constant 0 : index
    %75 = vector.load %arg14[%c0_82, %c8, %c0_83] : memref<2x16x128xbf16, #tpu.memory_space<vmem>>, vector<2x1x128xbf16>
    %76 = vector.shape_cast %75 : vector<2x1x128xbf16> to vector<2x128xbf16>
    %c8_84 = arith.constant 8 : index
    %c0_85 = arith.constant 0 : index
    %c0_86 = arith.constant 0 : index
    %77 = vector.load %arg4[%c8_84, %c0_85, %c0_86] : memref<16x128x16xbf16, #tpu.memory_space<vmem>>, vector<1x128x16xbf16>
    %78 = vector.shape_cast %77 : vector<1x128x16xbf16> to vector<128x16xbf16>
    %cst_87 = arith.constant dense<0.000000e+00> : vector<2x16xf32>
    %79 = tpu.matmul %76, %78, %cst_87 {dimension_numbers = #tpu.dot_dimension_numbers<[1], [0], [0], [1], [0, 0, 1, 1], [], []>} : vector<2x128xbf16>, vector<128x16xbf16>, vector<2x16xf32> -> vector<2x16xf32>
    %80 = arith.addf %74, %79 : vector<2x16xf32>
    %c0_88 = arith.constant 0 : index
    %c9 = arith.constant 9 : index
    %c0_89 = arith.constant 0 : index
    %81 = vector.load %arg14[%c0_88, %c9, %c0_89] : memref<2x16x128xbf16, #tpu.memory_space<vmem>>, vector<2x1x128xbf16>
    %82 = vector.shape_cast %81 : vector<2x1x128xbf16> to vector<2x128xbf16>
    %c9_90 = arith.constant 9 : index
    %c0_91 = arith.constant 0 : index
    %c0_92 = arith.constant 0 : index
    %83 = vector.load %arg4[%c9_90, %c0_91, %c0_92] : memref<16x128x16xbf16, #tpu.memory_space<vmem>>, vector<1x128x16xbf16>
    %84 = vector.shape_cast %83 : vector<1x128x16xbf16> to vector<128x16xbf16>
    %cst_93 = arith.constant dense<0.000000e+00> : vector<2x16xf32>
    %85 = tpu.matmul %82, %84, %cst_93 {dimension_numbers = #tpu.dot_dimension_numbers<[1], [0], [0], [1], [0, 0, 1, 1], [], []>} : vector<2x128xbf16>, vector<128x16xbf16>, vector<2x16xf32> -> vector<2x16xf32>
    %86 = arith.addf %80, %85 : vector<2x16xf32>
    %c0_94 = arith.constant 0 : index
    %c10 = arith.constant 10 : index
    %c0_95 = arith.constant 0 : index
    %87 = vector.load %arg14[%c0_94, %c10, %c0_95] : memref<2x16x128xbf16, #tpu.memory_space<vmem>>, vector<2x1x128xbf16>
    %88 = vector.shape_cast %87 : vector<2x1x128xbf16> to vector<2x128xbf16>
    %c10_96 = arith.constant 10 : index
    %c0_97 = arith.constant 0 : index
    %c0_98 = arith.constant 0 : index
    %89 = vector.load %arg4[%c10_96, %c0_97, %c0_98] : memref<16x128x16xbf16, #tpu.memory_space<vmem>>, vector<1x128x16xbf16>
    %90 = vector.shape_cast %89 : vector<1x128x16xbf16> to vector<128x16xbf16>
    %cst_99 = arith.constant dense<0.000000e+00> : vector<2x16xf32>
    %91 = tpu.matmul %88, %90, %cst_99 {dimension_numbers = #tpu.dot_dimension_numbers<[1], [0], [0], [1], [0, 0, 1, 1], [], []>} : vector<2x128xbf16>, vector<128x16xbf16>, vector<2x16xf32> -> vector<2x16xf32>
    %92 = arith.addf %86, %91 : vector<2x16xf32>
    %c0_100 = arith.constant 0 : index
    %c11 = arith.constant 11 : index
    %c0_101 = arith.constant 0 : index
    %93 = vector.load %arg14[%c0_100, %c11, %c0_101] : memref<2x16x128xbf16, #tpu.memory_space<vmem>>, vector<2x1x128xbf16>
    %94 = vector.shape_cast %93 : vector<2x1x128xbf16> to vector<2x128xbf16>
    %c11_102 = arith.constant 11 : index
    %c0_103 = arith.constant 0 : index
    %c0_104 = arith.constant 0 : index
    %95 = vector.load %arg4[%c11_102, %c0_103, %c0_104] : memref<16x128x16xbf16, #tpu.memory_space<vmem>>, vector<1x128x16xbf16>
    %96 = vector.shape_cast %95 : vector<1x128x16xbf16> to vector<128x16xbf16>
    %cst_105 = arith.constant dense<0.000000e+00> : vector<2x16xf32>
    %97 = tpu.matmul %94, %96, %cst_105 {dimension_numbers = #tpu.dot_dimension_numbers<[1], [0], [0], [1], [0, 0, 1, 1], [], []>} : vector<2x128xbf16>, vector<128x16xbf16>, vector<2x16xf32> -> vector<2x16xf32>
    %98 = arith.addf %92, %97 : vector<2x16xf32>
    %c0_106 = arith.constant 0 : index
    %c12 = arith.constant 12 : index
    %c0_107 = arith.constant 0 : index
    %99 = vector.load %arg14[%c0_106, %c12, %c0_107] : memref<2x16x128xbf16, #tpu.memory_space<vmem>>, vector<2x1x128xbf16>
    %100 = vector.shape_cast %99 : vector<2x1x128xbf16> to vector<2x128xbf16>
    %c12_108 = arith.constant 12 : index
    %c0_109 = arith.constant 0 : index
    %c0_110 = arith.constant 0 : index
    %101 = vector.load %arg4[%c12_108, %c0_109, %c0_110] : memref<16x128x16xbf16, #tpu.memory_space<vmem>>, vector<1x128x16xbf16>
    %102 = vector.shape_cast %101 : vector<1x128x16xbf16> to vector<128x16xbf16>
    %cst_111 = arith.constant dense<0.000000e+00> : vector<2x16xf32>
    %103 = tpu.matmul %100, %102, %cst_111 {dimension_numbers = #tpu.dot_dimension_numbers<[1], [0], [0], [1], [0, 0, 1, 1], [], []>} : vector<2x128xbf16>, vector<128x16xbf16>, vector<2x16xf32> -> vector<2x16xf32>
    %104 = arith.addf %98, %103 : vector<2x16xf32>
    %c0_112 = arith.constant 0 : index
    %c13 = arith.constant 13 : index
    %c0_113 = arith.constant 0 : index
    %105 = vector.load %arg14[%c0_112, %c13, %c0_113] : memref<2x16x128xbf16, #tpu.memory_space<vmem>>, vector<2x1x128xbf16>
    %106 = vector.shape_cast %105 : vector<2x1x128xbf16> to vector<2x128xbf16>
    %c13_114 = arith.constant 13 : index
    %c0_115 = arith.constant 0 : index
    %c0_116 = arith.constant 0 : index
    %107 = vector.load %arg4[%c13_114, %c0_115, %c0_116] : memref<16x128x16xbf16, #tpu.memory_space<vmem>>, vector<1x128x16xbf16>
    %108 = vector.shape_cast %107 : vector<1x128x16xbf16> to vector<128x16xbf16>
    %cst_117 = arith.constant dense<0.000000e+00> : vector<2x16xf32>
    %109 = tpu.matmul %106, %108, %cst_117 {dimension_numbers = #tpu.dot_dimension_numbers<[1], [0], [0], [1], [0, 0, 1, 1], [], []>} : vector<2x128xbf16>, vector<128x16xbf16>, vector<2x16xf32> -> vector<2x16xf32>
    %110 = arith.addf %104, %109 : vector<2x16xf32>
    %c0_118 = arith.constant 0 : index
    %c14 = arith.constant 14 : index
    %c0_119 = arith.constant 0 : index
    %111 = vector.load %arg14[%c0_118, %c14, %c0_119] : memref<2x16x128xbf16, #tpu.memory_space<vmem>>, vector<2x1x128xbf16>
    %112 = vector.shape_cast %111 : vector<2x1x128xbf16> to vector<2x128xbf16>
    %c14_120 = arith.constant 14 : index
    %c0_121 = arith.constant 0 : index
    %c0_122 = arith.constant 0 : index
    %113 = vector.load %arg4[%c14_120, %c0_121, %c0_122] : memref<16x128x16xbf16, #tpu.memory_space<vmem>>, vector<1x128x16xbf16>
    %114 = vector.shape_cast %113 : vector<1x128x16xbf16> to vector<128x16xbf16>
    %cst_123 = arith.constant dense<0.000000e+00> : vector<2x16xf32>
    %115 = tpu.matmul %112, %114, %cst_123 {dimension_numbers = #tpu.dot_dimension_numbers<[1], [0], [0], [1], [0, 0, 1, 1], [], []>} : vector<2x128xbf16>, vector<128x16xbf16>, vector<2x16xf32> -> vector<2x16xf32>
    %116 = arith.addf %110, %115 : vector<2x16xf32>
    %c0_124 = arith.constant 0 : index
    %c15_125 = arith.constant 15 : index
    %c0_126 = arith.constant 0 : index
    %117 = vector.load %arg14[%c0_124, %c15_125, %c0_126] : memref<2x16x128xbf16, #tpu.memory_space<vmem>>, vector<2x1x128xbf16>
    %118 = vector.shape_cast %117 : vector<2x1x128xbf16> to vector<2x128xbf16>
    %c15_127 = arith.constant 15 : index
    %c0_128 = arith.constant 0 : index
    %c0_129 = arith.constant 0 : index
    %119 = vector.load %arg4[%c15_127, %c0_128, %c0_129] : memref<16x128x16xbf16, #tpu.memory_space<vmem>>, vector<1x128x16xbf16>
    %120 = vector.shape_cast %119 : vector<1x128x16xbf16> to vector<128x16xbf16>
    %cst_130 = arith.constant dense<0.000000e+00> : vector<2x16xf32>
    %121 = tpu.matmul %118, %120, %cst_130 {dimension_numbers = #tpu.dot_dimension_numbers<[1], [0], [0], [1], [0, 0, 1, 1], [], []>} : vector<2x128xbf16>, vector<128x16xbf16>, vector<2x16xf32> -> vector<2x16xf32>
    %122 = arith.addf %116, %121 : vector<2x16xf32>
    %c0_131 = arith.constant 0 : index
    %c0_132 = arith.constant 0 : index
    %123 = vector.load %arg5[%c0_131, %c0_132] : memref<1x16xf32, #tpu.memory_space<vmem>>, vector<1x16xf32>
    %124 = vector.broadcast %123 : vector<1x16xf32> to vector<2x16xf32>
    %125 = arith.addf %122, %124 : vector<2x16xf32>
    %c0_133 = arith.constant 0 : index
    %c0_134 = arith.constant 0 : index
    %126 = vector.load %arg12[%c0_133, %c0_134] : memref<2x16xf32, #tpu.memory_space<vmem>>, vector<2x16xf32>
    tpu.vector_store %arg12[%c0_133, %c0_134], %125 {strides = array<i32>} : memref<2x16xf32, #tpu.memory_space<vmem>>, vector<2x16xf32>,
    %127 = vector.extract_strided_slice %125 {offsets = [0, 0], sizes = [2, 8], strides = [1, 1]} : vector<2x16xf32> to vector<2x8xf32>
    %128 = vector.extract_strided_slice %125 {offsets = [0, 8], sizes = [2, 8], strides = [1, 1]} : vector<2x16xf32> to vector<2x8xf32>
    %c0_135 = arith.constant 0 : index
    %c0_136 = arith.constant 0 : index
    %129 = vector.load %arg6[%c0_135, %c0_136] : memref<2x8xf32, #tpu.memory_space<vmem>>, vector<2x8xf32>
    %cst_137 = arith.constant 5.000000e-01 : f32
    %130 = vector.broadcast %cst_137 : f32 to vector<2x8xf32>
    %131 = arith.mulf %130, %128 : vector<2x8xf32>
    %132 = math.exp %131 : vector<2x8xf32>
    %133 = arith.mulf %129, %132 : vector<2x8xf32>
    %134 = arith.addf %127, %133 : vector<2x8xf32>
    %135 = arith.truncf %134 : vector<2x8xf32> to vector<2x8xbf16>
    %c0_138 = arith.constant 0 : index
    %c0_139 = arith.constant 0 : index
    %c0_140 = arith.constant 0 : index
    %136 = vector.load %arg7[%c0_138, %c0_139, %c0_140] : memref<16x8x128xbf16, #tpu.memory_space<vmem>>, vector<1x8x128xbf16>
    %137 = vector.shape_cast %136 : vector<1x8x128xbf16> to vector<8x128xbf16>
    %cst_141 = arith.constant dense<0.000000e+00> : vector<2x128xf32>
    %138 = tpu.matmul %135, %137, %cst_141 {dimension_numbers = #tpu.dot_dimension_numbers<[1], [0], [0], [1], [0, 0, 1, 1], [], []>} : vector<2x8xbf16>, vector<8x128xbf16>, vector<2x128xf32> -> vector<2x128xf32>
    %c0_142 = arith.constant 0 : index
    %c0_143 = arith.constant 0 : index
    %c0_144 = arith.constant 0 : index
    %139 = vector.load %arg8[%c0_142, %c0_143, %c0_144] : memref<16x1x128xf32, #tpu.memory_space<vmem>>, vector<1x1x128xf32>
    %140 = vector.shape_cast %139 : vector<1x1x128xf32> to vector<1x128xf32>
    %141 = vector.broadcast %140 : vector<1x128xf32> to vector<2x128xf32>
    %142 = arith.addf %138, %141 : vector<2x128xf32>
    %c0_145 = arith.constant 0 : index
    %c0_146 = arith.constant 0 : index
    %c0_147 = arith.constant 0 : index
    %143 = vector.load %arg15[%c0_145, %c0_146, %c0_147] : memref<2x16x128xf32, #tpu.memory_space<vmem>>, vector<2x1x128xf32>
    %144 = vector.shape_cast %143 : vector<2x1x128xf32> to vector<2x128xf32>
    %145 = vector.shape_cast %142 : vector<2x128xf32> to vector<2x1x128xf32>
    tpu.vector_store %arg15[%c0_145, %c0_146, %c0_147], %145 {strides = array<i32>} : memref<2x16x128xf32, #tpu.memory_space<vmem>>, vector<2x1x128xf32>,
    %c1_148 = arith.constant 1 : index
    %c0_149 = arith.constant 0 : index
    %c0_150 = arith.constant 0 : index
    %146 = vector.load %arg7[%c1_148, %c0_149, %c0_150] : memref<16x8x128xbf16, #tpu.memory_space<vmem>>, vector<1x8x128xbf16>
    %147 = vector.shape_cast %146 : vector<1x8x128xbf16> to vector<8x128xbf16>
    %cst_151 = arith.constant dense<0.000000e+00> : vector<2x128xf32>
    %148 = tpu.matmul %135, %147, %cst_151 {dimension_numbers = #tpu.dot_dimension_numbers<[1], [0], [0], [1], [0, 0, 1, 1], [], []>} : vector<2x8xbf16>, vector<8x128xbf16>, vector<2x128xf32> -> vector<2x128xf32>
    %c1_152 = arith.constant 1 : index
    %c0_153 = arith.constant 0 : index
    %c0_154 = arith.constant 0 : index
    %149 = vector.load %arg8[%c1_152, %c0_153, %c0_154] : memref<16x1x128xf32, #tpu.memory_space<vmem>>, vector<1x1x128xf32>
    %150 = vector.shape_cast %149 : vector<1x1x128xf32> to vector<1x128xf32>
    %151 = vector.broadcast %150 : vector<1x128xf32> to vector<2x128xf32>
    %152 = arith.addf %148, %151 : vector<2x128xf32>
    %c0_155 = arith.constant 0 : index
    %c1_156 = arith.constant 1 : index
    %c0_157 = arith.constant 0 : index
    %153 = vector.load %arg15[%c0_155, %c1_156, %c0_157] : memref<2x16x128xf32, #tpu.memory_space<vmem>>, vector<2x1x128xf32>
    %154 = vector.shape_cast %153 : vector<2x1x128xf32> to vector<2x128xf32>
    %155 = vector.shape_cast %152 : vector<2x128xf32> to vector<2x1x128xf32>
    tpu.vector_store %arg15[%c0_155, %c1_156, %c0_157], %155 {strides = array<i32>} : memref<2x16x128xf32, #tpu.memory_space<vmem>>, vector<2x1x128xf32>,
    %c2_158 = arith.constant 2 : index
    %c0_159 = arith.constant 0 : index
    %c0_160 = arith.constant 0 : index
    %156 = vector.load %arg7[%c2_158, %c0_159, %c0_160] : memref<16x8x128xbf16, #tpu.memory_space<vmem>>, vector<1x8x128xbf16>
    %157 = vector.shape_cast %156 : vector<1x8x128xbf16> to vector<8x128xbf16>
    %cst_161 = arith.constant dense<0.000000e+00> : vector<2x128xf32>
    %158 = tpu.matmul %135, %157, %cst_161 {dimension_numbers = #tpu.dot_dimension_numbers<[1], [0], [0], [1], [0, 0, 1, 1], [], []>} : vector<2x8xbf16>, vector<8x128xbf16>, vector<2x128xf32> -> vector<2x128xf32>
    %c2_162 = arith.constant 2 : index
    %c0_163 = arith.constant 0 : index
    %c0_164 = arith.constant 0 : index
    %159 = vector.load %arg8[%c2_162, %c0_163, %c0_164] : memref<16x1x128xf32, #tpu.memory_space<vmem>>, vector<1x1x128xf32>
    %160 = vector.shape_cast %159 : vector<1x1x128xf32> to vector<1x128xf32>
    %161 = vector.broadcast %160 : vector<1x128xf32> to vector<2x128xf32>
    %162 = arith.addf %158, %161 : vector<2x128xf32>
    %c0_165 = arith.constant 0 : index
    %c2_166 = arith.constant 2 : index
    %c0_167 = arith.constant 0 : index
    %163 = vector.load %arg15[%c0_165, %c2_166, %c0_167] : memref<2x16x128xf32, #tpu.memory_space<vmem>>, vector<2x1x128xf32>
    %164 = vector.shape_cast %163 : vector<2x1x128xf32> to vector<2x128xf32>
    %165 = vector.shape_cast %162 : vector<2x128xf32> to vector<2x1x128xf32>
    tpu.vector_store %arg15[%c0_165, %c2_166, %c0_167], %165 {strides = array<i32>} : memref<2x16x128xf32, #tpu.memory_space<vmem>>, vector<2x1x128xf32>,
    %c3_168 = arith.constant 3 : index
    %c0_169 = arith.constant 0 : index
    %c0_170 = arith.constant 0 : index
    %166 = vector.load %arg7[%c3_168, %c0_169, %c0_170] : memref<16x8x128xbf16, #tpu.memory_space<vmem>>, vector<1x8x128xbf16>
    %167 = vector.shape_cast %166 : vector<1x8x128xbf16> to vector<8x128xbf16>
    %cst_171 = arith.constant dense<0.000000e+00> : vector<2x128xf32>
    %168 = tpu.matmul %135, %167, %cst_171 {dimension_numbers = #tpu.dot_dimension_numbers<[1], [0], [0], [1], [0, 0, 1, 1], [], []>} : vector<2x8xbf16>, vector<8x128xbf16>, vector<2x128xf32> -> vector<2x128xf32>
    %c3_172 = arith.constant 3 : index
    %c0_173 = arith.constant 0 : index
    %c0_174 = arith.constant 0 : index
    %169 = vector.load %arg8[%c3_172, %c0_173, %c0_174] : memref<16x1x128xf32, #tpu.memory_space<vmem>>, vector<1x1x128xf32>
    %170 = vector.shape_cast %169 : vector<1x1x128xf32> to vector<1x128xf32>
    %171 = vector.broadcast %170 : vector<1x128xf32> to vector<2x128xf32>
    %172 = arith.addf %168, %171 : vector<2x128xf32>
    %c0_175 = arith.constant 0 : index
    %c3_176 = arith.constant 3 : index
    %c0_177 = arith.constant 0 : index
    %173 = vector.load %arg15[%c0_175, %c3_176, %c0_177] : memref<2x16x128xf32, #tpu.memory_space<vmem>>, vector<2x1x128xf32>
    %174 = vector.shape_cast %173 : vector<2x1x128xf32> to vector<2x128xf32>
    %175 = vector.shape_cast %172 : vector<2x128xf32> to vector<2x1x128xf32>
    tpu.vector_store %arg15[%c0_175, %c3_176, %c0_177], %175 {strides = array<i32>} : memref<2x16x128xf32, #tpu.memory_space<vmem>>, vector<2x1x128xf32>,
    %c4_178 = arith.constant 4 : index
    %c0_179 = arith.constant 0 : index
    %c0_180 = arith.constant 0 : index
    %176 = vector.load %arg7[%c4_178, %c0_179, %c0_180] : memref<16x8x128xbf16, #tpu.memory_space<vmem>>, vector<1x8x128xbf16>
    %177 = vector.shape_cast %176 : vector<1x8x128xbf16> to vector<8x128xbf16>
    %cst_181 = arith.constant dense<0.000000e+00> : vector<2x128xf32>
    %178 = tpu.matmul %135, %177, %cst_181 {dimension_numbers = #tpu.dot_dimension_numbers<[1], [0], [0], [1], [0, 0, 1, 1], [], []>} : vector<2x8xbf16>, vector<8x128xbf16>, vector<2x128xf32> -> vector<2x128xf32>
    %c4_182 = arith.constant 4 : index
    %c0_183 = arith.constant 0 : index
    %c0_184 = arith.constant 0 : index
    %179 = vector.load %arg8[%c4_182, %c0_183, %c0_184] : memref<16x1x128xf32, #tpu.memory_space<vmem>>, vector<1x1x128xf32>
    %180 = vector.shape_cast %179 : vector<1x1x128xf32> to vector<1x128xf32>
    %181 = vector.broadcast %180 : vector<1x128xf32> to vector<2x128xf32>
    %182 = arith.addf %178, %181 : vector<2x128xf32>
    %c0_185 = arith.constant 0 : index
    %c4_186 = arith.constant 4 : index
    %c0_187 = arith.constant 0 : index
    %183 = vector.load %arg15[%c0_185, %c4_186, %c0_187] : memref<2x16x128xf32, #tpu.memory_space<vmem>>, vector<2x1x128xf32>
    %184 = vector.shape_cast %183 : vector<2x1x128xf32> to vector<2x128xf32>
    %185 = vector.shape_cast %182 : vector<2x128xf32> to vector<2x1x128xf32>
    tpu.vector_store %arg15[%c0_185, %c4_186, %c0_187], %185 {strides = array<i32>} : memref<2x16x128xf32, #tpu.memory_space<vmem>>, vector<2x1x128xf32>,
    %c5_188 = arith.constant 5 : index
    %c0_189 = arith.constant 0 : index
    %c0_190 = arith.constant 0 : index
    %186 = vector.load %arg7[%c5_188, %c0_189, %c0_190] : memref<16x8x128xbf16, #tpu.memory_space<vmem>>, vector<1x8x128xbf16>
    %187 = vector.shape_cast %186 : vector<1x8x128xbf16> to vector<8x128xbf16>
    %cst_191 = arith.constant dense<0.000000e+00> : vector<2x128xf32>
    %188 = tpu.matmul %135, %187, %cst_191 {dimension_numbers = #tpu.dot_dimension_numbers<[1], [0], [0], [1], [0, 0, 1, 1], [], []>} : vector<2x8xbf16>, vector<8x128xbf16>, vector<2x128xf32> -> vector<2x128xf32>
    %c5_192 = arith.constant 5 : index
    %c0_193 = arith.constant 0 : index
    %c0_194 = arith.constant 0 : index
    %189 = vector.load %arg8[%c5_192, %c0_193, %c0_194] : memref<16x1x128xf32, #tpu.memory_space<vmem>>, vector<1x1x128xf32>
    %190 = vector.shape_cast %189 : vector<1x1x128xf32> to vector<1x128xf32>
    %191 = vector.broadcast %190 : vector<1x128xf32> to vector<2x128xf32>
    %192 = arith.addf %188, %191 : vector<2x128xf32>
    %c0_195 = arith.constant 0 : index
    %c5_196 = arith.constant 5 : index
    %c0_197 = arith.constant 0 : index
    %193 = vector.load %arg15[%c0_195, %c5_196, %c0_197] : memref<2x16x128xf32, #tpu.memory_space<vmem>>, vector<2x1x128xf32>
    %194 = vector.shape_cast %193 : vector<2x1x128xf32> to vector<2x128xf32>
    %195 = vector.shape_cast %192 : vector<2x128xf32> to vector<2x1x128xf32>
    tpu.vector_store %arg15[%c0_195, %c5_196, %c0_197], %195 {strides = array<i32>} : memref<2x16x128xf32, #tpu.memory_space<vmem>>, vector<2x1x128xf32>,
    %c6_198 = arith.constant 6 : index
    %c0_199 = arith.constant 0 : index
    %c0_200 = arith.constant 0 : index
    %196 = vector.load %arg7[%c6_198, %c0_199, %c0_200] : memref<16x8x128xbf16, #tpu.memory_space<vmem>>, vector<1x8x128xbf16>
    %197 = vector.shape_cast %196 : vector<1x8x128xbf16> to vector<8x128xbf16>
    %cst_201 = arith.constant dense<0.000000e+00> : vector<2x128xf32>
    %198 = tpu.matmul %135, %197, %cst_201 {dimension_numbers = #tpu.dot_dimension_numbers<[1], [0], [0], [1], [0, 0, 1, 1], [], []>} : vector<2x8xbf16>, vector<8x128xbf16>, vector<2x128xf32> -> vector<2x128xf32>
    %c6_202 = arith.constant 6 : index
    %c0_203 = arith.constant 0 : index
    %c0_204 = arith.constant 0 : index
    %199 = vector.load %arg8[%c6_202, %c0_203, %c0_204] : memref<16x1x128xf32, #tpu.memory_space<vmem>>, vector<1x1x128xf32>
    %200 = vector.shape_cast %199 : vector<1x1x128xf32> to vector<1x128xf32>
    %201 = vector.broadcast %200 : vector<1x128xf32> to vector<2x128xf32>
    %202 = arith.addf %198, %201 : vector<2x128xf32>
    %c0_205 = arith.constant 0 : index
    %c6_206 = arith.constant 6 : index
    %c0_207 = arith.constant 0 : index
    %203 = vector.load %arg15[%c0_205, %c6_206, %c0_207] : memref<2x16x128xf32, #tpu.memory_space<vmem>>, vector<2x1x128xf32>
    %204 = vector.shape_cast %203 : vector<2x1x128xf32> to vector<2x128xf32>
    %205 = vector.shape_cast %202 : vector<2x128xf32> to vector<2x1x128xf32>
    tpu.vector_store %arg15[%c0_205, %c6_206, %c0_207], %205 {strides = array<i32>} : memref<2x16x128xf32, #tpu.memory_space<vmem>>, vector<2x1x128xf32>,
    %c7_208 = arith.constant 7 : index
    %c0_209 = arith.constant 0 : index
    %c0_210 = arith.constant 0 : index
    %206 = vector.load %arg7[%c7_208, %c0_209, %c0_210] : memref<16x8x128xbf16, #tpu.memory_space<vmem>>, vector<1x8x128xbf16>
    %207 = vector.shape_cast %206 : vector<1x8x128xbf16> to vector<8x128xbf16>
    %cst_211 = arith.constant dense<0.000000e+00> : vector<2x128xf32>
    %208 = tpu.matmul %135, %207, %cst_211 {dimension_numbers = #tpu.dot_dimension_numbers<[1], [0], [0], [1], [0, 0, 1, 1], [], []>} : vector<2x8xbf16>, vector<8x128xbf16>, vector<2x128xf32> -> vector<2x128xf32>
    %c7_212 = arith.constant 7 : index
    %c0_213 = arith.constant 0 : index
    %c0_214 = arith.constant 0 : index
    %209 = vector.load %arg8[%c7_212, %c0_213, %c0_214] : memref<16x1x128xf32, #tpu.memory_space<vmem>>, vector<1x1x128xf32>
    %210 = vector.shape_cast %209 : vector<1x1x128xf32> to vector<1x128xf32>
    %211 = vector.broadcast %210 : vector<1x128xf32> to vector<2x128xf32>
    %212 = arith.addf %208, %211 : vector<2x128xf32>
    %c0_215 = arith.constant 0 : index
    %c7_216 = arith.constant 7 : index
    %c0_217 = arith.constant 0 : index
    %213 = vector.load %arg15[%c0_215, %c7_216, %c0_217] : memref<2x16x128xf32, #tpu.memory_space<vmem>>, vector<2x1x128xf32>
    %214 = vector.shape_cast %213 : vector<2x1x128xf32> to vector<2x128xf32>
    %215 = vector.shape_cast %212 : vector<2x128xf32> to vector<2x1x128xf32>
    tpu.vector_store %arg15[%c0_215, %c7_216, %c0_217], %215 {strides = array<i32>} : memref<2x16x128xf32, #tpu.memory_space<vmem>>, vector<2x1x128xf32>,
    %c8_218 = arith.constant 8 : index
    %c0_219 = arith.constant 0 : index
    %c0_220 = arith.constant 0 : index
    %216 = vector.load %arg7[%c8_218, %c0_219, %c0_220] : memref<16x8x128xbf16, #tpu.memory_space<vmem>>, vector<1x8x128xbf16>
    %217 = vector.shape_cast %216 : vector<1x8x128xbf16> to vector<8x128xbf16>
    %cst_221 = arith.constant dense<0.000000e+00> : vector<2x128xf32>
    %218 = tpu.matmul %135, %217, %cst_221 {dimension_numbers = #tpu.dot_dimension_numbers<[1], [0], [0], [1], [0, 0, 1, 1], [], []>} : vector<2x8xbf16>, vector<8x128xbf16>, vector<2x128xf32> -> vector<2x128xf32>
    %c8_222 = arith.constant 8 : index
    %c0_223 = arith.constant 0 : index
    %c0_224 = arith.constant 0 : index
    %219 = vector.load %arg8[%c8_222, %c0_223, %c0_224] : memref<16x1x128xf32, #tpu.memory_space<vmem>>, vector<1x1x128xf32>
    %220 = vector.shape_cast %219 : vector<1x1x128xf32> to vector<1x128xf32>
    %221 = vector.broadcast %220 : vector<1x128xf32> to vector<2x128xf32>
    %222 = arith.addf %218, %221 : vector<2x128xf32>
    %c0_225 = arith.constant 0 : index
    %c8_226 = arith.constant 8 : index
    %c0_227 = arith.constant 0 : index
    %223 = vector.load %arg15[%c0_225, %c8_226, %c0_227] : memref<2x16x128xf32, #tpu.memory_space<vmem>>, vector<2x1x128xf32>
    %224 = vector.shape_cast %223 : vector<2x1x128xf32> to vector<2x128xf32>
    %225 = vector.shape_cast %222 : vector<2x128xf32> to vector<2x1x128xf32>
    tpu.vector_store %arg15[%c0_225, %c8_226, %c0_227], %225 {strides = array<i32>} : memref<2x16x128xf32, #tpu.memory_space<vmem>>, vector<2x1x128xf32>,
    %c9_228 = arith.constant 9 : index
    %c0_229 = arith.constant 0 : index
    %c0_230 = arith.constant 0 : index
    %226 = vector.load %arg7[%c9_228, %c0_229, %c0_230] : memref<16x8x128xbf16, #tpu.memory_space<vmem>>, vector<1x8x128xbf16>
    %227 = vector.shape_cast %226 : vector<1x8x128xbf16> to vector<8x128xbf16>
    %cst_231 = arith.constant dense<0.000000e+00> : vector<2x128xf32>
    %228 = tpu.matmul %135, %227, %cst_231 {dimension_numbers = #tpu.dot_dimension_numbers<[1], [0], [0], [1], [0, 0, 1, 1], [], []>} : vector<2x8xbf16>, vector<8x128xbf16>, vector<2x128xf32> -> vector<2x128xf32>
    %c9_232 = arith.constant 9 : index
    %c0_233 = arith.constant 0 : index
    %c0_234 = arith.constant 0 : index
    %229 = vector.load %arg8[%c9_232, %c0_233, %c0_234] : memref<16x1x128xf32, #tpu.memory_space<vmem>>, vector<1x1x128xf32>
    %230 = vector.shape_cast %229 : vector<1x1x128xf32> to vector<1x128xf32>
    %231 = vector.broadcast %230 : vector<1x128xf32> to vector<2x128xf32>
    %232 = arith.addf %228, %231 : vector<2x128xf32>
    %c0_235 = arith.constant 0 : index
    %c9_236 = arith.constant 9 : index
    %c0_237 = arith.constant 0 : index
    %233 = vector.load %arg15[%c0_235, %c9_236, %c0_237] : memref<2x16x128xf32, #tpu.memory_space<vmem>>, vector<2x1x128xf32>
    %234 = vector.shape_cast %233 : vector<2x1x128xf32> to vector<2x128xf32>
    %235 = vector.shape_cast %232 : vector<2x128xf32> to vector<2x1x128xf32>
    tpu.vector_store %arg15[%c0_235, %c9_236, %c0_237], %235 {strides = array<i32>} : memref<2x16x128xf32, #tpu.memory_space<vmem>>, vector<2x1x128xf32>,
    %c10_238 = arith.constant 10 : index
    %c0_239 = arith.constant 0 : index
    %c0_240 = arith.constant 0 : index
    %236 = vector.load %arg7[%c10_238, %c0_239, %c0_240] : memref<16x8x128xbf16, #tpu.memory_space<vmem>>, vector<1x8x128xbf16>
    %237 = vector.shape_cast %236 : vector<1x8x128xbf16> to vector<8x128xbf16>
    %cst_241 = arith.constant dense<0.000000e+00> : vector<2x128xf32>
    %238 = tpu.matmul %135, %237, %cst_241 {dimension_numbers = #tpu.dot_dimension_numbers<[1], [0], [0], [1], [0, 0, 1, 1], [], []>} : vector<2x8xbf16>, vector<8x128xbf16>, vector<2x128xf32> -> vector<2x128xf32>
    %c10_242 = arith.constant 10 : index
    %c0_243 = arith.constant 0 : index
    %c0_244 = arith.constant 0 : index
    %239 = vector.load %arg8[%c10_242, %c0_243, %c0_244] : memref<16x1x128xf32, #tpu.memory_space<vmem>>, vector<1x1x128xf32>
    %240 = vector.shape_cast %239 : vector<1x1x128xf32> to vector<1x128xf32>
    %241 = vector.broadcast %240 : vector<1x128xf32> to vector<2x128xf32>
    %242 = arith.addf %238, %241 : vector<2x128xf32>
    %c0_245 = arith.constant 0 : index
    %c10_246 = arith.constant 10 : index
    %c0_247 = arith.constant 0 : index
    %243 = vector.load %arg15[%c0_245, %c10_246, %c0_247] : memref<2x16x128xf32, #tpu.memory_space<vmem>>, vector<2x1x128xf32>
    %244 = vector.shape_cast %243 : vector<2x1x128xf32> to vector<2x128xf32>
    %245 = vector.shape_cast %242 : vector<2x128xf32> to vector<2x1x128xf32>
    tpu.vector_store %arg15[%c0_245, %c10_246, %c0_247], %245 {strides = array<i32>} : memref<2x16x128xf32, #tpu.memory_space<vmem>>, vector<2x1x128xf32>,
    %c11_248 = arith.constant 11 : index
    %c0_249 = arith.constant 0 : index
    %c0_250 = arith.constant 0 : index
    %246 = vector.load %arg7[%c11_248, %c0_249, %c0_250] : memref<16x8x128xbf16, #tpu.memory_space<vmem>>, vector<1x8x128xbf16>
    %247 = vector.shape_cast %246 : vector<1x8x128xbf16> to vector<8x128xbf16>
    %cst_251 = arith.constant dense<0.000000e+00> : vector<2x128xf32>
    %248 = tpu.matmul %135, %247, %cst_251 {dimension_numbers = #tpu.dot_dimension_numbers<[1], [0], [0], [1], [0, 0, 1, 1], [], []>} : vector<2x8xbf16>, vector<8x128xbf16>, vector<2x128xf32> -> vector<2x128xf32>
    %c11_252 = arith.constant 11 : index
    %c0_253 = arith.constant 0 : index
    %c0_254 = arith.constant 0 : index
    %249 = vector.load %arg8[%c11_252, %c0_253, %c0_254] : memref<16x1x128xf32, #tpu.memory_space<vmem>>, vector<1x1x128xf32>
    %250 = vector.shape_cast %249 : vector<1x1x128xf32> to vector<1x128xf32>
    %251 = vector.broadcast %250 : vector<1x128xf32> to vector<2x128xf32>
    %252 = arith.addf %248, %251 : vector<2x128xf32>
    %c0_255 = arith.constant 0 : index
    %c11_256 = arith.constant 11 : index
    %c0_257 = arith.constant 0 : index
    %253 = vector.load %arg15[%c0_255, %c11_256, %c0_257] : memref<2x16x128xf32, #tpu.memory_space<vmem>>, vector<2x1x128xf32>
    %254 = vector.shape_cast %253 : vector<2x1x128xf32> to vector<2x128xf32>
    %255 = vector.shape_cast %252 : vector<2x128xf32> to vector<2x1x128xf32>
    tpu.vector_store %arg15[%c0_255, %c11_256, %c0_257], %255 {strides = array<i32>} : memref<2x16x128xf32, #tpu.memory_space<vmem>>, vector<2x1x128xf32>,
    %c12_258 = arith.constant 12 : index
    %c0_259 = arith.constant 0 : index
    %c0_260 = arith.constant 0 : index
    %256 = vector.load %arg7[%c12_258, %c0_259, %c0_260] : memref<16x8x128xbf16, #tpu.memory_space<vmem>>, vector<1x8x128xbf16>
    %257 = vector.shape_cast %256 : vector<1x8x128xbf16> to vector<8x128xbf16>
    %cst_261 = arith.constant dense<0.000000e+00> : vector<2x128xf32>
    %258 = tpu.matmul %135, %257, %cst_261 {dimension_numbers = #tpu.dot_dimension_numbers<[1], [0], [0], [1], [0, 0, 1, 1], [], []>} : vector<2x8xbf16>, vector<8x128xbf16>, vector<2x128xf32> -> vector<2x128xf32>
    %c12_262 = arith.constant 12 : index
    %c0_263 = arith.constant 0 : index
    %c0_264 = arith.constant 0 : index
    %259 = vector.load %arg8[%c12_262, %c0_263, %c0_264] : memref<16x1x128xf32, #tpu.memory_space<vmem>>, vector<1x1x128xf32>
    %260 = vector.shape_cast %259 : vector<1x1x128xf32> to vector<1x128xf32>
    %261 = vector.broadcast %260 : vector<1x128xf32> to vector<2x128xf32>
    %262 = arith.addf %258, %261 : vector<2x128xf32>
    %c0_265 = arith.constant 0 : index
    %c12_266 = arith.constant 12 : index
    %c0_267 = arith.constant 0 : index
    %263 = vector.load %arg15[%c0_265, %c12_266, %c0_267] : memref<2x16x128xf32, #tpu.memory_space<vmem>>, vector<2x1x128xf32>
    %264 = vector.shape_cast %263 : vector<2x1x128xf32> to vector<2x128xf32>
    %265 = vector.shape_cast %262 : vector<2x128xf32> to vector<2x1x128xf32>
    tpu.vector_store %arg15[%c0_265, %c12_266, %c0_267], %265 {strides = array<i32>} : memref<2x16x128xf32, #tpu.memory_space<vmem>>, vector<2x1x128xf32>,
    %c13_268 = arith.constant 13 : index
    %c0_269 = arith.constant 0 : index
    %c0_270 = arith.constant 0 : index
    %266 = vector.load %arg7[%c13_268, %c0_269, %c0_270] : memref<16x8x128xbf16, #tpu.memory_space<vmem>>, vector<1x8x128xbf16>
    %267 = vector.shape_cast %266 : vector<1x8x128xbf16> to vector<8x128xbf16>
    %cst_271 = arith.constant dense<0.000000e+00> : vector<2x128xf32>
    %268 = tpu.matmul %135, %267, %cst_271 {dimension_numbers = #tpu.dot_dimension_numbers<[1], [0], [0], [1], [0, 0, 1, 1], [], []>} : vector<2x8xbf16>, vector<8x128xbf16>, vector<2x128xf32> -> vector<2x128xf32>
    %c13_272 = arith.constant 13 : index
    %c0_273 = arith.constant 0 : index
    %c0_274 = arith.constant 0 : index
    %269 = vector.load %arg8[%c13_272, %c0_273, %c0_274] : memref<16x1x128xf32, #tpu.memory_space<vmem>>, vector<1x1x128xf32>
    %270 = vector.shape_cast %269 : vector<1x1x128xf32> to vector<1x128xf32>
    %271 = vector.broadcast %270 : vector<1x128xf32> to vector<2x128xf32>
    %272 = arith.addf %268, %271 : vector<2x128xf32>
    %c0_275 = arith.constant 0 : index
    %c13_276 = arith.constant 13 : index
    %c0_277 = arith.constant 0 : index
    %273 = vector.load %arg15[%c0_275, %c13_276, %c0_277] : memref<2x16x128xf32, #tpu.memory_space<vmem>>, vector<2x1x128xf32>
    %274 = vector.shape_cast %273 : vector<2x1x128xf32> to vector<2x128xf32>
    %275 = vector.shape_cast %272 : vector<2x128xf32> to vector<2x1x128xf32>
    tpu.vector_store %arg15[%c0_275, %c13_276, %c0_277], %275 {strides = array<i32>} : memref<2x16x128xf32, #tpu.memory_space<vmem>>, vector<2x1x128xf32>,
    %c14_278 = arith.constant 14 : index
    %c0_279 = arith.constant 0 : index
    %c0_280 = arith.constant 0 : index
    %276 = vector.load %arg7[%c14_278, %c0_279, %c0_280] : memref<16x8x128xbf16, #tpu.memory_space<vmem>>, vector<1x8x128xbf16>
    %277 = vector.shape_cast %276 : vector<1x8x128xbf16> to vector<8x128xbf16>
    %cst_281 = arith.constant dense<0.000000e+00> : vector<2x128xf32>
    %278 = tpu.matmul %135, %277, %cst_281 {dimension_numbers = #tpu.dot_dimension_numbers<[1], [0], [0], [1], [0, 0, 1, 1], [], []>} : vector<2x8xbf16>, vector<8x128xbf16>, vector<2x128xf32> -> vector<2x128xf32>
    %c14_282 = arith.constant 14 : index
    %c0_283 = arith.constant 0 : index
    %c0_284 = arith.constant 0 : index
    %279 = vector.load %arg8[%c14_282, %c0_283, %c0_284] : memref<16x1x128xf32, #tpu.memory_space<vmem>>, vector<1x1x128xf32>
    %280 = vector.shape_cast %279 : vector<1x1x128xf32> to vector<1x128xf32>
    %281 = vector.broadcast %280 : vector<1x128xf32> to vector<2x128xf32>
    %282 = arith.addf %278, %281 : vector<2x128xf32>
    %c0_285 = arith.constant 0 : index
    %c14_286 = arith.constant 14 : index
    %c0_287 = arith.constant 0 : index
    %283 = vector.load %arg15[%c0_285, %c14_286, %c0_287] : memref<2x16x128xf32, #tpu.memory_space<vmem>>, vector<2x1x128xf32>
    %284 = vector.shape_cast %283 : vector<2x1x128xf32> to vector<2x128xf32>
    %285 = vector.shape_cast %282 : vector<2x128xf32> to vector<2x1x128xf32>
    tpu.vector_store %arg15[%c0_285, %c14_286, %c0_287], %285 {strides = array<i32>} : memref<2x16x128xf32, #tpu.memory_space<vmem>>, vector<2x1x128xf32>,
    %c15_288 = arith.constant 15 : index
    %c0_289 = arith.constant 0 : index
    %c0_290 = arith.constant 0 : index
    %286 = vector.load %arg7[%c15_288, %c0_289, %c0_290] : memref<16x8x128xbf16, #tpu.memory_space<vmem>>, vector<1x8x128xbf16>
    %287 = vector.shape_cast %286 : vector<1x8x128xbf16> to vector<8x128xbf16>
    %cst_291 = arith.constant dense<0.000000e+00> : vector<2x128xf32>
    %288 = tpu.matmul %135, %287, %cst_291 {dimension_numbers = #tpu.dot_dimension_numbers<[1], [0], [0], [1], [0, 0, 1, 1], [], []>} : vector<2x8xbf16>, vector<8x128xbf16>, vector<2x128xf32> -> vector<2x128xf32>
    %c15_292 = arith.constant 15 : index
    %c0_293 = arith.constant 0 : index
    %c0_294 = arith.constant 0 : index
    %289 = vector.load %arg8[%c15_292, %c0_293, %c0_294] : memref<16x1x128xf32, #tpu.memory_space<vmem>>, vector<1x1x128xf32>
    %290 = vector.shape_cast %289 : vector<1x1x128xf32> to vector<1x128xf32>
    %291 = vector.broadcast %290 : vector<1x128xf32> to vector<2x128xf32>
    %292 = arith.addf %288, %291 : vector<2x128xf32>
    %c0_295 = arith.constant 0 : index
    %c15_296 = arith.constant 15 : index
    %c0_297 = arith.constant 0 : index
    %293 = vector.load %arg15[%c0_295, %c15_296, %c0_297] : memref<2x16x128xf32, #tpu.memory_space<vmem>>, vector<2x1x128xf32>
    %294 = vector.shape_cast %293 : vector<2x1x128xf32> to vector<2x128xf32>
    %295 = vector.shape_cast %292 : vector<2x128xf32> to vector<2x1x128xf32>
    tpu.vector_store %arg15[%c0_295, %c15_296, %c0_297], %295 {strides = array<i32>} : memref<2x16x128xf32, #tpu.memory_space<vmem>>, vector<2x1x128xf32>,
    %c0_298 = arith.constant 0 : index
    %c0_299 = arith.constant 0 : index
    %c0_300 = arith.constant 0 : index
    %296 = vector.load %arg15[%c0_298, %c0_299, %c0_300] : memref<2x16x128xf32, #tpu.memory_space<vmem>>, vector<2x16x128xf32>
    %297 = arith.truncf %296 : vector<2x16x128xf32> to vector<2x16x128xbf16>
    %298 = vector.shape_cast %297 : vector<2x16x128xbf16> to vector<32x128xbf16>
    %c0_301 = arith.constant 0 : index
    %c0_302 = arith.constant 0 : index
    %299 = vector.load %arg9[%c0_301, %c0_302] : memref<128x192xbf16, #tpu.memory_space<vmem>>, vector<128x192xbf16>
    %cst_303 = arith.constant dense<0.000000e+00> : vector<32x192xf32>
    %300 = tpu.matmul %298, %299, %cst_303 {dimension_numbers = #tpu.dot_dimension_numbers<[1], [0], [0], [1], [0, 0, 1, 1], [], []>} : vector<32x128xbf16>, vector<128x192xbf16>, vector<32x192xf32> -> vector<32x192xf32>
    %cst_304 = arith.constant 0.000000e+00 : f32
    %301 = vector.broadcast %cst_304 : f32 to vector<2x192xf32>
    %c0_305 = arith.constant 0 : index
    %c0_306 = arith.constant 0 : index
    %c0_307 = arith.constant 0 : index
    %302 = vector.load %arg16[%c0_305, %c0_306, %c0_307] : memref<2x18x192xf32, #tpu.memory_space<vmem>>, vector<2x1x192xf32>
    %303 = vector.shape_cast %302 : vector<2x1x192xf32> to vector<2x192xf32>
    %304 = vector.shape_cast %301 : vector<2x192xf32> to vector<2x1x192xf32>
    tpu.vector_store %arg16[%c0_305, %c0_306, %c0_307], %304 {strides = array<i32>} : memref<2x18x192xf32, #tpu.memory_space<vmem>>, vector<2x1x192xf32>,
    %c0_308 = arith.constant 0 : index
    %c17 = arith.constant 17 : index
    %c0_309 = arith.constant 0 : index
    %305 = vector.load %arg16[%c0_308, %c17, %c0_309] : memref<2x18x192xf32, #tpu.memory_space<vmem>>, vector<2x1x192xf32>
    %306 = vector.shape_cast %305 : vector<2x1x192xf32> to vector<2x192xf32>
    %307 = vector.shape_cast %301 : vector<2x192xf32> to vector<2x1x192xf32>
    tpu.vector_store %arg16[%c0_308, %c17, %c0_309], %307 {strides = array<i32>} : memref<2x18x192xf32, #tpu.memory_space<vmem>>, vector<2x1x192xf32>,
    %308 = vector.shape_cast %300 : vector<32x192xf32> to vector<2x16x192xf32>
    %c0_310 = arith.constant 0 : index
    %c1_311 = arith.constant 1 : index
    %c0_312 = arith.constant 0 : index
    %309 = vector.load %arg16[%c0_310, %c1_311, %c0_312] : memref<2x18x192xf32, #tpu.memory_space<vmem>>, vector<2x16x192xf32>
    tpu.vector_store %arg16[%c0_310, %c1_311, %c0_312], %308 {strides = array<i32>} : memref<2x18x192xf32, #tpu.memory_space<vmem>>, vector<2x16x192xf32>,
    %c0_313 = arith.constant 0 : index
    %c0_314 = arith.constant 0 : index
    %c0_315 = arith.constant 0 : index
    %310 = vector.load %arg16[%c0_313, %c0_314, %c0_315] : memref<2x18x192xf32, #tpu.memory_space<vmem>>, vector<2x16x64xf32>
    %c0_316 = arith.constant 0 : index
    %c1_317 = arith.constant 1 : index
    %c64_318 = arith.constant 64 : index
    %311 = vector.load %arg16[%c0_316, %c1_317, %c64_318] : memref<2x18x192xf32, #tpu.memory_space<vmem>>, vector<2x16x64xf32>
    %312 = arith.addf %310, %311 : vector<2x16x64xf32>
    %c0_319 = arith.constant 0 : index
    %c2_320 = arith.constant 2 : index
    %c128_321 = arith.constant 128 : index
    %313 = vector.load %arg16[%c0_319, %c2_320, %c128_321] : memref<2x18x192xf32, #tpu.memory_space<vmem>>, vector<2x16x64xf32>
    %314 = arith.addf %312, %313 : vector<2x16x64xf32>
    %c0_322 = arith.constant 0 : index
    %c0_323 = arith.constant 0 : index
    %315 = vector.load %arg10[%c0_322, %c0_323] : memref<1x64xf32, #tpu.memory_space<vmem>>, vector<1x64xf32>
    %316 = vector.shape_cast %315 : vector<1x64xf32> to vector<1x1x64xf32>
    %317 = vector.broadcast %316 : vector<1x1x64xf32> to vector<2x16x64xf32>
    %318 = arith.addf %314, %317 : vector<2x16x64xf32>
    %319 = math.tanh %318 : vector<2x16x64xf32>
    %320 = vector.shape_cast %319 : vector<2x16x64xf32> to vector<32x64xf32>
    %c0_324 = arith.constant 0 : index
    %c0_325 = arith.constant 0 : index
    %321 = vector.load %arg11[%c0_324, %c0_325] : memref<32x64xf32, #tpu.memory_space<vmem>>, vector<32x64xf32>
    tpu.vector_store %arg11[%c0_324, %c0_325], %320 {strides = array<i32>} : memref<32x64xf32, #tpu.memory_space<vmem>>, vector<32x64xf32>,
    return
  }
  func.func @transform_0(%arg0: i32) -> (i32, i32, i32) {
    %c0_i32 = arith.constant 0 : i32
    %c0_i32_0 = arith.constant 0 : i32
    %c0_i32_1 = arith.constant 0 : i32
    return %arg0, %c0_i32, %c0_i32_0 : i32, i32, i32
  }
  func.func @transform_1(%arg0: i32) -> (i32, i32) {
    %c0_i32 = arith.constant 0 : i32
    %c0_i32_0 = arith.constant 0 : i32
    %c0_i32_1 = arith.constant 0 : i32
    return %c0_i32, %c0_i32_0 : i32, i32
  }
  func.func @transform_2(%arg0: i32) -> (i32, i32) {
    %c0_i32 = arith.constant 0 : i32
    %c0_i32_0 = arith.constant 0 : i32
    %c0_i32_1 = arith.constant 0 : i32
    return %c0_i32, %c0_i32_0 : i32, i32
  }
  func.func @transform_3(%arg0: i32) -> (i32, i32, i32) {
    %c0_i32 = arith.constant 0 : i32
    %c0_i32_0 = arith.constant 0 : i32
    %c0_i32_1 = arith.constant 0 : i32
    %c0_i32_2 = arith.constant 0 : i32
    return %c0_i32, %c0_i32_0, %c0_i32_1 : i32, i32, i32
  }
  func.func @transform_4(%arg0: i32) -> (i32, i32) {
    %c0_i32 = arith.constant 0 : i32
    %c0_i32_0 = arith.constant 0 : i32
    %c0_i32_1 = arith.constant 0 : i32
    return %c0_i32, %c0_i32_0 : i32, i32
  }
  func.func @transform_5(%arg0: i32) -> (i32, i32) {
    %c0_i32 = arith.constant 0 : i32
    %c0_i32_0 = arith.constant 0 : i32
    return %arg0, %c0_i32 : i32, i32
  }
  func.func @transform_6(%arg0: i32) -> (i32, i32, i32) {
    %c0_i32 = arith.constant 0 : i32
    %c0_i32_0 = arith.constant 0 : i32
    %c0_i32_1 = arith.constant 0 : i32
    %c0_i32_2 = arith.constant 0 : i32
    return %c0_i32, %c0_i32_0, %c0_i32_1 : i32, i32, i32
  }
  func.func @transform_7(%arg0: i32) -> (i32, i32, i32) {
    %c0_i32 = arith.constant 0 : i32
    %c0_i32_0 = arith.constant 0 : i32
    %c0_i32_1 = arith.constant 0 : i32
    %c0_i32_2 = arith.constant 0 : i32
    return %c0_i32, %c0_i32_0, %c0_i32_1 : i32, i32, i32
  }
  func.func @transform_8(%arg0: i32) -> (i32, i32) {
    %c0_i32 = arith.constant 0 : i32
    %c0_i32_0 = arith.constant 0 : i32
    %c0_i32_1 = arith.constant 0 : i32
    return %c0_i32, %c0_i32_0 : i32, i32
  }
  func.func @transform_9(%arg0: i32) -> (i32, i32) {
    %c0_i32 = arith.constant 0 : i32
    %c0_i32_0 = arith.constant 0 : i32
    %c0_i32_1 = arith.constant 0 : i32
    return %c0_i32, %c0_i32_0 : i32, i32
  }
  func.func @transform_10(%arg0: i32) -> (i32, i32) {
    %c0_i32 = arith.constant 0 : i32
    %c0_i32_0 = arith.constant 0 : i32
    return %arg0, %c0_i32 : i32, i32
  }
  func.func @transform_11(%arg0: i32) -> (i32, i32) {
    %c0_i32 = arith.constant 0 : i32
    %c0_i32_0 = arith.constant 0 : i32
    return %arg0, %c0_i32 : i32, i32
  }
}

</mosaic_0001>

<bundles_post_ra>
// kernel: vae_forward.1
= control target key start
LH: loop header
LB: loop body
LE: loop exit
PB: predicated region body
PF: predicated region fallthrough
CT: control target
= control target key end

     0   :  { %vm88_vm0 = vcmask 516096   ;;  %v4982_v3 = vmov 0   ;;  %s4983_s23 = smov 64   ;;  %v4984_v5 = vmov 0.0   ;;  %vm71_vm1 = vcmask 1040384   ;;  %s6165_s0 = inlined_call_operand.vmem [shape: f32[2,16,64], index: 0, kind: input, shape index: {}]   ;;  %s6166_s1 = inlined_call_operand.vmem [shape: bf16[192,128], index: 1, kind: input, shape index: {}]   ;;  %s6167_s3 = inlined_call_operand.vmem [shape: bf16[16,128,16], index: 3, kind: input, shape index: {}]   ;;  %s6168_s2 = inlined_call_operand.vmem [shape: f32[1,128], index: 2, kind: input, shape index: {}]   ;;  %s6169_s6 = inlined_call_operand.vmem [shape: bf16[16,8,128], index: 6, kind: input, shape index: {}]   ;;  %s6170_s4 = inlined_call_operand.vmem [shape: f32[1,16], index: 4, kind: input, shape index: {}]   ;;  %s6171_s11 = inlined_call_operand.vmem [shape: f32[2,16], index: 11, kind: output, shape index: {1}]   ;;  %s6172_s5 = inlined_call_operand.vmem [shape: f32[2,8], index: 5, kind: input, shape index: {}]   ;;  %s6173_s8 = inlined_call_operand.vmem [shape: bf16[128,192], index: 8, kind: input, shape index: {}]   ;;  %s6174_s7 = inlined_call_operand.vmem [shape: f32[16,1,128], index: 7, kind: input, shape index: {}]   ;;  %s6175_s9 = inlined_call_operand.vmem [shape: f32[1,64], index: 9, kind: input, shape index: {}]   ;;  %s6176_s10 = inlined_call_operand.vmem [shape: f32[32,64], index: 10, kind: output, shape index: {0}]  }
   0x1   :  { %v5051_v0 = vld [vmem:[%s6165_s0] sm:$0xff]  ;;  %v39_v1 = vld [vmem:[%s6165_s0 + $0x8] sm:$0xff]  ;;  %v5059_v2 = vld [vmem:[%s6165_s0 + $0x10] sm:$0xff]  ;;  %223 = vmatprep.subr.bf16.mxu0 %v4982_v3  ;;  %100 = vst.msk [vmem:[#allocation2 + $0x1f] sm:$0x1] %vm88_vm0, %v4984_v5  ;;  %4386 = vmatprep.subr.bf16.mxu1 %v4984_v5  ;;  %vm84_vm2 = vcmask 523264  }
   0x2   :  { %46 = vrot.lane.b32.xlu0 %v5051_v0, %s4983_s23  ;;  %50 = vrot.lane.b32.xlu1 %v5059_v2, %s4983_s23  ;;  %v41_v4 = vld [vmem:[%s6165_s0 + $0x18] sm:$0xff]  ;;  %101 = vst.msk [vmem:[#allocation2 + $0x3f] sm:$0x1] %vm88_vm0, %v4984_v5  ;;  %v4808_v6 = vld [vmem:[%s6166_s1] sm:$0xff]   ;;  %v72_v9 = vrot.slane %v5051_v0, 7  ;;  %v75_v10 = vrot.slane %v5059_v2, 7 }
   0x3   :  { %224 = vmatpush1.bf16.msra.mxu0 %v4808_v6  ;;  %v4809_v7 = vld [vmem:[%s6166_s1 + $0x8] sm:$0xff]   ;;  %v4810_v8 = vld [vmem:[%s6166_s1 + $0x10] sm:$0xff]   ;;  %v4811_v12 = vld [vmem:[%s6166_s1 + $0x18] sm:$0xff]   ;;  %vm96_vm3 = vcmask 522240   ;;  %vm58_vm4 = vcmask 1048064   ;;  %vm82_vm5 = vcmask 523265  }
   0x4   :  { %225 = vmatprep.subr.bf16.mxu0 %v4982_v3  ;;  %v64_v11 = vld [vmem:[%s6165_s0 + $0x8] sm:$0x7f]  ;;  %v66_v14 = vld [vmem:[%s6165_s0 + $0x18] sm:$0x7f]  ;;  %v4812_v15 = vld [vmem:[%s6166_s1 + $0x20] sm:$0xff]   ;;  %vm4985_vm6 = vmmov 0  }
   0x5   :  { %v73_v13 = vrot.slane %v64_v11, 7  ;;  %v76_v17 = vrot.slane %v66_v14, 7  ;;  %v91_v18 = vld [vmem:[%s6165_s0 + $0x1] sm:$0xff]  ;;  %v92_v19 = vld [vmem:[%s6165_s0 + $0x9] sm:$0x7f]  ;;  %v93_v21 = vld [vmem:[%s6165_s0 + $0x11] sm:$0xff]  ;;  %4402 = vmatprep.mubr.msk.bf16.mxu1 %vm4985_vm6, %v4984_v5 }
   0x6   :  { %48 = vrot.lane.b32.xlu0 %v39_v1, %s4983_s23  ;;  %52 = vrot.lane.b32.xlu1 %v41_v4, %s4983_s23  ;;  %v94_v20 = vld [vmem:[%s6165_s0 + $0x19] sm:$0x7f]  ;;  %95 = vst.msk [vmem:[#allocation2 + $0x8] sm:$0xff] %vm84_vm2, %v91_v18  ;;  %98 = vst.msk [vmem:[#allocation2 + $0x28] sm:$0xff] %vm84_vm2, %v93_v21  ;;  %v4820_v23 = vld [vmem:[%s6167_s3 + $0x40] sm:$0xff]   ;;  %vm320_vm7 = vcmask 1041409  }
   0x7   :  { %226 = vmatpush1.bf16.msra.mxu0 %v4809_v7  ;;  %v74_v16 = vsel %vm71_vm1, %v72_v9, %v73_v13  ;;  %v77_v22 = vsel %vm71_vm1, %v75_v10, %v76_v17  ;;  %97 = vst.msk [vmem:[#allocation2 + $0x18] sm:$0x7f] %vm96_vm3, %v92_v19  ;;  %99 = vst.msk [vmem:[#allocation2 + $0x38] sm:$0x7f] %vm96_vm3, %v94_v20  ;;  %v4813_v24 = vld [vmem:[%s6166_s1 + $0x28] sm:$0xff]   ;;  %4387 = vmatpush3.bf16.msra.mxu1 %v4820_v23  ;;  %v4814_v26 = vld [vmem:[%s6166_s1 + $0x30] sm:$0xff]  }
   0x8   :  { %227 = vmatprep.subr.bf16.mxu0 %v4982_v3  ;;  %4388 = vmatprep.subr.bf16.mxu1 %v4984_v5  ;;  %v4815_v29 = vld [vmem:[%s6166_s1 + $0x38] sm:$0xff]   ;;  %v4816_v30 = vld [vmem:[%s6166_s1 + $0x40] sm:$0xff]   ;;  %v4817_v31 = vld [vmem:[%s6166_s1 + $0x48] sm:$0xff]   ;;  %vm2131_vm8 = vcmask 1043456   ;;  %vm2106_vm9 = vcmask 123904   ;;  %vm2127_vm10 = vcmask 64512  }
   0x9   :  { %v4818_v32 = vld [vmem:[%s6166_s1 + $0x50] sm:$0xff]   ;;  %v4819_v33 = vld [vmem:[%s6166_s1 + $0x58] sm:$0xff]   ;;  %v4821_v47 = vld [vmem:[%s6167_s3 + $0x100] sm:$0xff]   ;;  %vm3630_vm12 = vcmask 1046528   ;;  %vm3669_vm13 = vcmask 1045504  }
   0xa   :  { %v4822_v48 = vld [vmem:[%s6167_s3 + $0x48] sm:$0xff]   ;;  %v4824_v50 = vld [vmem:[%s6167_s3 + $0x50] sm:$0xff]   ;;  %v4826_v52 = vld [vmem:[%s6167_s3 + $0x58] sm:$0xff]  }
   0xb   :  { %228 = vmatpush1.bf16.msra.mxu0 %v4810_v8  ;;  %4389 = vmatpush3.bf16.msra.mxu1 %v4822_v48  ;;  %v4823_v49 = vld [vmem:[%s6167_s3 + $0x108] sm:$0xff]   ;;  %v4825_v51 = vld [vmem:[%s6167_s3 + $0x110] sm:$0xff]   ;;  %v4827_v53 = vld [vmem:[%s6167_s3 + $0x118] sm:$0xff]  }
   0xc   :  { %229 = vmatprep.subr.bf16.mxu0 %v4982_v3  ;;  %4390 = vmatprep.subr.bf16.mxu1 %v4984_v5  ;;  %v4828_v54 = vld [vmem:[%s6167_s3 + $0x60] sm:$0xff]   ;;  %v4830_v56 = vld [vmem:[%s6167_s3 + $0x68] sm:$0xff]   ;;  %v4832_v58 = vld [vmem:[%s6167_s3 + $0x70] sm:$0xff]  }
   0xd   :  { %v103_v25 = vld [vmem:[#allocation2 + $0x8] sm:$0xff]  ;;  %v4829_v55 = vld [vmem:[%s6167_s3 + $0x120] sm:$0xff]   ;;  %v4833_v59 = vld [vmem:[%s6167_s3 + $0x130] sm:$0xff]  }
   0xe   :  { %v105_v27 = vld [vmem:[#allocation2 + $0x18] sm:$0xff]  ;;  %v107_v38 = vld [vmem:[#allocation2 + $0x28] sm:$0xff]  ;;  %v3715_v62 = vld [vmem:[%s6168_s2] ss:$0 sm:$0xff] }
   0xf   :  { %230 = vmatpush1.bf16.msra.mxu0 %v4811_v12  ;;  %v111_v28 = vpack.c.bf16 %v105_v27, %v103_v25  ;;  %v109_v39 = vld [vmem:[#allocation2 + $0x38] sm:$0xff]  ;;  %4391 = vmatpush3.bf16.msra.mxu1 %v4824_v50  ;;  %v4831_v57 = vld [vmem:[%s6167_s3 + $0x128] sm:$0xff]   ;;  %v4836_v27 = vld [vmem:[%s6167_s3] sm:$0xff]  }
  0x10   :  { %231 = vmatprep.subr.bf16.mxu0 %v4982_v3  ;;  %v113_v42 = vpack.c.bf16 %v109_v39, %v107_v38  ;;  %4392 = vmatprep.subr.bf16.mxu1 %v4984_v5  ;;  %v4834_v60 = vld [vmem:[%s6167_s3 + $0x78] sm:$0xff]  }
  0x11   :  { %3728 = vmatprep.mubr.msk.bf16.mxu0 %vm84_vm2, %v111_v28  ;;  %v4835_v61 = vld [vmem:[%s6167_s3 + $0x138] sm:$0xff]  }
  0x13   :  { %232 = vmatpush1.bf16.msra.mxu0 %v4812_v15  ;;  %4393 = vmatpush3.bf16.msra.mxu1 %v4826_v52  ;;  %v4838_v52 = vld [vmem:[%s6167_s3 + $0x8] sm:$0xff]  }
  0x14   :  { %233 = vmatprep.subr.bf16.mxu0 %v4982_v3  ;;  %4394 = vmatprep.subr.bf16.mxu1 %v4984_v5 }
  0x17   :  { %234 = vmatpush1.bf16.msra.mxu0 %v4813_v24  ;;  %4395 = vmatpush3.bf16.msra.mxu1 %v4828_v54 }
  0x18   :  { %235 = vmatprep.subr.bf16.mxu0 %v4982_v3  ;;  %4396 = vmatprep.subr.bf16.mxu1 %v4984_v5 }
  0x1b   :  { %236 = vmatpush1.bf16.msra.mxu0 %v4814_v26  ;;  %4397 = vmatpush3.bf16.msra.mxu1 %v4830_v56 }
  0x1c   :  { %237 = vmatprep.subr.bf16.mxu0 %v4982_v3  ;;  %4398 = vmatprep.subr.bf16.mxu1 %v4984_v5 }
  0x1f   :  { %238 = vmatpush1.bf16.msra.mxu0 %v4815_v29  ;;  %4399 = vmatpush3.bf16.msra.mxu1 %v4832_v58 }
  0x20   :  { %239 = vmatprep.subr.bf16.mxu0 %v4982_v3  ;;  %4400 = vmatprep.subr.bf16.mxu1 %v4984_v5 }
  0x23   :  { %240 = vmatpush1.bf16.msra.mxu0 %v4816_v30  ;;  %4401 = vmatpush3.bf16.msra.mxu1 %v4834_v60 }
  0x24   :  { %241 = vmatprep.subr.bf16.mxu0 %v4982_v3  ;;  %4406 = vmatprep.subr.bf16.mxu1 %v4984_v5 }
  0x27   :  { %242 = vmatpush1.bf16.msra.mxu0 %v4817_v31 }
  0x28   :  { %243 = vmatprep.subr.bf16.mxu0 %v4982_v3 }
  0x2b   :  { %244 = vmatpush1.bf16.msra.mxu0 %v4818_v32 }
  0x2c   :  { %245 = vmatprep.subr.bf16.mxu0 %v4982_v3 }
  0x2f   :  { %246 = vmatpush1.bf16.msra.mxu0 %v4819_v33 }
  0x30   :  { %4466 = vmatprep.subr.bf16.mxu0 %v4984_v5 }
  0x74   :  { %v47_v34 = vpop.permute.xlu0 %46  ;;  %v51_v35 = vpop.permute.xlu1 %50 }
  0x75   :  { %59 = vst.msk [vmem:[#allocation2] sm:$0xff] %vm58_vm4, %v47_v34  ;;  %61 = vst.msk [vmem:[#allocation2 + $0x20] sm:$0xff] %vm58_vm4, %v51_v35 }
  0x76   :  { %83 = vst.msk [vmem:[#allocation2] sm:$0xfe] %vm82_vm5, %v72_v9  ;;  %86 = vst.msk [vmem:[#allocation2 + $0x20] sm:$0xfe] %vm82_vm5, %v75_v10 }
  0x77   :  { %89 = vst.msk [vmem:[#allocation2] sm:$0x1] %vm88_vm0, %v4984_v5  ;;  %90 = vst.msk [vmem:[#allocation2 + $0x20] sm:$0x1] %vm88_vm0, %v4984_v5 }
  0x78   :  { %v49_v36 = vpop.permute.xlu0 %48  ;;  %v53_v37 = vpop.permute.xlu1 %52 }
  0x79   :  { %60 = vst.msk [vmem:[#allocation2 + $0x10] sm:$0xff] %vm58_vm4, %v49_v36  ;;  %62 = vst.msk [vmem:[#allocation2 + $0x30] sm:$0xff] %vm58_vm4, %v53_v37 }
  0x7a   :  { %85 = vst.msk [vmem:[#allocation2 + $0x10] sm:$0xff] %vm84_vm2, %v74_v16  ;;  %87 = vst.msk [vmem:[#allocation2 + $0x30] sm:$0xff] %vm84_vm2, %v77_v22 }
  0x7e   :  { %v102_v40 = vld [vmem:[#allocation2] sm:$0xff] }
  0x7f   :  { %v106_v44 = vld [vmem:[#allocation2 + $0x20] sm:$0xff] }
  0x81   :  { %v104_v41 = vld [vmem:[#allocation2 + $0x10] sm:$0xff] }
  0x82   :  { %v110_v43 = vpack.c.bf16 %v104_v41, %v102_v40  ;;  %v108_v45 = vld [vmem:[#allocation2 + $0x30] sm:$0xff] }
  0x83   :  { %v112_v46 = vpack.c.bf16 %v108_v45, %v106_v44 }
  0x84   :  { %256 = vmatmul.mubr.bf16.vlgmr.msra.gmra.mrb[0].mxu0 %v110_v43 }
  0x85   :  { %3729 = vmatprep.mubr.msk.bf16.mxu0 %vm84_vm2, %v113_v42  ;;  %4467 = vmatpush3.bf16.msra.mxu0 %v4821_v47  ;;  %v4837_v42 = vld [vmem:[%s6167_s3 + $0x180] sm:$0xff]  }
  0x86   :  { %4468 = vmatprep.subr.bf16.mxu0 %v4984_v5 }
  0x89   :  { %4469 = vmatpush3.bf16.msra.mxu0 %v4823_v49 }
  0x8a   :  { %4470 = vmatprep.subr.bf16.mxu0 %v4984_v5 }
  0x8c   :  { %264 = vmatmul.mubr.bf16.gmra.mrb[4].mxu0 %v112_v46 }
  0x8d   :  { %4471 = vmatpush3.bf16.msra.mxu0 %v4825_v51  ;;  %4482 = vmatprep.mubr.msk.bf16.mxu0 %vm4985_vm6, %v4984_v5 }
  0x8e   :  { %4472 = vmatprep.subr.bf16.mxu0 %v4984_v5 }
  0x91   :  { %4473 = vmatpush3.bf16.msra.mxu0 %v4827_v53 }
  0x92   :  { %4474 = vmatprep.subr.bf16.mxu0 %v4984_v5 }
  0x95   :  { %4475 = vmatpush3.bf16.msra.mxu0 %v4829_v55 }
  0x96   :  { %4476 = vmatprep.subr.bf16.mxu0 %v4984_v5 }
  0x99   :  { %4477 = vmatpush3.bf16.msra.mxu0 %v4831_v57 }
  0x9a   :  { %4478 = vmatprep.subr.bf16.mxu0 %v4984_v5 }
  0x9d   :  { %4479 = vmatpush3.bf16.msra.mxu0 %v4833_v59  ;;  %v4839_v59 = vld [vmem:[%s6167_s3 + $0x188] sm:$0xff]  }
  0x9e   :  { %4480 = vmatprep.subr.bf16.mxu0 %v4984_v5 }
  0xa1   :  { %4481 = vmatpush3.bf16.msra.mxu0 %v4835_v61 }
  0xa2   :  { %4506 = vmatprep.subr.bf16.mxu0 %v4984_v5 }
 0x157   :  { %v257_v63 = vpop.f32.mrb[0].mxu0 }
 0x158   :  { %v258_v0 = vadd.f32 %v3715_v62, %v257_v63  ;;  %v259_v1 = vpop.f32.mrb[1].mxu0 }
 0x159   :  { %v260_v2 = vpop.f32.mrb[2].mxu0 }
 0x15a   :  { %v261_v4 = vadd.f32 %v3715_v62, %v260_v2  ;;  %v262_v6 = vpop.f32.mrb[3].mxu0  ;;  %v272_v7 = vmax.f32 %v258_v0, 0.0 }
 0x15c   :  { %v273_v8 = vmax.f32 %v261_v4, 0.0  ;;  %v4840_v4 = vld [vmem:[%s6167_s3 + $0x10] sm:$0xff]  }
 0x15e   :  { %v276_v9 = vpack.c.bf16 %v273_v8, %v272_v7 }
 0x15f   :  { %v265_v10 = vpop.f32.mrb[4].mxu0 }
 0x160   :  { %278 = vst [vmem:[#allocation3] sm:$0xff] %v276_v9  ;;  %v266_v11 = vadd.f32 %v3715_v62, %v265_v10  ;;  %v267_v12 = vpop.f32.mrb[5].mxu0 }
 0x161   :  { %v268_v13 = vpop.f32.mrb[6].mxu0  ;;  %v4841_v12 = vld [vmem:[%s6167_s3 + $0x190] sm:$0xff]  }
 0x162   :  { %v269_v14 = vadd.f32 %v3715_v62, %v268_v13  ;;  %v270_v15 = vpop.f32.mrb[7].mxu0  ;;  %v274_v16 = vmax.f32 %v266_v11, 0.0 }
 0x163   :  { %v4842_v15 = vld [vmem:[%s6167_s3 + $0x18] sm:$0xff]  }
 0x164   :  { %v275_v17 = vmax.f32 %v269_v14, 0.0 }
 0x166   :  { %v277_v18 = vpack.c.bf16 %v275_v17, %v274_v16  ;;  %v4843_v16 = vld [vmem:[%s6167_s3 + $0x198] sm:$0xff]   ;;  %v4844_v17 = vld [vmem:[%s6167_s3 + $0x20] sm:$0xff]  }
 0x167   :  { %v5229_v19 = vld [vmem:[#allocation3] sm:$0x1]  ;;  %v732_v20 = vld [vmem:[#allocation3] sm:$0x4]  ;;  %v5240_v29 = vld [vmem:[#allocation3] sm:$0x10] }
 0x168   :  { %279 = vst [vmem:[#allocation3 + $0x8] sm:$0xff] %v277_v18  ;;  %v317_v21 = vunpack.c.l.b16 %v5229_v19  ;;  %v753_v22 = vunpack.c.l.b16 %v732_v20  ;;  %v5242_v30 = vld [vmem:[#allocation3] sm:$0x8]  ;;  %v5246_v32 = vld [vmem:[#allocation3] sm:$0x20]  ;;  %v1209_v39 = vunpack.c.h.b16 %v5240_v29  ;;  %v4846_v20 = vld [vmem:[%s6167_s3 + $0x28] sm:$0xff]  }
 0x169   :  { %v5256_v40 = vld [vmem:[#allocation3] sm:$0x40]  ;;  %v981_v43 = vunpack.c.l.b16 %v5242_v30  ;;  %v5266_v46 = vld [vmem:[#allocation3] sm:$0x80]  ;;  %v1435_v49 = vunpack.c.h.b16 %v5246_v32  ;;  %v4854_v30 = vld [vmem:[%s6167_s3 + $0x88] sm:$0xff]  }
 0x16a   :  { %v319_v26 = vrot.slane %v317_v21, 1  ;;  %v755_v34 = vrot.slane %v753_v22, 4  ;;  %v866_v53 = vrot.slane %v753_v22, 5  ;;  %v1663_v55 = vunpack.c.h.b16 %v5256_v40  ;;  %v4845_v18 = vld [vmem:[%s6167_s3 + $0x1a0] sm:$0xff]   ;;  %v4847_v22 = vld [vmem:[%s6167_s3 + $0x1a8] sm:$0xff]  }
 0x16b   :  { %v1891_v57 = vunpack.c.h.b16 %v5266_v46  ;;  %v1321_v58 = vrot.slane %v1209_v39, 1  ;;  %v1094_v61 = vrot.slane %v981_v43, 7  ;;  %v1548_v1 = vrot.slane %v1435_v49, 3  ;;  %v4853_v19 = vld [vmem:[%s6167_s3 + $0x200] sm:$0xff]   ;;  %v4871_v29 = vld [vmem:[%s6167_s3 + $0x288] sm:$0xff]  }
 0x16c   :  { %v1776_v7 = vrot.slane %v1663_v55, 5  ;;  %v4901_v40 = vld [vmem:[%s6167_s3 + $0x380] sm:$0xff]   ;;  %v4917_v46 = vld [vmem:[%s6167_s3 + $0x248] sm:$0xff]  }
 0x16d   :  { %v2004_v10 = vrot.slane %v1891_v57, 7 }
 0x16f   :  { %v5232_v23 = vld [vmem:[#allocation3 + $0x8] sm:$0x1]  ;;  %v733_v24 = vld [vmem:[#allocation3 + $0x8] sm:$0x4]  ;;  %v5244_v31 = vld [vmem:[#allocation3 + $0x8] sm:$0x8] }
 0x170   :  { %v318_v25 = vunpack.c.l.b16 %v5232_v23  ;;  %v754_v28 = vunpack.c.l.b16 %v733_v24  ;;  %v5251_v36 = vld [vmem:[#allocation3 + $0x8] sm:$0x10]  ;;  %v5253_v37 = vld [vmem:[#allocation3 + $0x8] sm:$0x20]  ;;  %v982_v44 = vunpack.c.l.b16 %v5244_v31  ;;  %v5264_v45 = vld [vmem:[#allocation3 + $0x8] sm:$0x40] }
 0x171   :  { %v1210_v48 = vunpack.c.h.b16 %v5251_v36  ;;  %v1436_v50 = vunpack.c.h.b16 %v5253_v37  ;;  %v5271_v51 = vld [vmem:[#allocation3 + $0x8] sm:$0x80]  ;;  %v1664_v56 = vunpack.c.h.b16 %v5264_v45  ;;  %v4848_v24 = vld [vmem:[%s6167_s3 + $0x30] sm:$0xff]   ;;  %v4851_v23 = vld [vmem:[%s6167_s3 + $0x1b8] sm:$0xff]  }
 0x172   :  { %v321_v33 = vsel %vm320_vm7, %v318_v25, %v319_v26  ;;  %v756_v35 = vrot.slane %v754_v28, 3  ;;  %v867_v54 = vrot.slane %v754_v28, 4  ;;  %v1095_v62 = vrot.slane %v982_v44, 6  ;;  %v4850_v28 = vld [vmem:[%s6167_s3 + $0x38] sm:$0xff]   ;;  %v4852_v31 = vld [vmem:[%s6167_s3 + $0x80] sm:$0xff]  }
 0x173   :  { %v322_v38 = vpack.c.b16 %v321_v33, %v321_v33  ;;  %v1892_v63 = vunpack.c.h.b16 %v5271_v51  ;;  %v5301_v0 = vsel %vm320_vm7, %v1210_v48, %v1321_v58  ;;  %v1549_v2 = vrot.slane %v1436_v50, 2  ;;  %v4862_v58 = vld [vmem:[%s6167_s3 + $0xa8] sm:$0xff]   ;;  %v4884_v37 = vld [vmem:[%s6167_s3 + $0x140] sm:$0xff]  }
 0x174   :  { %v757_v41 = vsel %vm320_vm7, %v756_v35, %v755_v34  ;;  %v5290_v60 = vsel %vm320_vm7, %v867_v54, %v866_v53  ;;  %v5311_v6 = vsel %vm320_vm7, %v1095_v62, %v1094_v61  ;;  %v1777_v8 = vrot.slane %v1664_v56, 4  ;;  %v4861_v53 = vld [vmem:[%s6167_s3 + $0x220] sm:$0xff]   ;;  %v5429_v54 = vld [vmem:[#allocation3 + $0x8] sm:$0x2] }
 0x175   :  { %4403 = vmatmul.mubr.bf16.vlgmr.msra.gmra.mrb[0].mxu1 %v322_v38  ;;  %v758_v47 = vpack.c.b16 %v757_v41, %v757_v41  ;;  %v5319_v9 = vsel %vm320_vm7, %v1549_v2, %v1548_v1  ;;  %v2005_v11 = vrot.slane %v1892_v63, 6  ;;  %v412_v26 = vrot.slane %v318_v25, 7  ;;  %v4855_v41 = vld [vmem:[%s6167_s3 + $0x208] sm:$0xff]   ;;  %v4864_v1 = vld [vmem:[%s6167_s3 + $0xb0] sm:$0xff]  }
 0x176   :  { %4407 = vmatpush3.bf16.msra.mxu1 %v4836_v27  ;;  %4422 = vmatprep.mubr.msk.bf16.mxu1 %vm4985_vm6, %v4984_v5  ;;  %v5329_v13 = vsel %vm320_vm7, %v1777_v8, %v1776_v7  ;;  %v4849_v27 = vld [vmem:[%s6167_s3 + $0x1b0] sm:$0xff]   ;;  %v984_v33 = vrot.slane %v982_v44, 5  ;;  %v983_v34 = vrot.slane %v981_v43, 6  ;;  %v4858_v44 = vld [vmem:[%s6167_s3 + $0x98] sm:$0xff]   ;;  %v4863_v61 = vld [vmem:[%s6167_s3 + $0x228] sm:$0xff]   ;;  %v526_v62 = vunpack.c.l.b16 %v5429_v54 }
 0x177   :  { %4483 = vmatmul.mubr.bf16.vlgmr.msra.gmra.mrb[8].mxu0 %v758_v47  ;;  %4408 = vmatprep.subr.bf16.mxu1 %v4984_v5  ;;  %v5333_v14 = vsel %vm320_vm7, %v2005_v11, %v2004_v10  ;;  %v413_v25 = vsel %vm320_vm7, %v412_v26, %v317_v21  ;;  %v4857_v43 = vld [vmem:[%s6167_s3 + $0x210] sm:$0xff]   ;;  %v4859_v47 = vld [vmem:[%s6167_s3 + $0x218] sm:$0xff]   ;;  %v1211_v11 = vrot.slane %v1210_v48, 7 }
 0x178   :  { %4507 = vmatpush3.bf16.msra.mxu0 %v4837_v42  ;;  %4522 = vmatprep.mubr.msk.bf16.mxu0 %vm4985_vm6, %v4984_v5  ;;  %v985_v35 = vsel %vm320_vm7, %v984_v33, %v983_v34  ;;  %v414_v38 = vpack.c.b16 %v413_v25, %v413_v25  ;;  %v4856_v42 = vld [vmem:[%s6167_s3 + $0x90] sm:$0xff]   ;;  %v528_v7 = vrot.slane %v526_v62, 1  ;;  %v4866_v8 = vld [vmem:[%s6167_s3 + $0xb8] sm:$0xff]   ;;  %v4878_v33 = vld [vmem:[%s6167_s3 + $0xe8] sm:$0xff]  }
 0x179   :  { %4508 = vmatprep.subr.bf16.mxu0 %v4984_v5  ;;  %v986_v21 = vpack.c.b16 %v985_v35, %v985_v35  ;;  %v1212_v36 = vsel %vm320_vm7, %v1211_v11, %v1209_v39  ;;  %v4872_v39 = vld [vmem:[%s6167_s3 + $0xd0] sm:$0xff]   ;;  %v4875_v26 = vld [vmem:[%s6167_s3 + $0x298] sm:$0xff]   ;;  %v4900_v11 = vld [vmem:[%s6167_s3 + $0x1c0] sm:$0xff]  }
 0x17a   :  { %4409 = vmatpush3.bf16.msra.mxu1 %v4838_v52  ;;  %v4860_v52 = vld [vmem:[%s6167_s3 + $0xa0] sm:$0xff]   ;;  %v4880_v25 = vld [vmem:[%s6167_s3 + $0xf0] sm:$0xff]   ;;  %v4882_v35 = vld [vmem:[%s6167_s3 + $0xf8] sm:$0xff]  }
 0x17b   :  { %4410 = vmatprep.subr.bf16.mxu1 %v4984_v5  ;;  %v4881_v34 = vld [vmem:[%s6167_s3 + $0x2b0] sm:$0xff]   ;;  %v4891_v54 = vld [vmem:[%s6167_s3 + $0x318] sm:$0xff]  }
 0x17c   :  { %4509 = vmatpush3.bf16.msra.mxu0 %v4839_v59  ;;  %v5435_v59 = vld [vmem:[#allocation3] sm:$0x2] }
 0x17d   :  { %4510 = vmatprep.subr.bf16.mxu0 %v4984_v5  ;;  %v525_v2 = vunpack.c.l.b16 %v5435_v59  ;;  %v4893_v59 = vld [vmem:[%s6167_s3 + $0x320] sm:$0xff]  }
 0x17e   :  { %4411 = vmatpush3.bf16.msra.mxu1 %v4840_v4  ;;  %v4865_v4 = vld [vmem:[%s6167_s3 + $0x230] sm:$0xff]  }
 0x17f   :  { %4412 = vmatprep.subr.bf16.mxu1 %v4984_v5  ;;  %v527_v10 = vrot.slane %v525_v2, 2 }
 0x180   :  { %4511 = vmatpush3.bf16.msra.mxu0 %v4841_v12  ;;  %v4867_v12 = vld [vmem:[%s6167_s3 + $0x238] sm:$0xff]  }
 0x181   :  { %4512 = vmatprep.subr.bf16.mxu0 %v4984_v5 }
 0x182   :  { %4413 = vmatpush3.bf16.msra.mxu1 %v4842_v15  ;;  %v529_v15 = vsel %vm320_vm7, %v528_v7, %v527_v10  ;;  %v1666_v7 = vrot.slane %v1664_v56, 3  ;;  %v1665_v10 = vrot.slane %v1663_v55, 4  ;;  %v869_v56 = vpack.c.b16 %v5290_v60, %v5290_v60  ;;  %v4903_v60 = vld [vmem:[%s6167_s3 + $0x388] sm:$0xff]  }
 0x183   :  { %4414 = vmatprep.subr.bf16.mxu1 %v4984_v5  ;;  %v530_v48 = vpack.c.b16 %v529_v15, %v529_v15  ;;  %v4904_v15 = vld [vmem:[%s6167_s3 + $0x1d0] sm:$0xff]  }
 0x184   :  { %4513 = vmatpush3.bf16.msra.mxu0 %v4843_v16  ;;  %v4868_v16 = vld [vmem:[%s6167_s3 + $0xc0] sm:$0xff]   ;;  %v1667_v45 = vsel %vm320_vm7, %v1666_v7, %v1665_v10 }
 0x185   :  { %4514 = vmatprep.subr.bf16.mxu0 %v4984_v5  ;;  %v1668_v55 = vpack.c.b16 %v1667_v45, %v1667_v45  ;;  %v4938_v45 = vld [vmem:[%s6167_s3 + $0x370] sm:$0xff]  }
 0x186   :  { %4415 = vmatpush3.bf16.msra.mxu1 %v4844_v17  ;;  %v4869_v17 = vld [vmem:[%s6167_s3 + $0x280] sm:$0xff]  }
 0x187   :  { %4416 = vmatprep.subr.bf16.mxu1 %v4984_v5 }
 0x188   :  { %4515 = vmatpush3.bf16.msra.mxu0 %v4845_v18  ;;  %v1213_v18 = vpack.c.b16 %v1212_v36, %v1212_v36  ;;  %v4906_v36 = vld [vmem:[%s6167_s3 + $0x1d8] sm:$0xff]  }
 0x189   :  { %4516 = vmatprep.subr.bf16.mxu0 %v4984_v5 }
 0x18a   :  { %4417 = vmatpush3.bf16.msra.mxu1 %v4846_v20  ;;  %v4870_v20 = vld [vmem:[%s6167_s3 + $0xc8] sm:$0xff]  }
 0x18b   :  { %4418 = vmatprep.subr.bf16.mxu1 %v4984_v5 }
 0x18c   :  { %4517 = vmatpush3.bf16.msra.mxu0 %v4847_v22  ;;  %v4873_v22 = vld [vmem:[%s6167_s3 + $0x290] sm:$0xff]  }
 0x18d   :  { %4518 = vmatprep.subr.bf16.mxu0 %v4984_v5 }
 0x18e   :  { %4419 = vmatpush3.bf16.msra.mxu1 %v4848_v24  ;;  %v4874_v24 = vld [vmem:[%s6167_s3 + $0xd8] sm:$0xff]  }
 0x18f   :  { %4420 = vmatprep.subr.bf16.mxu1 %v4984_v5 }
 0x190   :  { %4519 = vmatpush3.bf16.msra.mxu0 %v4849_v27  ;;  %v4876_v27 = vld [vmem:[%s6167_s3 + $0xe0] sm:$0xff]  }
 0x191   :  { %4520 = vmatprep.subr.bf16.mxu0 %v4984_v5 }
 0x192   :  { %4421 = vmatpush3.bf16.msra.mxu1 %v4850_v28  ;;  %v4877_v28 = vld [vmem:[%s6167_s3 + $0x2a0] sm:$0xff]  }
 0x193   :  { %4426 = vmatprep.subr.bf16.mxu1 %v4984_v5 }
 0x194   :  { %4521 = vmatpush3.bf16.msra.mxu0 %v4851_v23  ;;  %v4879_v23 = vld [vmem:[%s6167_s3 + $0x2a8] sm:$0xff]  }
 0x195   :  { %4423 = vmatmul.mubr.bf16.vlgmr.msra.gmra.mrb[4].mxu1 %v414_v38  ;;  %4546 = vmatprep.subr.bf16.mxu0 %v4984_v5  ;;  %v638_v38 = vrot.slane %v525_v2, 3  ;;  %v4897_v2 = vld [vmem:[%s6167_s3 + $0x330] sm:$0xff]  }
 0x196   :  { %4427 = vmatpush3.bf16.msra.mxu1 %v4852_v31  ;;  %4442 = vmatprep.mubr.msk.bf16.mxu1 %vm4985_vm6, %v4984_v5  ;;  %v639_v31 = vrot.slane %v526_v62, 2  ;;  %v4895_v62 = vld [vmem:[%s6167_s3 + $0x328] sm:$0xff]  }
 0x197   :  { %4523 = vmatmul.mubr.bf16.vlgmr.msra.gmra.mrb[12].mxu0 %v986_v21  ;;  %4428 = vmatprep.subr.bf16.mxu1 %v4984_v5  ;;  %v4883_v21 = vld [vmem:[%s6167_s3 + $0x2b8] sm:$0xff]  }
 0x198   :  { %4547 = vmatpush3.bf16.msra.mxu0 %v4853_v19  ;;  %4562 = vmatprep.mubr.msk.bf16.mxu0 %vm4985_vm6, %v4984_v5  ;;  %v1438_v19 = vrot.slane %v1436_v50, 1 }
 0x199   :  { %4548 = vmatprep.subr.bf16.mxu0 %v4984_v5 }
 0x19a   :  { %4429 = vmatpush3.bf16.msra.mxu1 %v4854_v30  ;;  %v640_v30 = vsel %vm320_vm7, %v639_v31, %v638_v38  ;;  %v4922_v31 = vld [vmem:[%s6167_s3 + $0x270] sm:$0xff]   ;;  %v4924_v38 = vld [vmem:[%s6167_s3 + $0x2c0] sm:$0xff]  }
 0x19b   :  { %4430 = vmatprep.subr.bf16.mxu1 %v4984_v5 }
 0x19c   :  { %4549 = vmatpush3.bf16.msra.mxu0 %v4855_v41  ;;  %v1437_v41 = vrot.slane %v1435_v49, 2  ;;  %v4886_v49 = vld [vmem:[%s6167_s3 + $0x148] sm:$0xff]  }
 0x19d   :  { %4550 = vmatprep.subr.bf16.mxu0 %v4984_v5 }
 0x19e   :  { %4431 = vmatpush3.bf16.msra.mxu1 %v4856_v42  ;;  %v1439_v50 = vsel %vm320_vm7, %v1438_v19, %v1437_v41  ;;  %v641_v42 = vpack.c.b16 %v640_v30, %v640_v30  ;;  %v1323_v19 = vpack.c.b16 %v5301_v0, %v5301_v0  ;;  %v4926_v30 = vld [vmem:[%s6167_s3 + $0x2d0] sm:$0xff]   ;;  %v4927_v0 = vld [vmem:[%s6167_s3 + $0x2d8] sm:$0xff]   ;;  %v4928_v41 = vld [vmem:[%s6167_s3 + $0x2e0] sm:$0xff]  }
 0x19f   :  { %4432 = vmatprep.subr.bf16.mxu1 %v4984_v5  ;;  %v1440_v32 = vpack.c.b16 %v1439_v50, %v1439_v50 }
 0x1a0   :  { %4551 = vmatpush3.bf16.msra.mxu0 %v4857_v43  ;;  %v4885_v43 = vld [vmem:[%s6167_s3 + $0x300] sm:$0xff]  }
 0x1a1   :  { %4552 = vmatprep.subr.bf16.mxu0 %v4984_v5 }
 0x1a2   :  { %4433 = vmatpush3.bf16.msra.mxu1 %v4858_v44  ;;  %v4887_v44 = vld [vmem:[%s6167_s3 + $0x308] sm:$0xff]  }
 0x1a3   :  { %4434 = vmatprep.subr.bf16.mxu1 %v4984_v5 }
 0x1a4   :  { %4553 = vmatpush3.bf16.msra.mxu0 %v4859_v47  ;;  %v4888_v47 = vld [vmem:[%s6167_s3 + $0x150] sm:$0xff]  }
 0x1a5   :  { %4554 = vmatprep.subr.bf16.mxu0 %v4984_v5 }
 0x1a6   :  { %4435 = vmatpush3.bf16.msra.mxu1 %v4860_v52  ;;  %v4889_v52 = vld [vmem:[%s6167_s3 + $0x310] sm:$0xff]  }
 0x1a7   :  { %4436 = vmatprep.subr.bf16.mxu1 %v4984_v5 }
 0x1a8   :  { %4555 = vmatpush3.bf16.msra.mxu0 %v4861_v53  ;;  %v4890_v53 = vld [vmem:[%s6167_s3 + $0x158] sm:$0xff]  }
 0x1a9   :  { %4556 = vmatprep.subr.bf16.mxu0 %v4984_v5 }
 0x1aa   :  { %4437 = vmatpush3.bf16.msra.mxu1 %v4862_v58  ;;  %v4892_v58 = vld [vmem:[%s6167_s3 + $0x160] sm:$0xff]  }
 0x1ab   :  { %4438 = vmatprep.subr.bf16.mxu1 %v4984_v5 }
 0x1ac   :  { %4557 = vmatpush3.bf16.msra.mxu0 %v4863_v61  ;;  %v4894_v61 = vld [vmem:[%s6167_s3 + $0x168] sm:$0xff]  }
 0x1ad   :  { %4558 = vmatprep.subr.bf16.mxu0 %v4984_v5 }
 0x1ae   :  { %4439 = vmatpush3.bf16.msra.mxu1 %v4864_v1  ;;  %v4896_v1 = vld [vmem:[%s6167_s3 + $0x170] sm:$0xff]  }
 0x1af   :  { %4440 = vmatprep.subr.bf16.mxu1 %v4984_v5 }
 0x1b0   :  { %4559 = vmatpush3.bf16.msra.mxu0 %v4865_v4  ;;  %v4898_v4 = vld [vmem:[%s6167_s3 + $0x178] sm:$0xff]  }
 0x1b1   :  { %4560 = vmatprep.subr.bf16.mxu0 %v4984_v5 }
 0x1b2   :  { %4441 = vmatpush3.bf16.msra.mxu1 %v4866_v8  ;;  %v4899_v8 = vld [vmem:[%s6167_s3 + $0x338] sm:$0xff]  }
 0x1b3   :  { %4446 = vmatprep.subr.bf16.mxu1 %v4984_v5 }
 0x1b4   :  { %4561 = vmatpush3.bf16.msra.mxu0 %v4867_v12  ;;  %v4902_v12 = vld [vmem:[%s6167_s3 + $0x1c8] sm:$0xff]  }
 0x1b5   :  { %4443 = vmatmul.mubr.bf16.vlgmr.msra.gmra.mrb[8].mxu1 %v530_v48  ;;  %4586 = vmatprep.subr.bf16.mxu0 %v4984_v5  ;;  %v4907_v48 = vld [vmem:[%s6167_s3 + $0x398] sm:$0xff]  }
 0x1b6   :  { %4447 = vmatpush3.bf16.msra.mxu1 %v4868_v16  ;;  %4462 = vmatprep.mubr.msk.bf16.mxu1 %vm4985_vm6, %v4984_v5  ;;  %v4905_v16 = vld [vmem:[%s6167_s3 + $0x390] sm:$0xff]  }
 0x1b7   :  { %4563 = vmatmul.mubr.bf16.vlgmr.msra.gmra.mrb[16].mxu0 %v1213_v18  ;;  %4448 = vmatprep.subr.bf16.mxu1 %v4984_v5  ;;  %v4909_v18 = vld [vmem:[%s6167_s3 + $0x3a0] sm:$0xff]  }
 0x1b8   :  { %4587 = vmatpush3.bf16.msra.mxu0 %v4869_v17  ;;  %4602 = vmatprep.mubr.msk.bf16.mxu0 %vm4985_vm6, %v4984_v5  ;;  %v4908_v17 = vld [vmem:[%s6167_s3 + $0x1e0] sm:$0xff]  }
 0x1b9   :  { %4588 = vmatprep.subr.bf16.mxu0 %v4984_v5 }
 0x1ba   :  { %4449 = vmatpush3.bf16.msra.mxu1 %v4870_v20  ;;  %v4910_v20 = vld [vmem:[%s6167_s3 + $0x1e8] sm:$0xff]  }
 0x1bb   :  { %4450 = vmatprep.subr.bf16.mxu1 %v4984_v5 }
 0x1bc   :  { %4589 = vmatpush3.bf16.msra.mxu0 %v4871_v29  ;;  %v4911_v29 = vld [vmem:[%s6167_s3 + $0x3a8] sm:$0xff]  }
 0x1bd   :  { %4590 = vmatprep.subr.bf16.mxu0 %v4984_v5 }
 0x1be   :  { %4451 = vmatpush3.bf16.msra.mxu1 %v4872_v39  ;;  %v4912_v39 = vld [vmem:[%s6167_s3 + $0x1f0] sm:$0xff]  }
 0x1bf   :  { %4452 = vmatprep.subr.bf16.mxu1 %v4984_v5 }
 0x1c0   :  { %4591 = vmatpush3.bf16.msra.mxu0 %v4873_v22  ;;  %v4913_v22 = vld [vmem:[%s6167_s3 + $0x3b0] sm:$0xff]  }
 0x1c1   :  { %4592 = vmatprep.subr.bf16.mxu0 %v4984_v5 }
 0x1c2   :  { %4453 = vmatpush3.bf16.msra.mxu1 %v4874_v24  ;;  %v4914_v24 = vld [vmem:[%s6167_s3 + $0x1f8] sm:$0xff]  }
 0x1c3   :  { %4454 = vmatprep.subr.bf16.mxu1 %v4984_v5 }
 0x1c4   :  { %4593 = vmatpush3.bf16.msra.mxu0 %v4875_v26  ;;  %v1894_v26 = vrot.slane %v1892_v63, 5  ;;  %v1097_v63 = vpack.c.b16 %v5311_v6, %v5311_v6  ;;  %v4919_v6 = vld [vmem:[%s6167_s3 + $0x258] sm:$0xff]  }
 0x1c5   :  { %4594 = vmatprep.subr.bf16.mxu0 %v4984_v5 }
 0x1c6   :  { %4455 = vmatpush3.bf16.msra.mxu1 %v4876_v27  ;;  %v4915_v27 = vld [vmem:[%s6167_s3 + $0x3b8] sm:$0xff]  }
 0x1c7   :  { %4456 = vmatprep.subr.bf16.mxu1 %v4984_v5 }
 0x1c8   :  { %4595 = vmatpush3.bf16.msra.mxu0 %v4877_v28  ;;  %v1893_v28 = vrot.slane %v1891_v57, 6  ;;  %v4918_v57 = vld [vmem:[%s6167_s3 + $0x250] sm:$0xff]  }
 0x1c9   :  { %4596 = vmatprep.subr.bf16.mxu0 %v4984_v5 }
 0x1ca   :  { %4457 = vmatpush3.bf16.msra.mxu1 %v4878_v33  ;;  %v4916_v33 = vld [vmem:[%s6167_s3 + $0x240] sm:$0xff]   ;;  %v1895_v51 = vsel %vm320_vm7, %v1894_v26, %v1893_v28  ;;  %v4946_v26 = vld [vmem:[%s6167_s3 + $0x3f0] sm:$0xff]  }
 0x1cb   :  { %4458 = vmatprep.subr.bf16.mxu1 %v4984_v5 }
 0x1cc   :  { %4597 = vmatpush3.bf16.msra.mxu0 %v4879_v23  ;;  %v1896_v23 = vpack.c.b16 %v1895_v51, %v1895_v51 }
 0x1cd   :  { %4598 = vmatprep.subr.bf16.mxu0 %v4984_v5 }
 0x1ce   :  { %4459 = vmatpush3.bf16.msra.mxu1 %v4880_v25  ;;  %v4920_v25 = vld [vmem:[%s6167_s3 + $0x260] sm:$0xff]  }
 0x1cf   :  { %4460 = vmatprep.subr.bf16.mxu1 %v4984_v5 }
 0x1d0   :  { %4599 = vmatpush3.bf16.msra.mxu0 %v4881_v34  ;;  %v4921_v34 = vld [vmem:[%s6167_s3 + $0x268] sm:$0xff]  }
 0x1d1   :  { %4600 = vmatprep.subr.bf16.mxu0 %v4984_v5 }
 0x1d2   :  { %4461 = vmatpush3.bf16.msra.mxu1 %v4882_v35  ;;  %v4923_v35 = vld [vmem:[%s6167_s3 + $0x278] sm:$0xff]  }
 0x1d3   :  { %4486 = vmatprep.subr.bf16.mxu1 %v4984_v5 }
 0x1d4   :  { %4601 = vmatpush3.bf16.msra.mxu0 %v4883_v21  ;;  %v4925_v21 = vld [vmem:[%s6167_s3 + $0x2c8] sm:$0xff]  }
 0x1d5   :  { %4463 = vmatmul.mubr.bf16.vlgmr.msra.gmra.mrb[12].mxu1 %v641_v42  ;;  %4626 = vmatprep.subr.bf16.mxu0 %v4984_v5 }
 0x1d6   :  { %4487 = vmatpush3.bf16.msra.mxu1 %v4884_v37  ;;  %4502 = vmatprep.mubr.msk.bf16.mxu1 %vm4985_vm6, %v4984_v5  ;;  %v4929_v37 = vld [vmem:[%s6167_s3 + $0x2e8] sm:$0xff]  }
 0x1d7   :  { %4603 = vmatmul.mubr.bf16.vlgmr.msra.gmra.mrb[20].mxu0 %v1440_v32  ;;  %4488 = vmatprep.subr.bf16.mxu1 %v4984_v5 }
 0x1d8   :  { %4627 = vmatpush3.bf16.msra.mxu0 %v4885_v43  ;;  %4642 = vmatprep.mubr.msk.bf16.mxu0 %vm4985_vm6, %v4984_v5 }
 0x1d9   :  { %4628 = vmatprep.subr.bf16.mxu0 %v4984_v5 }
 0x1da   :  { %4489 = vmatpush3.bf16.msra.mxu1 %v4886_v49  ;;  %v4930_v49 = vld [vmem:[%s6167_s3 + $0x2f0] sm:$0xff]  }
 0x1db   :  { %4490 = vmatprep.subr.bf16.mxu1 %v4984_v5 }
 0x1dc   :  { %4629 = vmatpush3.bf16.msra.mxu0 %v4887_v44 }
 0x1dd   :  { %4630 = vmatprep.subr.bf16.mxu0 %v4984_v5 }
 0x1de   :  { %4491 = vmatpush3.bf16.msra.mxu1 %v4888_v47 }
 0x1df   :  { %4492 = vmatprep.subr.bf16.mxu1 %v4984_v5 }
 0x1e0   :  { %4631 = vmatpush3.bf16.msra.mxu0 %v4889_v52 }
 0x1e1   :  { %4632 = vmatprep.subr.bf16.mxu0 %v4984_v5 }
 0x1e2   :  { %4493 = vmatpush3.bf16.msra.mxu1 %v4890_v53 }
 0x1e3   :  { %4494 = vmatprep.subr.bf16.mxu1 %v4984_v5 }
 0x1e4   :  { %4633 = vmatpush3.bf16.msra.mxu0 %v4891_v54  ;;  %v4931_v54 = vld [vmem:[%s6167_s3 + $0x2f8] sm:$0xff]  }
 0x1e5   :  { %4634 = vmatprep.subr.bf16.mxu0 %v4984_v5 }
 0x1e6   :  { %4495 = vmatpush3.bf16.msra.mxu1 %v4892_v58  ;;  %v4932_v58 = vld [vmem:[%s6167_s3 + $0x340] sm:$0xff]  }
 0x1e7   :  { %4496 = vmatprep.subr.bf16.mxu1 %v4984_v5 }
 0x1e8   :  { %4635 = vmatpush3.bf16.msra.mxu0 %v4893_v59  ;;  %v1551_v59 = vpack.c.b16 %v5319_v9, %v5319_v9  ;;  %v4935_v9 = vld [vmem:[%s6167_s3 + $0x358] sm:$0xff]  }
 0x1e9   :  { %4636 = vmatprep.subr.bf16.mxu0 %v4984_v5 }
 0x1ea   :  { %4497 = vmatpush3.bf16.msra.mxu1 %v4894_v61  ;;  %v4933_v61 = vld [vmem:[%s6167_s3 + $0x348] sm:$0xff]  }
 0x1eb   :  { %4498 = vmatprep.subr.bf16.mxu1 %v4984_v5 }
 0x1ec   :  { %4637 = vmatpush3.bf16.msra.mxu0 %v4895_v62  ;;  %v4934_v62 = vld [vmem:[%s6167_s3 + $0x350] sm:$0xff]  }
 0x1ed   :  { %4638 = vmatprep.subr.bf16.mxu0 %v4984_v5 }
 0x1ee   :  { %4499 = vmatpush3.bf16.msra.mxu1 %v4896_v1  ;;  %v4936_v1 = vld [vmem:[%s6167_s3 + $0x360] sm:$0xff]  }
 0x1ef   :  { %4500 = vmatprep.subr.bf16.mxu1 %v4984_v5 }
 0x1f0   :  { %4639 = vmatpush3.bf16.msra.mxu0 %v4897_v2  ;;  %v4937_v2 = vld [vmem:[%s6167_s3 + $0x368] sm:$0xff]  }
 0x1f1   :  { %4640 = vmatprep.subr.bf16.mxu0 %v4984_v5 }
 0x1f2   :  { %4501 = vmatpush3.bf16.msra.mxu1 %v4898_v4 }
 0x1f3   :  { %4526 = vmatprep.subr.bf16.mxu1 %v4984_v5 }
 0x1f4   :  { %4641 = vmatpush3.bf16.msra.mxu0 %v4899_v8 }
 0x1f5   :  { %4503 = vmatmul.mubr.bf16.vlgmr.msra.gmra.mrb[16].mxu1 %v869_v56  ;;  %4666 = vmatprep.subr.bf16.mxu0 %v4984_v5 }
 0x1f6   :  { %4527 = vmatpush3.bf16.msra.mxu1 %v4900_v11  ;;  %4542 = vmatprep.mubr.msk.bf16.mxu1 %vm4985_vm6, %v4984_v5 }
 0x1f7   :  { %4643 = vmatmul.mubr.bf16.vlgmr.msra.gmra.mrb[24].mxu0 %v1668_v55  ;;  %4528 = vmatprep.subr.bf16.mxu1 %v4984_v5 }
 0x1f8   :  { %4667 = vmatpush3.bf16.msra.mxu0 %v4901_v40  ;;  %4682 = vmatprep.mubr.msk.bf16.mxu0 %vm4985_vm6, %v4984_v5 }
 0x1f9   :  { %4668 = vmatprep.subr.bf16.mxu0 %v4984_v5 }
 0x1fa   :  { %4529 = vmatpush3.bf16.msra.mxu1 %v4902_v12 }
 0x1fb   :  { %4530 = vmatprep.subr.bf16.mxu1 %v4984_v5 }
 0x1fc   :  { %4669 = vmatpush3.bf16.msra.mxu0 %v4903_v60  ;;  %v4939_v60 = vld [vmem:[%s6167_s3 + $0x378] sm:$0xff]  }
 0x1fd   :  { %4670 = vmatprep.subr.bf16.mxu0 %v4984_v5 }
 0x1fe   :  { %4531 = vmatpush3.bf16.msra.mxu1 %v4904_v15  ;;  %v4940_v15 = vld [vmem:[%s6167_s3 + $0x3c0] sm:$0xff]  }
 0x1ff   :  { %4532 = vmatprep.subr.bf16.mxu1 %v4984_v5 }
 0x200   :  { %4671 = vmatpush3.bf16.msra.mxu0 %v4905_v16  ;;  %v1779_v16 = vpack.c.b16 %v5329_v13, %v5329_v13  ;;  %v4943_v13 = vld [vmem:[%s6167_s3 + $0x3d8] sm:$0xff]  }
 0x201   :  { %4672 = vmatprep.subr.bf16.mxu0 %v4984_v5 }
 0x202   :  { %4533 = vmatpush3.bf16.msra.mxu1 %v4906_v36  ;;  %v4941_v36 = vld [vmem:[%s6167_s3 + $0x3c8] sm:$0xff]  }
 0x203   :  { %4534 = vmatprep.subr.bf16.mxu1 %v4984_v5 }
 0x204   :  { %4673 = vmatpush3.bf16.msra.mxu0 %v4907_v48  ;;  %v4942_v48 = vld [vmem:[%s6167_s3 + $0x3d0] sm:$0xff]  }
 0x205   :  { %4674 = vmatprep.subr.bf16.mxu0 %v4984_v5 }
 0x206   :  { %4535 = vmatpush3.bf16.msra.mxu1 %v4908_v17  ;;  %v4944_v17 = vld [vmem:[%s6167_s3 + $0x3e0] sm:$0xff]  }
 0x207   :  { %4536 = vmatprep.subr.bf16.mxu1 %v4984_v5 }
 0x208   :  { %4675 = vmatpush3.bf16.msra.mxu0 %v4909_v18  ;;  %v4945_v18 = vld [vmem:[%s6167_s3 + $0x3e8] sm:$0xff]  }
 0x209   :  { %4676 = vmatprep.subr.bf16.mxu0 %v4984_v5 }
 0x20a   :  { %4537 = vmatpush3.bf16.msra.mxu1 %v4910_v20 }
 0x20b   :  { %4538 = vmatprep.subr.bf16.mxu1 %v4984_v5 }
 0x20c   :  { %4677 = vmatpush3.bf16.msra.mxu0 %v4911_v29 }
 0x20d   :  { %4678 = vmatprep.subr.bf16.mxu0 %v4984_v5 }
 0x20e   :  { %4539 = vmatpush3.bf16.msra.mxu1 %v4912_v39 }
 0x20f   :  { %4540 = vmatprep.subr.bf16.mxu1 %v4984_v5 }
 0x210   :  { %4679 = vmatpush3.bf16.msra.mxu0 %v4913_v22 }
 0x211   :  { %4680 = vmatprep.subr.bf16.mxu0 %v4984_v5 }
 0x212   :  { %4541 = vmatpush3.bf16.msra.mxu1 %v4914_v24 }
 0x213   :  { %4566 = vmatprep.subr.bf16.mxu1 %v4984_v5 }
 0x214   :  { %4681 = vmatpush3.bf16.msra.mxu0 %v4915_v27 }
 0x215   :  { %4543 = vmatmul.mubr.bf16.vlgmr.msra.gmra.mrb[20].mxu1 %v1097_v63  ;;  %4706 = vmatprep.subr.bf16.mxu0 %v4984_v5  ;;  %v4947_v63 = vld [vmem:[%s6167_s3 + $0x3f8] sm:$0xff]  }
 0x216   :  { %4567 = vmatpush3.bf16.msra.mxu1 %v4916_v33  ;;  %4582 = vmatprep.mubr.msk.bf16.mxu1 %vm4985_vm6, %v4984_v5 }
 0x217   :  { %4683 = vmatmul.mubr.bf16.vlgmr.msra.gmra.mrb[28].mxu0 %v1896_v23  ;;  %4568 = vmatprep.subr.bf16.mxu1 %v4984_v5  ;;  %v2007_v23 = vpack.c.b16 %v5333_v14, %v5333_v14 }
 0x218   :  { %4708 = vmatprep.mubr.msk.bf16.mxu0 %vm4985_vm6, %v4984_v5 }
 0x21a   :  { %4569 = vmatpush3.bf16.msra.mxu1 %v4917_v46 }
 0x21b   :  { %4570 = vmatprep.subr.bf16.mxu1 %v4984_v5 }
 0x21e   :  { %4571 = vmatpush3.bf16.msra.mxu1 %v4918_v57 }
 0x21f   :  { %4572 = vmatprep.subr.bf16.mxu1 %v4984_v5 }
 0x222   :  { %4573 = vmatpush3.bf16.msra.mxu1 %v4919_v6 }
 0x223   :  { %4574 = vmatprep.subr.bf16.mxu1 %v4984_v5 }
 0x226   :  { %4575 = vmatpush3.bf16.msra.mxu1 %v4920_v25 }
 0x227   :  { %4576 = vmatprep.subr.bf16.mxu1 %v4984_v5 }
 0x22a   :  { %4577 = vmatpush3.bf16.msra.mxu1 %v4921_v34 }
 0x22b   :  { %4578 = vmatprep.subr.bf16.mxu1 %v4984_v5 }
 0x22e   :  { %4579 = vmatpush3.bf16.msra.mxu1 %v4922_v31 }
 0x22f   :  { %4580 = vmatprep.subr.bf16.mxu1 %v4984_v5 }
 0x232   :  { %4581 = vmatpush3.bf16.msra.mxu1 %v4923_v35 }
 0x233   :  { %4606 = vmatprep.subr.bf16.mxu1 %v4984_v5 }
 0x235   :  { %4583 = vmatmul.mubr.bf16.vlgmr.msra.gmra.mrb[24].mxu1 %v1323_v19 }
 0x236   :  { %4607 = vmatpush3.bf16.msra.mxu1 %v4924_v38  ;;  %4622 = vmatprep.mubr.msk.bf16.mxu1 %vm4985_vm6, %v4984_v5 }
 0x237   :  { %4608 = vmatprep.subr.bf16.mxu1 %v4984_v5 }
 0x23a   :  { %4609 = vmatpush3.bf16.msra.mxu1 %v4925_v21 }
 0x23b   :  { %4610 = vmatprep.subr.bf16.mxu1 %v4984_v5 }
 0x23e   :  { %4611 = vmatpush3.bf16.msra.mxu1 %v4926_v30 }
 0x23f   :  { %4612 = vmatprep.subr.bf16.mxu1 %v4984_v5 }
 0x242   :  { %4613 = vmatpush3.bf16.msra.mxu1 %v4927_v0 }
 0x243   :  { %4614 = vmatprep.subr.bf16.mxu1 %v4984_v5 }
 0x246   :  { %4615 = vmatpush3.bf16.msra.mxu1 %v4928_v41 }
 0x247   :  { %4616 = vmatprep.subr.bf16.mxu1 %v4984_v5 }
 0x248   :  { %v406_v50 = vpop.f32.mrb[0].mxu1 }
 0x249   :  { %v4404_v42 = vpop.f32.mrb[1].mxu1 }
 0x24a   :  { %4617 = vmatpush3.bf16.msra.mxu1 %v4929_v37  ;;  %v409_v43 = vpop.f32.mrb[2].mxu1  ;;  %v5762_v32 = vpop.f32.mrb[8].mxu0 }
 0x24b   :  { %v4405_v44 = vpop.f32.mrb[3].mxu1  ;;  %v4484_v47 = vpop.f32.mrb[9].mxu0  ;;  %4618 = vmatprep.subr.bf16.mxu1 %v4984_v5 }
 0x24c   :  { %v845_v52 = vpop.f32.mrb[10].mxu0 }
 0x24d   :  { %v4485_v53 = vpop.f32.mrb[11].mxu0 }
 0x24e   :  { %4619 = vmatpush3.bf16.msra.mxu1 %v4930_v49 }
 0x24f   :  { %4620 = vmatprep.subr.bf16.mxu1 %v4984_v5 }
 0x252   :  { %4621 = vmatpush3.bf16.msra.mxu1 %v4931_v54 }
 0x253   :  { %4646 = vmatprep.subr.bf16.mxu1 %v4984_v5 }
 0x255   :  { %4623 = vmatmul.mubr.bf16.vlgmr.msra.gmra.mrb[28].mxu1 %v1551_v59 }
 0x256   :  { %4647 = vmatpush3.bf16.msra.mxu1 %v4932_v58  ;;  %4662 = vmatprep.mubr.msk.bf16.mxu1 %vm4985_vm6, %v4984_v5 }
 0x257   :  { %4648 = vmatprep.subr.bf16.mxu1 %v4984_v5 }
 0x25a   :  { %4649 = vmatpush3.bf16.msra.mxu1 %v4933_v61 }
 0x25b   :  { %4650 = vmatprep.subr.bf16.mxu1 %v4984_v5 }
 0x25e   :  { %4651 = vmatpush3.bf16.msra.mxu1 %v4934_v62 }
 0x25f   :  { %4652 = vmatprep.subr.bf16.mxu1 %v4984_v5 }
 0x262   :  { %4653 = vmatpush3.bf16.msra.mxu1 %v4935_v9 }
 0x263   :  { %4654 = vmatprep.subr.bf16.mxu1 %v4984_v5 }
 0x266   :  { %4655 = vmatpush3.bf16.msra.mxu1 %v4936_v1  ;;  %v2119_v1 = vld [vmem:[%s6169_s6] sm:$0xf] }
 0x267   :  { %4656 = vmatprep.subr.bf16.mxu1 %v4984_v5 }
 0x268   :  { %v498_v4 = vpop.f32.mrb[4].mxu1 }
 0x269   :  { %v499_v7 = vadd.f32 %v498_v4, %v406_v50  ;;  %v4424_v8 = vpop.f32.mrb[5].mxu1 }
 0x26a   :  { %v501_v10 = vpop.f32.mrb[6].mxu1  ;;  %v5800_v11 = vpop.f32.mrb[12].mxu0  ;;  %4657 = vmatpush3.bf16.msra.mxu1 %v4937_v2  ;;  %v2133_v2 = vsel %vm2131_vm8, %v2119_v1, 0 }
 0x26b   :  { %v4425_v56 = vpop.f32.mrb[7].mxu1  ;;  %v4524_v40 = vpop.f32.mrb[13].mxu0  ;;  %4658 = vmatprep.subr.bf16.mxu1 %v4984_v5  ;;  %4707 = vmatpush3.bf16.msra.mxu0 %v2133_v2  ;;  %v4181_v2 = vld [vmem:[%s6169_s6 + $0x38] sm:$0xf] }
 0x26c   :  { %v1073_v55 = vpop.f32.mrb[14].mxu0  ;;  %4712 = vmatprep.subr.bf16.mxu0 %v4984_v5 }
 0x26d   :  { %v4525_v12 = vpop.f32.mrb[15].mxu0 }
 0x26e   :  { %4659 = vmatpush3.bf16.msra.mxu1 %v4938_v45 }
 0x26f   :  { %4660 = vmatprep.subr.bf16.mxu1 %v4984_v5 }
 0x272   :  { %4661 = vmatpush3.bf16.msra.mxu1 %v4939_v60 }
 0x273   :  { %4686 = vmatprep.subr.bf16.mxu1 %v4984_v5 }
 0x275   :  { %4663 = vmatmul.mubr.bf16.vlgmr.msra.gmra.mrb[32].mxu1 %v1779_v16 }
 0x276   :  { %4687 = vmatpush3.bf16.msra.mxu1 %v4940_v15  ;;  %4702 = vmatprep.mubr.msk.bf16.mxu1 %vm4985_vm6, %v4984_v5 }
 0x277   :  { %4688 = vmatprep.subr.bf16.mxu1 %v4984_v5 }
 0x27a   :  { %4689 = vmatpush3.bf16.msra.mxu1 %v4941_v36 }
 0x27b   :  { %4690 = vmatprep.subr.bf16.mxu1 %v4984_v5 }
 0x27e   :  { %4691 = vmatpush3.bf16.msra.mxu1 %v4942_v48 }
 0x27f   :  { %4692 = vmatprep.subr.bf16.mxu1 %v4984_v5 }
 0x282   :  { %4693 = vmatpush3.bf16.msra.mxu1 %v4943_v13 }
 0x283   :  { %4694 = vmatprep.subr.bf16.mxu1 %v4984_v5 }
 0x286   :  { %4695 = vmatpush3.bf16.msra.mxu1 %v4944_v17 }
 0x287   :  { %4696 = vmatprep.subr.bf16.mxu1 %v4984_v5 }
 0x288   :  { %v614_v20 = vpop.f32.mrb[8].mxu1 }
 0x289   :  { %v620_v29 = vadd.f32 %v614_v20, %v499_v7  ;;  %v4444_v39 = vpop.f32.mrb[9].mxu1 }
 0x28a   :  { %v617_v22 = vpop.f32.mrb[10].mxu1  ;;  %v1297_v24 = vpop.f32.mrb[16].mxu0  ;;  %4697 = vmatpush3.bf16.msra.mxu1 %v4945_v18 }
 0x28b   :  { %v4445_v27 = vpop.f32.mrb[11].mxu1  ;;  %v4564_v28 = vpop.f32.mrb[17].mxu0  ;;  %4698 = vmatprep.subr.bf16.mxu1 %v4984_v5 }
 0x28c   :  { %v1300_v33 = vpop.f32.mrb[18].mxu0 }
 0x28d   :  { %v4565_v51 = vpop.f32.mrb[19].mxu0 }
 0x28e   :  { %4699 = vmatpush3.bf16.msra.mxu1 %v4946_v26  ;;  %v4127_v51 = vld [vmem:[%s6169_s6 + $0x14] sm:$0xf] }
 0x28f   :  { %4700 = vmatprep.subr.bf16.mxu1 %v4984_v5 }
 0x292   :  { %4701 = vmatpush3.bf16.msra.mxu1 %v4947_v63  ;;  %v2533_v63 = vsel %vm2131_vm8, %v4127_v51, 0 }
 0x293   :  { %4736 = vmatprep.subr.bf16.mxu1 %v4984_v5 }
 0x295   :  { %4703 = vmatmul.mubr.bf16.vlgmr.msra.gmra.mrb[36].mxu1 %v2007_v23 }
 0x296   :  { %4738 = vmatprep.mubr.msk.bf16.mxu1 %vm4985_vm6, %v4984_v5  ;;  %4737 = vmatpush3.bf16.msra.mxu1 %v2533_v63 }
 0x297   :  { %4748 = vmatprep.subr.bf16.mxu1 %v4984_v5 }
 0x2a8   :  { %v725_v46 = vpop.f32.mrb[12].mxu1 }
 0x2a9   :  { %v731_v57 = vadd.f32 %v725_v46, %v620_v29  ;;  %v4464_v6 = vpop.f32.mrb[13].mxu1  ;;  %v4098_v29 = vld [vmem:[%s6170_s4] ss:$0 sm:$0xff]  ;;  %s4986_s4 = smov 120  }
 0x2aa   :  { %v728_v25 = vpop.f32.mrb[14].mxu1  ;;  %v1524_v34 = vpop.f32.mrb[20].mxu0  ;;  %v2108_v46 = vld [vmem:[%s6172_s5] sm:$0x3] }
 0x2ab   :  { %v4465_v31 = vpop.f32.mrb[15].mxu1  ;;  %v4604_v35 = vpop.f32.mrb[21].mxu0  ;;  %v848_v38 = vadd.f32 %v5762_v32, %v731_v57  ;;  %v4103_v25 = vld [vmem:[%s6169_s6 + $0x4] sm:$0xf] }
 0x2ac   :  { %v1527_v19 = vpop.f32.mrb[22].mxu0 }
 0x2ad   :  { %v4605_v21 = vpop.f32.mrb[23].mxu0 }
 0x2ae   :  { %v4109_v21 = vld [vmem:[%s6169_s6 + $0x8] sm:$0xf] }
 0x2c8   :  { %v953_v30 = vpop.f32.mrb[16].mxu1 }
 0x2c9   :  { %v959_v0 = vadd.f32 %v953_v30, %v848_v38  ;;  %v4504_v14 = vpop.f32.mrb[17].mxu1  ;;  %v2213_v38 = vsel %vm2131_vm8, %v4103_v25, 0  ;;  %v4151_v30 = vld [vmem:[%s6169_s6 + $0x24] sm:$0xf] }
 0x2ca   :  { %v956_v41 = vpop.f32.mrb[18].mxu1  ;;  %v1752_v37 = vpop.f32.mrb[24].mxu0  ;;  %v2853_v14 = vsel %vm2131_vm8, %v4151_v30, 0  ;;  %v4141_v30 = vld [vmem:[%s6174_s7 + $0x7] ss:$0 sm:$0xff] }
 0x2cb   :  { %v4505_v50 = vpop.f32.mrb[19].mxu1  ;;  %v4644_v42 = vpop.f32.mrb[25].mxu0  ;;  %v1076_v43 = vadd.f32 %v5800_v11, %v959_v0  ;;  %v2293_v0 = vsel %vm2131_vm8, %v4109_v21, 0  ;;  %v4115_v41 = vld [vmem:[%s6169_s6 + $0xc] sm:$0xf] }
 0x2cc   :  { %v1755_v49 = vpop.f32.mrb[26].mxu0  ;;  %v2373_v50 = vsel %vm2131_vm8, %v4115_v41, 0  ;;  %v4105_v21 = vld [vmem:[%s6174_s7 + $0x1] ss:$0 sm:$0xff] }
 0x2cd   :  { %v4645_v44 = vpop.f32.mrb[27].mxu0  ;;  %v4175_v49 = vld [vmem:[%s6169_s6 + $0x34] sm:$0xf] }
 0x2e8   :  { %v1181_v47 = vpop.f32.mrb[20].mxu1 }
 0x2e9   :  { %v1187_v52 = vadd.f32 %v1181_v47, %v1076_v43  ;;  %v4544_v53 = vpop.f32.mrb[21].mxu1  ;;  %v4121_v43 = vld [vmem:[%s6169_s6 + $0x10] sm:$0xf]  ;;  %v3173_v47 = vsel %vm2131_vm8, %v4175_v49, 0 }
 0x2ea   :  { %v1184_v54 = vpop.f32.mrb[22].mxu1  ;;  %v1980_v58 = vpop.f32.mrb[28].mxu0  ;;  %v2453_v44 = vsel %vm2131_vm8, %v4121_v43, 0  ;;  %v4187_v53 = vld [vmem:[%s6169_s6 + $0x3c] sm:$0xf] }
 0x2eb   :  { %v4545_v59 = vpop.f32.mrb[23].mxu1  ;;  %v4684_v32 = vpop.f32.mrb[29].mxu0  ;;  %v1303_v61 = vadd.f32 %v1297_v24, %v1187_v52  ;;  %v4133_v52 = vld [vmem:[%s6169_s6 + $0x18] sm:$0xf] }
 0x2ec   :  { %v1983_v62 = vpop.f32.mrb[30].mxu0  ;;  %v2613_v54 = vsel %vm2131_vm8, %v4133_v52, 0  ;;  %v4145_v59 = vld [vmem:[%s6169_s6 + $0x20] sm:$0xf] }
 0x2ed   :  { %v4685_v9 = vpop.f32.mrb[31].mxu0  ;;  %v2773_v32 = vsel %vm2131_vm8, %v4145_v59, 0  ;;  %v4111_v59 = vld [vmem:[%s6174_s7 + $0x2] ss:$0 sm:$0xff] }
 0x2ee   :  { %v4169_v9 = vld [vmem:[%s6169_s6 + $0x30] sm:$0xf] }
 0x2ef   :  { %v3093_v1 = vsel %vm2131_vm8, %v4169_v9, 0 }
 0x308   :  { %v1407_v4 = vpop.f32.mrb[24].mxu1 }
 0x309   :  { %v1413_v7 = vadd.f32 %v1407_v4, %v1303_v61  ;;  %v4584_v8 = vpop.f32.mrb[25].mxu1  ;;  %v4157_v61 = vld [vmem:[%s6169_s6 + $0x28] sm:$0xf]  ;;  %v3253_v4 = vsel %vm2131_vm8, %v4181_v2, 0 }
 0x30a   :  { %v1410_v10 = vpop.f32.mrb[26].mxu1  ;;  %v2933_v62 = vsel %vm2131_vm8, %v4157_v61, 0  ;;  %v4950_v8 = vld [vmem:[%s6173_s8 + $0x4] ss:$8 sps:$4 sm:$0xff]  }
 0x30b   :  { %v4585_v11 = vpop.f32.mrb[27].mxu1  ;;  %v1530_v45 = vadd.f32 %v1524_v34, %v1413_v7  ;;  %v4139_v34 = vld [vmem:[%s6169_s6 + $0x1c] sm:$0xf]  ;;  %v4948_v7 = vld [vmem:[%s6173_s8] ss:$8 sps:$4 sm:$0xff]  }
 0x30c   :  { %v2693_v19 = vsel %vm2131_vm8, %v4139_v34, 0  ;;  %v4951_v10 = vld [vmem:[%s6173_s8 + $0x10] ss:$8 sps:$4 sm:$0xff]   ;;  %v4953_v11 = vld [vmem:[%s6173_s8 + $0x14] ss:$8 sps:$4 sm:$0xff]  }
 0x328   :  { %v1635_v56 = vpop.f32.mrb[28].mxu1 }
 0x329   :  { %v1641_v40 = vadd.f32 %v1635_v56, %v1530_v45  ;;  %v4624_v55 = vpop.f32.mrb[29].mxu1  ;;  %v4956_v45 = vld [vmem:[%s6173_s8 + $0x24] ss:$8 sps:$4 sm:$0xff]   ;;  %v4954_v56 = vld [vmem:[%s6173_s8 + $0x20] ss:$8 sps:$4 sm:$0xff]  }
 0x32a   :  { %v1638_v12 = vpop.f32.mrb[30].mxu1  ;;  %v4959_v55 = vld [vmem:[%s6173_s8 + $0x34] ss:$8 sps:$4 sm:$0xff]  }
 0x32b   :  { %v4625_v60 = vpop.f32.mrb[31].mxu1  ;;  %v1758_v15 = vadd.f32 %v1752_v37, %v1641_v40  ;;  %v4163_v37 = vld [vmem:[%s6169_s6 + $0x2c] sm:$0xf]  ;;  %v4957_v40 = vld [vmem:[%s6173_s8 + $0x30] ss:$8 sps:$4 sm:$0xff]  }
 0x32c   :  { %v3013_v42 = vsel %vm2131_vm8, %v4163_v37, 0  ;;  %v4962_v12 = vld [vmem:[%s6173_s8 + $0x44] ss:$8 sps:$4 sm:$0xff]   ;;  %v4960_v60 = vld [vmem:[%s6173_s8 + $0x40] ss:$8 sps:$4 sm:$0xff]  }
 0x348   :  { %v1863_v16 = vpop.f32.mrb[32].mxu1 }
 0x349   :  { %v1869_v36 = vadd.f32 %v1863_v16, %v1758_v15  ;;  %v4664_v48 = vpop.f32.mrb[33].mxu1  ;;  %v4963_v15 = vld [vmem:[%s6173_s8 + $0x50] ss:$8 sps:$4 sm:$0xff]   ;;  %v4965_v16 = vld [vmem:[%s6173_s8 + $0x54] ss:$8 sps:$4 sm:$0xff]  }
 0x34a   :  { %v1866_v13 = vpop.f32.mrb[34].mxu1  ;;  %v4966_v48 = vld [vmem:[%s6173_s8 + $0x60] ss:$8 sps:$4 sm:$0xff]  }
 0x34b   :  { %v4665_v17 = vpop.f32.mrb[35].mxu1  ;;  %v1986_v18 = vadd.f32 %v1980_v58, %v1869_v36  ;;  %v3333_v58 = vsel %vm2131_vm8, %v4187_v53, 0  ;;  %v4968_v36 = vld [vmem:[%s6173_s8 + $0x64] ss:$8 sps:$4 sm:$0xff]   ;;  %v4971_v13 = vld [vmem:[%s6173_s8 + $0x74] ss:$8 sps:$4 sm:$0xff]  }
 0x34c   :  { %v4969_v17 = vld [vmem:[%s6173_s8 + $0x70] ss:$8 sps:$4 sm:$0xff]  }
 0x368   :  { %v2091_v20 = vpop.f32.mrb[36].mxu1 }
 0x369   :  { %v2097_v39 = vadd.f32 %v2091_v20, %v1986_v18  ;;  %v4704_v22 = vpop.f32.mrb[37].mxu1  ;;  %v4987_v18 = vmov 1966171168  }
 0x36a   :  { %v2094_v24 = vpop.f32.mrb[38].mxu1  ;;  %v2177_v20 = vunpack.c.l.s4 %v4987_v18 }
 0x36b   :  { %v2105_v26 = vadd.f32 %v4098_v29, %v2097_v39  ;;  %v4705_v27 = vpop.f32.mrb[39].mxu1  ;;  %v2179_v29 = vlaneseq  ;;  %v4099_v24 = vld [vmem:[%s6174_s7] ss:$0 sm:$0xff] }
 0x36c   :  { %v2178_v39 = vunpack.c.0.s8 %v2177_v20 }
 0x36d   :  { %2107 = vst.msk [vmem:[%s6171_s11] sm:$0x3] %vm2106_vm9, %v2105_v26  ;;  %v2109_v28 = vmul.f32 0.5, %v2105_v26  ;;  %v2180_v22 = vshrl.u32 %v2179_v29, 7  ;;  %vm3559_vm11 = vcmp.lt.s32.totalorder %v2179_v29, 192 }
 0x36e   :  { %3567 = vst.msk [vmem:[#allocation5 + $0x21] ss:$8 sm:$0x3] %vm3559_vm11, %v4984_v5  ;;  %3561 = vst.msk [vmem:[#allocation5] ss:$8 sm:$0x3] %vm3559_vm11, %v4984_v5 }
 0x36f   :  { %v2110_v33 = vmul.f32 1.442695, %v2109_v28  ;;  %v6058_v27 = vsub.s32 %v2178_v39, %v2180_v22  ;;  %3564 = vst.msk [vmem:[#allocation5 + $0x30] ss:$8 sm:$0x3] %vm3559_vm11, %v4984_v5 }
 0x370   :  { %3570 = vst.msk [vmem:[#allocation5 + $0x51] ss:$8 sm:$0x3] %vm3559_vm11, %v4984_v5 }
 0x371   :  { %4972 = vpow2.f32 %v2110_v33 }
 0x37b   :  { %v4973_v23 = vpop.eup %4972 }
 0x37c   :  { %2113 = vrot.lane.b32.xlu0 %v4973_v23, %s4986_s4 }
 0x3ee   :  { %v2114_v57 = vpop.permute.xlu0 %2113 }
 0x3ef   :  { %v2116_v6 = vmul.f32 %v2114_v57, %v2108_v46 }
 0x3f1   :  { %v2117_v31 = vadd.f32 %v2116_v6, %v2105_v26  ;;  %v4129_v26 = vld [vmem:[%s6174_s7 + $0x5] ss:$0 sm:$0xff] }
 0x3f3   :  { %v5878_v35 = vpack.c.bf16 %v2117_v31, %v2117_v31 }
 0x3f5   :  { %4709 = vmatmul.mubr.msk.bf16.vlgmr.msra.gmra.mrb[32].mxu0 %vm2127_vm10, %v5878_v35  ;;  %4739 = vmatmul.mubr.msk.bf16.vlgmr.msra.gmra.mrb[40].mxu1 %vm2127_vm10, %v5878_v35 }
 0x3f6   :  { %4713 = vmatpush3.bf16.msra.mxu0 %v2213_v38  ;;  %4749 = vmatpush3.bf16.msra.mxu1 %v2693_v19 }
 0x3f7   :  { %4714 = vmatprep.mubr.msk.bf16.mxu0 %vm4985_vm6, %v4984_v5  ;;  %4718 = vmatprep.subr.bf16.mxu0 %v4984_v5 }
 0x3f8   :  { %4750 = vmatprep.mubr.msk.bf16.mxu1 %vm4985_vm6, %v4984_v5  ;;  %4760 = vmatprep.subr.bf16.mxu1 %v4984_v5 }
 0x3fd   :  { %4715 = vmatmul.mubr.msk.bf16.vlgmr.msra.gmra.mrb[36].mxu0 %vm2127_vm10, %v5878_v35  ;;  %4751 = vmatmul.mubr.msk.bf16.vlgmr.msra.gmra.mrb[44].mxu1 %vm2127_vm10, %v5878_v35 }
 0x3fe   :  { %4719 = vmatpush3.bf16.msra.mxu0 %v2293_v0  ;;  %4761 = vmatpush3.bf16.msra.mxu1 %v2853_v14 }
 0x3ff   :  { %4720 = vmatprep.mubr.msk.bf16.mxu0 %vm4985_vm6, %v4984_v5  ;;  %4724 = vmatprep.subr.bf16.mxu0 %v4984_v5 }
 0x400   :  { %4762 = vmatprep.mubr.msk.bf16.mxu1 %vm4985_vm6, %v4984_v5  ;;  %4772 = vmatprep.subr.bf16.mxu1 %v4984_v5 }
 0x405   :  { %4721 = vmatmul.mubr.msk.bf16.vlgmr.msra.gmra.mrb[40].mxu0 %vm2127_vm10, %v5878_v35  ;;  %4763 = vmatmul.mubr.msk.bf16.vlgmr.msra.gmra.mrb[48].mxu1 %vm2127_vm10, %v5878_v35 }
 0x406   :  { %4725 = vmatpush3.bf16.msra.mxu0 %v2373_v50  ;;  %4773 = vmatpush3.bf16.msra.mxu1 %v3013_v42 }
 0x407   :  { %4726 = vmatprep.mubr.msk.bf16.mxu0 %vm4985_vm6, %v4984_v5  ;;  %4730 = vmatprep.subr.bf16.mxu0 %v4984_v5 }
 0x408   :  { %4774 = vmatprep.mubr.msk.bf16.mxu1 %vm4985_vm6, %v4984_v5  ;;  %4784 = vmatprep.subr.bf16.mxu1 %v4984_v5 }
 0x40d   :  { %4727 = vmatmul.mubr.msk.bf16.vlgmr.msra.gmra.mrb[44].mxu0 %vm2127_vm10, %v5878_v35  ;;  %4775 = vmatmul.mubr.msk.bf16.vlgmr.msra.gmra.mrb[52].mxu1 %vm2127_vm10, %v5878_v35 }
 0x40e   :  { %4731 = vmatpush3.bf16.msra.mxu0 %v2453_v44  ;;  %4785 = vmatpush3.bf16.msra.mxu1 %v3173_v47 }
 0x40f   :  { %4732 = vmatprep.mubr.msk.bf16.mxu0 %vm4985_vm6, %v4984_v5  ;;  %4742 = vmatprep.subr.bf16.mxu0 %v4984_v5 }
 0x410   :  { %4786 = vmatprep.mubr.msk.bf16.mxu1 %vm4985_vm6, %v4984_v5  ;;  %4796 = vmatprep.subr.bf16.mxu1 %v4984_v5 }
 0x415   :  { %4733 = vmatmul.mubr.msk.bf16.vlgmr.msra.gmra.mrb[48].mxu0 %vm2127_vm10, %v5878_v35  ;;  %4787 = vmatmul.mubr.msk.bf16.vlgmr.msra.gmra.mrb[56].mxu1 %vm2127_vm10, %v5878_v35 }
 0x416   :  { %4743 = vmatpush3.bf16.msra.mxu0 %v2613_v54  ;;  %4797 = vmatpush3.bf16.msra.mxu1 %v3333_v58 }
 0x417   :  { %4744 = vmatprep.mubr.msk.bf16.mxu0 %vm4985_vm6, %v4984_v5  ;;  %4754 = vmatprep.subr.bf16.mxu0 %v4984_v5 }
 0x418   :  { %4798 = vmatprep.mubr.msk.bf16.mxu1 %vm4985_vm6, %v4984_v5 }
 0x41d   :  { %4745 = vmatmul.mubr.msk.bf16.vlgmr.msra.gmra.mrb[52].mxu0 %vm2127_vm10, %v5878_v35  ;;  %4799 = vmatmul.mubr.msk.bf16.vlgmr.msra.gmra.mrb[60].mxu1 %vm2127_vm10, %v5878_v35 }
 0x41e   :  { %4755 = vmatpush3.bf16.msra.mxu0 %v2773_v32  ;;  %4756 = vmatprep.mubr.msk.bf16.mxu0 %vm4985_vm6, %v4984_v5  ;;  %v4153_v32 = vld [vmem:[%s6174_s7 + $0x9] ss:$0 sm:$0xff] }
 0x41f   :  { %4766 = vmatprep.subr.bf16.mxu0 %v4984_v5 }
 0x425   :  { %4757 = vmatmul.mubr.msk.bf16.vlgmr.msra.gmra.mrb[56].mxu0 %vm2127_vm10, %v5878_v35 }
 0x426   :  { %4767 = vmatpush3.bf16.msra.mxu0 %v2933_v62  ;;  %4768 = vmatprep.mubr.msk.bf16.mxu0 %vm4985_vm6, %v4984_v5 }
 0x427   :  { %4778 = vmatprep.subr.bf16.mxu0 %v4984_v5 }
 0x42d   :  { %4769 = vmatmul.mubr.msk.bf16.vlgmr.msra.gmra.mrb[60].mxu0 %vm2127_vm10, %v5878_v35 }
 0x42e   :  { %4779 = vmatpush3.bf16.msra.mxu0 %v3093_v1  ;;  %4780 = vmatprep.mubr.msk.bf16.mxu0 %vm4985_vm6, %v4984_v5 }
 0x42f   :  { %4790 = vmatprep.subr.bf16.mxu0 %v4984_v5 }
 0x435   :  { %4781 = vmatmul.mubr.msk.bf16.vlgmr.msra.gmra.mrb[64].mxu0 %vm2127_vm10, %v5878_v35 }
 0x436   :  { %4791 = vmatpush3.bf16.msra.mxu0 %v3253_v4  ;;  %4792 = vmatprep.mubr.msk.bf16.mxu0 %vm4985_vm6, %v4984_v5 }
 0x437   :  { %3504 = vmatprep.subr.bf16.mxu0 %v4950_v8 }
 0x43d   :  { %4793 = vmatmul.mubr.msk.bf16.vlgmr.msra.gmra.mrb[68].mxu0 %vm2127_vm10, %v5878_v35 }
 0x43e   :  { %3536 = vmatprep.mubr.bf16.mxu0 %v4982_v3  ;;  %3505 = vmatpush1.bf16.msra.mxu0 %v4948_v7 }
 0x43f   :  { %3506 = vmatprep.subr.bf16.mxu0 %v4953_v11 }
 0x442   :  { %3507 = vmatpush1.bf16.msra.mxu0 %v4951_v10 }
 0x443   :  { %3508 = vmatprep.subr.bf16.mxu0 %v4956_v45 }
 0x446   :  { %3509 = vmatpush1.bf16.msra.mxu0 %v4954_v56 }
 0x447   :  { %3510 = vmatprep.subr.bf16.mxu0 %v4959_v55 }
 0x44a   :  { %3511 = vmatpush1.bf16.msra.mxu0 %v4957_v40 }
 0x44b   :  { %3512 = vmatprep.subr.bf16.mxu0 %v4962_v12  ;;  %v4117_v12 = vld [vmem:[%s6174_s7 + $0x3] ss:$0 sm:$0xff] }
 0x44e   :  { %3513 = vmatpush1.bf16.msra.mxu0 %v4960_v60  ;;  %v4165_v60 = vld [vmem:[%s6174_s7 + $0xb] ss:$0 sm:$0xff] }
 0x44f   :  { %3514 = vmatprep.subr.bf16.mxu0 %v4965_v16 }
 0x452   :  { %3515 = vmatpush1.bf16.msra.mxu0 %v4963_v15 }
 0x453   :  { %3516 = vmatprep.subr.bf16.mxu0 %v4968_v36 }
 0x456   :  { %3517 = vmatpush1.bf16.msra.mxu0 %v4966_v48 }
 0x457   :  { %3518 = vmatprep.subr.bf16.mxu0 %v4971_v13 }
 0x45a   :  { %3519 = vmatpush1.bf16.msra.mxu0 %v4969_v17 }
 0x4c8   :  { %v2169_v28 = vpop.f32.mrb[32].mxu0  ;;  %v2569_v33 = vpop.f32.mrb[40].mxu1 }
 0x4c9   :  { %v2170_v51 = vadd.f32 %v4099_v24, %v2169_v28  ;;  %v2570_v63 = vadd.f32 %v4129_v26, %v2569_v33  ;;  %v4710_v23 = vpop.f32.mrb[33].mxu0  ;;  %v4740_v46 = vpop.f32.mrb[41].mxu1 }
 0x4ca   :  { %v2172_v57 = vpop.f32.mrb[34].mxu0  ;;  %v2572_v6 = vpop.f32.mrb[42].mxu1 }
 0x4cb   :  { %v2182_v25 = vrot.slane %v2170_v51, %v6058_v27  ;;  %v2582_v34 = vrot.slane %v2570_v63, %v6058_v27  ;;  %v4711_v31 = vpop.f32.mrb[35].mxu0  ;;  %v4741_v35 = vpop.f32.mrb[43].mxu1  ;;  %v4123_v51 = vld [vmem:[%s6174_s7 + $0x4] ss:$0 sm:$0xff]  ;;  %v4177_v63 = vld [vmem:[%s6174_s7 + $0xd] ss:$0 sm:$0xff] }
 0x4cd   :  { %v2183_v38 = vcombine.high %v2182_v25, %v2182_v25  ;;  %4101 = vst.sshfl [vmem:[#allocation4] sm:$0x1 pattern:$0x73625140] %v2182_v25  ;;  %v2583_v19 = vcombine.high %v2582_v34, %v2582_v34 }
 0x4ce   :  { %4131 = vst.sshfl [vmem:[#allocation4 + $0x5] sm:$0x1 pattern:$0x73625140] %v2582_v34 }
 0x4cf   :  { %4102 = vst.sshfl [vmem:[#allocation4 + $0x10] sm:$0x1 pattern:$0x73625140] %v2183_v38 }
 0x4d0   :  { %4132 = vst.sshfl [vmem:[#allocation4 + $0x15] sm:$0x1 pattern:$0x73625140] %v2583_v19  ;;  %v2249_v0 = vpop.f32.mrb[36].mxu0  ;;  %v2729_v14 = vpop.f32.mrb[44].mxu1 }
 0x4d1   :  { %v2250_v41 = vadd.f32 %v4105_v21, %v2249_v0  ;;  %v2730_v37 = vadd.f32 %v4141_v30, %v2729_v14  ;;  %v4716_v50 = vpop.f32.mrb[37].mxu0  ;;  %v4752_v42 = vpop.f32.mrb[45].mxu1 }
 0x4d2   :  { %v2252_v43 = vpop.f32.mrb[38].mxu0  ;;  %v2732_v49 = vpop.f32.mrb[46].mxu1 }
 0x4d3   :  { %v2262_v44 = vrot.slane %v2250_v41, %v6058_v27  ;;  %v2742_v47 = vrot.slane %v2730_v37, %v6058_v27  ;;  %v4717_v52 = vpop.f32.mrb[39].mxu0  ;;  %v4753_v53 = vpop.f32.mrb[47].mxu1  ;;  %v4135_v41 = vld [vmem:[%s6174_s7 + $0x6] ss:$0 sm:$0xff]  ;;  %v4189_v37 = vld [vmem:[%s6174_s7 + $0xf] ss:$0 sm:$0xff] }
 0x4d5   :  { %v2263_v54 = vcombine.high %v2262_v44, %v2262_v44  ;;  %4107 = vst.sshfl [vmem:[#allocation4 + $0x1] sm:$0x1 pattern:$0x73625140] %v2262_v44  ;;  %v2743_v58 = vcombine.high %v2742_v47, %v2742_v47 }
 0x4d6   :  { %4143 = vst.sshfl [vmem:[#allocation4 + $0x7] sm:$0x1 pattern:$0x73625140] %v2742_v47 }
 0x4d7   :  { %4108 = vst.sshfl [vmem:[#allocation4 + $0x11] sm:$0x1 pattern:$0x73625140] %v2263_v54 }
 0x4d8   :  { %4144 = vst.sshfl [vmem:[#allocation4 + $0x17] sm:$0x1 pattern:$0x73625140] %v2743_v58  ;;  %v2329_v61 = vpop.f32.mrb[40].mxu0  ;;  %v2889_v62 = vpop.f32.mrb[48].mxu1 }
 0x4d9   :  { %v2330_v9 = vadd.f32 %v4111_v59, %v2329_v61  ;;  %v2890_v1 = vadd.f32 %v4153_v32, %v2889_v62  ;;  %v4722_v2 = vpop.f32.mrb[41].mxu0  ;;  %v4764_v4 = vpop.f32.mrb[49].mxu1 }
 0x4da   :  { %v2332_v7 = vpop.f32.mrb[42].mxu0  ;;  %v2892_v8 = vpop.f32.mrb[50].mxu1 }
 0x4db   :  { %v2342_v10 = vrot.slane %v2330_v9, %v6058_v27  ;;  %v2902_v11 = vrot.slane %v2890_v1, %v6058_v27  ;;  %v4723_v45 = vpop.f32.mrb[43].mxu0  ;;  %v4765_v56 = vpop.f32.mrb[51].mxu1  ;;  %v4147_v9 = vld [vmem:[%s6174_s7 + $0x8] ss:$0 sm:$0xff] }
 0x4dc   :  { %v4159_v45 = vld [vmem:[%s6174_s7 + $0xa] ss:$0 sm:$0xff] }
 0x4dd   :  { %v2343_v40 = vcombine.high %v2342_v10, %v2342_v10  ;;  %4113 = vst.sshfl [vmem:[#allocation4 + $0x2] sm:$0x1 pattern:$0x73625140] %v2342_v10  ;;  %v2903_v55 = vcombine.high %v2902_v11, %v2902_v11 }
 0x4de   :  { %4155 = vst.sshfl [vmem:[#allocation4 + $0x9] sm:$0x1 pattern:$0x73625140] %v2902_v11 }
 0x4df   :  { %4114 = vst.sshfl [vmem:[#allocation4 + $0x12] sm:$0x1 pattern:$0x73625140] %v2343_v40 }
 0x4e0   :  { %4156 = vst.sshfl [vmem:[#allocation4 + $0x19] sm:$0x1 pattern:$0x73625140] %v2903_v55  ;;  %v2409_v15 = vpop.f32.mrb[44].mxu0  ;;  %v3049_v16 = vpop.f32.mrb[52].mxu1 }
 0x4e1   :  { %v2410_v36 = vadd.f32 %v4117_v12, %v2409_v15  ;;  %v3050_v48 = vadd.f32 %v4165_v60, %v3049_v16  ;;  %v4728_v13 = vpop.f32.mrb[45].mxu0  ;;  %v4776_v17 = vpop.f32.mrb[53].mxu1 }
 0x4e2   :  { %v2412_v18 = vpop.f32.mrb[46].mxu0  ;;  %v3052_v20 = vpop.f32.mrb[54].mxu1 }
 0x4e3   :  { %v2422_v39 = vrot.slane %v2410_v36, %v6058_v27  ;;  %v3062_v22 = vrot.slane %v3050_v48, %v6058_v27  ;;  %v4729_v24 = vpop.f32.mrb[47].mxu0  ;;  %v4777_v26 = vpop.f32.mrb[55].mxu1  ;;  %v4171_v36 = vld [vmem:[%s6174_s7 + $0xc] ss:$0 sm:$0xff] }
 0x4e4   :  { %v4183_v24 = vld [vmem:[%s6174_s7 + $0xe] ss:$0 sm:$0xff] }
 0x4e5   :  { %v2423_v28 = vcombine.high %v2422_v39, %v2422_v39  ;;  %4119 = vst.sshfl [vmem:[#allocation4 + $0x3] sm:$0x1 pattern:$0x73625140] %v2422_v39  ;;  %v3063_v33 = vcombine.high %v3062_v22, %v3062_v22 }
 0x4e6   :  { %4167 = vst.sshfl [vmem:[#allocation4 + $0xb] sm:$0x1 pattern:$0x73625140] %v3062_v22 }
 0x4e7   :  { %4120 = vst.sshfl [vmem:[#allocation4 + $0x13] sm:$0x1 pattern:$0x73625140] %v2423_v28 }
 0x4e8   :  { %4168 = vst.sshfl [vmem:[#allocation4 + $0x1b] sm:$0x1 pattern:$0x73625140] %v3063_v33  ;;  %v2489_v23 = vpop.f32.mrb[48].mxu0  ;;  %v3209_v46 = vpop.f32.mrb[56].mxu1 }
 0x4e9   :  { %v2490_v57 = vadd.f32 %v4123_v51, %v2489_v23  ;;  %v3210_v6 = vadd.f32 %v4177_v63, %v3209_v46  ;;  %v4734_v25 = vpop.f32.mrb[49].mxu0  ;;  %v4788_v34 = vpop.f32.mrb[57].mxu1 }
 0x4ea   :  { %v2492_v31 = vpop.f32.mrb[50].mxu0  ;;  %v3212_v35 = vpop.f32.mrb[58].mxu1 }
 0x4eb   :  { %v2502_v38 = vrot.slane %v2490_v57, %v6058_v27  ;;  %v3222_v19 = vrot.slane %v3210_v6, %v6058_v27  ;;  %v4735_v21 = vpop.f32.mrb[51].mxu0  ;;  %v4789_v30 = vpop.f32.mrb[59].mxu1 }
 0x4ed   :  { %v2503_v0 = vcombine.high %v2502_v38, %v2502_v38  ;;  %4125 = vst.sshfl [vmem:[#allocation4 + $0x4] sm:$0x1 pattern:$0x73625140] %v2502_v38  ;;  %v3223_v14 = vcombine.high %v3222_v19, %v3222_v19 }
 0x4ee   :  { %4179 = vst.sshfl [vmem:[#allocation4 + $0xd] sm:$0x1 pattern:$0x73625140] %v3222_v19 }
 0x4ef   :  { %4126 = vst.sshfl [vmem:[#allocation4 + $0x14] sm:$0x1 pattern:$0x73625140] %v2503_v0 }
 0x4f0   :  { %4180 = vst.sshfl [vmem:[#allocation4 + $0x1d] sm:$0x1 pattern:$0x73625140] %v3223_v14  ;;  %v2649_v50 = vpop.f32.mrb[52].mxu0  ;;  %v3369_v42 = vpop.f32.mrb[60].mxu1 }
 0x4f1   :  { %v2650_v43 = vadd.f32 %v4135_v41, %v2649_v50  ;;  %v3370_v49 = vadd.f32 %v4189_v37, %v3369_v42  ;;  %v4746_v44 = vpop.f32.mrb[53].mxu0  ;;  %v4800_v47 = vpop.f32.mrb[61].mxu1 }
 0x4f2   :  { %v2652_v52 = vpop.f32.mrb[54].mxu0  ;;  %v3372_v53 = vpop.f32.mrb[62].mxu1 }
 0x4f3   :  { %v2662_v54 = vrot.slane %v2650_v43, %v6058_v27  ;;  %v3382_v58 = vrot.slane %v3370_v49, %v6058_v27  ;;  %v4747_v59 = vpop.f32.mrb[55].mxu0  ;;  %v4801_v32 = vpop.f32.mrb[63].mxu1 }
 0x4f5   :  { %v2663_v61 = vcombine.high %v2662_v54, %v2662_v54  ;;  %4137 = vst.sshfl [vmem:[#allocation4 + $0x6] sm:$0x1 pattern:$0x73625140] %v2662_v54  ;;  %v3383_v62 = vcombine.high %v3382_v58, %v3382_v58 }
 0x4f6   :  { %4191 = vst.sshfl [vmem:[#allocation4 + $0xf] sm:$0x1 pattern:$0x73625140] %v3382_v58 }
 0x4f7   :  { %4138 = vst.sshfl [vmem:[#allocation4 + $0x16] sm:$0x1 pattern:$0x73625140] %v2663_v61 }
 0x4f8   :  { %4192 = vst.sshfl [vmem:[#allocation4 + $0x1f] sm:$0x1 pattern:$0x73625140] %v3383_v62  ;;  %v2809_v1 = vpop.f32.mrb[56].mxu0 }
 0x4f9   :  { %v2810_v2 = vadd.f32 %v4147_v9, %v2809_v1  ;;  %v4758_v4 = vpop.f32.mrb[57].mxu0 }
 0x4fa   :  { %v2812_v7 = vpop.f32.mrb[58].mxu0 }
 0x4fb   :  { %v2822_v8 = vrot.slane %v2810_v2, %v6058_v27  ;;  %v4759_v10 = vpop.f32.mrb[59].mxu0 }
 0x4fc   :  { %v3402_v57 = vld [vmem:[#allocation4] sm:$0xff] }
 0x4fd   :  { %v2823_v11 = vcombine.high %v2822_v8, %v2822_v8  ;;  %4149 = vst.sshfl [vmem:[#allocation4 + $0x8] sm:$0x1 pattern:$0x73625140] %v2822_v8 }
 0x4fe   :  { %v3404_v31 = vld [vmem:[#allocation4 + $0x10] sm:$0xff] }
 0x4ff   :  { %4150 = vst.sshfl [vmem:[#allocation4 + $0x18] sm:$0x1 pattern:$0x73625140] %v2823_v11 }
 0x500   :  { %v2969_v56 = vpop.f32.mrb[60].mxu0 }
 0x501   :  { %v2970_v40 = vadd.f32 %v4159_v45, %v2969_v56  ;;  %v4770_v55 = vpop.f32.mrb[61].mxu0 }
 0x502   :  { %v2972_v12 = vpop.f32.mrb[62].mxu0 }
 0x503   :  { %v2982_v60 = vrot.slane %v2970_v40, %v6058_v27  ;;  %v4771_v15 = vpop.f32.mrb[63].mxu0 }
 0x505   :  { %v2983_v16 = vcombine.high %v2982_v60, %v2982_v60  ;;  %4161 = vst.sshfl [vmem:[#allocation4 + $0xa] sm:$0x1 pattern:$0x73625140] %v2982_v60 }
 0x507   :  { %4162 = vst.sshfl [vmem:[#allocation4 + $0x1a] sm:$0x1 pattern:$0x73625140] %v2983_v16 }
 0x508   :  { %v3129_v48 = vpop.f32.mrb[64].mxu0 }
 0x509   :  { %v3130_v13 = vadd.f32 %v4171_v36, %v3129_v48  ;;  %v4782_v17 = vpop.f32.mrb[65].mxu0  ;;  %v4209_v48 = vld [vmem:[%s6175_s9] ss:$0 sm:$0xff] }
 0x50a   :  { %v3132_v18 = vpop.f32.mrb[66].mxu0 }
 0x50b   :  { %v3142_v20 = vrot.slane %v3130_v13, %v6058_v27  ;;  %v4783_v39 = vpop.f32.mrb[67].mxu0 }
 0x50d   :  { %v3143_v22 = vcombine.high %v3142_v20, %v3142_v20  ;;  %4173 = vst.sshfl [vmem:[#allocation4 + $0xc] sm:$0x1 pattern:$0x73625140] %v3142_v20 }
 0x50f   :  { %4174 = vst.sshfl [vmem:[#allocation4 + $0x1c] sm:$0x1 pattern:$0x73625140] %v3143_v22 }
 0x510   :  { %v3289_v26 = vpop.f32.mrb[68].mxu0 }
 0x511   :  { %v3290_v28 = vadd.f32 %v4183_v24, %v3289_v26  ;;  %v4794_v33 = vpop.f32.mrb[69].mxu0 }
 0x512   :  { %v3292_v51 = vpop.f32.mrb[70].mxu0 }
 0x513   :  { %v3302_v63 = vrot.slane %v3290_v28, %v6058_v27  ;;  %v4795_v23 = vpop.f32.mrb[71].mxu0 }
 0x515   :  { %v3303_v46 = vcombine.high %v3302_v63, %v3302_v63  ;;  %4185 = vst.sshfl [vmem:[#allocation4 + $0xe] sm:$0x1 pattern:$0x73625140] %v3302_v63 }
 0x517   :  { %4186 = vst.sshfl [vmem:[#allocation4 + $0x1e] sm:$0x1 pattern:$0x73625140] %v3303_v46 }
 0x51c   :  { %v3403_v6 = vld [vmem:[#allocation4 + $0x8] sm:$0xff] }
 0x51d   :  { %v3406_v25 = vpack.c.bf16 %v3403_v6, %v3402_v57 }
 0x51e   :  { %v3405_v34 = vld [vmem:[#allocation4 + $0x18] sm:$0xff] }
 0x51f   :  { %3537 = vmatmul.mubr.bf16.vlgmr.msra.gmra.mrb[72].mxu0 %v3406_v25  ;;  %v3407_v35 = vpack.c.bf16 %v3405_v34, %v3404_v31 }
 0x520   :  { %3546 = vmatprep.mubr.bf16.mxu0 %v4982_v3 }
 0x527   :  { %3547 = vmatmul.mubr.bf16.gmra.mrb[76].mxu0 %v3407_v35 }
 0x5f2   :  { %v3538_v27 = vpop.f32.mrb[72].mxu0 }
 0x5f3   :  { %v3580_v38 = vrot.slane %v3538_v27, 7  ;;  %v3540_v19 = vpop.f32.mrb[73].mxu0 }
 0x5f4   :  { %v3581_v21 = vrot.slane %v3540_v19, 7  ;;  %v3542_v30 = vpop.f32.mrb[74].mxu0 }
 0x5f5   :  { %3604 = vst [vmem:[#allocation5] sm:$0xfe] %v3580_v38  ;;  %v3582_v3 = vrot.slane %v3542_v30, 7  ;;  %v3544_v0 = vpop.f32.mrb[75].mxu0 }
 0x5f6   :  { %3605 = vst.msk [vmem:[#allocation5 + $0x8] sm:$0xfe] %vm82_vm5, %v3581_v21  ;;  %v3584_v14 = vrot.slane %v3544_v0, 7 }
 0x5f7   :  { %v3583_v29 = vsel %vm71_vm1, %v3580_v38, %v3582_v3  ;;  %3608 = vst [vmem:[#allocation5 + $0x20] sm:$0x1] %v3582_v3 }
 0x5f8   :  { %v3585_v41 = vsel %vm71_vm1, %v3581_v21, %v3584_v14  ;;  %3609 = vst.msk [vmem:[#allocation5 + $0x28] sm:$0x1] %vm88_vm0, %v3584_v14  ;;  %v3632_v52 = vrot.slane %v3583_v29, 1 }
 0x5f9   :  { %3607 = vst.msk [vmem:[#allocation5 + $0x18] sm:$0xff] %vm84_vm2, %v3585_v41 }
 0x5fa   :  { %v3548_v5 = vpop.f32.mrb[76].mxu0 }
 0x5fb   :  { %v3586_v37 = vrot.slane %v3548_v5, 7  ;;  %v3550_v50 = vpop.f32.mrb[77].mxu0 }
 0x5fc   :  { %v3587_v42 = vrot.slane %v3550_v50, 7  ;;  %v3552_v43 = vpop.f32.mrb[78].mxu0  ;;  %v3620_v49 = vld [vmem:[#allocation5] sm:$0xfe] }
 0x5fd   :  { %3610 = vst [vmem:[#allocation5 + $0x30] sm:$0xfe] %v3586_v37  ;;  %v3588_v44 = vrot.slane %v3552_v43, 7  ;;  %v3554_v47 = vpop.f32.mrb[79].mxu0  ;;  %v3631_v53 = vrot.slane %v3620_v49, 1  ;;  %v3616_v60 = vld [vmem:[#allocation5] sm:$0xff] }
 0x5fe   :  { %3611 = vst.msk [vmem:[#allocation5 + $0x38] sm:$0xfe] %vm82_vm5, %v3587_v42  ;;  %v3590_v54 = vrot.slane %v3554_v47, 7  ;;  %v3621_v58 = vld [vmem:[#allocation5 + $0x20] sm:$0x1] }
 0x5ff   :  { %v3589_v59 = vsel %vm71_vm1, %v3586_v37, %v3588_v44  ;;  %3614 = vst [vmem:[#allocation5 + $0x50] sm:$0x1] %v3588_v44  ;;  %v3634_v32 = vrot.slane %v3621_v58, 1  ;;  %v3633_v61 = vsel %vm3630_vm12, %v3631_v53, %v3632_v52  ;;  %v3659_v56 = vld [vmem:[#allocation5 + $0x28] sm:$0x3] }
 0x600   :  { %v3591_v62 = vsel %vm71_vm1, %v3587_v42, %v3590_v54  ;;  %3615 = vst.msk [vmem:[#allocation5 + $0x58] sm:$0x1] %vm88_vm0, %v3590_v54  ;;  %3641 = vrot.lane.b32.xlu1 %v3633_v61, %s4983_s23  ;;  %v3637_v2 = vrot.slane %v3589_v59, 1  ;;  %v3658_v45 = vld [vmem:[#allocation5 + $0x18] sm:$0xff]  ;;  %v3657_v40 = vld [vmem:[#allocation5 + $0x8] sm:$0xfc] }
 0x601   :  { %3613 = vst.msk [vmem:[#allocation5 + $0x48] sm:$0xff] %vm84_vm2, %v3591_v62  ;;  %v3635_v9 = vsel %vm3630_vm12, %v3632_v52, %v3634_v32  ;;  %v3671_v55 = vrot.slane %v3658_v45, 2  ;;  %v3673_v12 = vrot.slane %v3659_v56, 2  ;;  %v3670_v15 = vrot.slane %v3657_v40, 2 }
 0x602   :  { %3643 = vrot.lane.b32.xlu0 %v3635_v9, %s4983_s23 }
 0x603   :  { %v3672_v17 = vsel %vm3669_vm13, %v3670_v15, %v3671_v55  ;;  %v3674_v22 = vsel %vm3669_vm13, %v3671_v55, %v3673_v12 }
 0x604   :  { %v3622_v1 = vld [vmem:[#allocation5 + $0x30] sm:$0xfe] }
 0x605   :  { %v3636_v4 = vrot.slane %v3622_v1, 1  ;;  %v3660_v33 = vld [vmem:[#allocation5 + $0x38] sm:$0xfc]  ;;  %v3618_v46 = vld [vmem:[#allocation5 + $0x30] sm:$0xff] }
 0x606   :  { %v3623_v7 = vld [vmem:[#allocation5 + $0x50] sm:$0x1]  ;;  %v3675_v57 = vrot.slane %v3660_v33, 2 }
 0x607   :  { %v3639_v8 = vrot.slane %v3623_v7, 1  ;;  %v3638_v10 = vsel %vm3630_vm12, %v3636_v4, %v3637_v2  ;;  %v3662_v28 = vld [vmem:[#allocation5 + $0x58] sm:$0x3] }
 0x608   :  { %3645 = vrot.lane.b32.xlu1 %v3638_v10, %s4983_s23  ;;  %v3661_v39 = vld [vmem:[#allocation5 + $0x48] sm:$0xff]  ;;  %v3678_v23 = vrot.slane %v3662_v28, 2 }
 0x609   :  { %v3640_v11 = vsel %vm3630_vm12, %v3637_v2, %v3639_v8  ;;  %v3676_v51 = vrot.slane %v3661_v39, 2 }
 0x60a   :  { %3647 = vrot.lane.b32.xlu0 %v3640_v11, %s4983_s23 }
 0x60b   :  { %v3677_v31 = vsel %vm3669_vm13, %v3675_v57, %v3676_v51  ;;  %v3679_v38 = vsel %vm3669_vm13, %v3676_v51, %v3678_v23 }
 0x672   :  { %v3642_v16 = vpop.permute.xlu1 %3641 }
 0x673   :  { %v3653_v36 = vadd.f32 %v3642_v16, %v3616_v60 }
 0x674   :  { %v3644_v13 = vpop.permute.xlu0 %3643 }
 0x675   :  { %v3654_v18 = vadd.f32 %v3644_v13, %v3583_v29  ;;  %v3684_v20 = vadd.f32 %v3672_v17, %v3653_v36 }
 0x677   :  { %v3685_v24 = vadd.f32 %v3674_v22, %v3654_v18  ;;  %v3695_v26 = vadd.f32 %v4209_v48, %v3684_v20 }
 0x679   :  { %v3696_v63 = vadd.f32 %v4209_v48, %v3685_v24  ;;  %4974 = vtanh.f32 %v3695_v26 }
 0x67a   :  { %v3646_v6 = vpop.permute.xlu1 %3645 }
 0x67b   :  { %4976 = vtanh.f32 %v3696_v63  ;;  %v3655_v25 = vadd.f32 %v3646_v6, %v3618_v46 }
 0x67c   :  { %v3648_v34 = vpop.permute.xlu0 %3647 }
 0x67d   :  { %v3656_v35 = vadd.f32 %v3648_v34, %v3589_v59  ;;  %v3686_v27 = vadd.f32 %v3677_v31, %v3655_v25 }
 0x67f   :  { %v3687_v19 = vadd.f32 %v3679_v38, %v3656_v35  ;;  %v3697_v21 = vadd.f32 %v4209_v48, %v3686_v27 }
 0x681   :  { %v3698_v30 = vadd.f32 %v4209_v48, %v3687_v19  ;;  %4978 = vtanh.f32 %v3697_v21 }
 0x683   :  { %v4975_v3 = vpop.eup %4974  ;;  %4980 = vtanh.f32 %v3698_v30 }
 0x684   :  { %3703 = vst.msk [vmem:[%s6176_s10] sm:$0xff] %vm84_vm2, %v4975_v3 }
 0x685   :  { %v4977_v0 = vpop.eup %4976 }
 0x686   :  { %3704 = vst.msk [vmem:[%s6176_s10 + $0x8] sm:$0xff] %vm84_vm2, %v4977_v0 }
 0x68b   :  { %v4979_v14 = vpop.eup %4978 }
 0x68c   :  { %3705 = vst.msk [vmem:[%s6176_s10 + $0x10] sm:$0xff] %vm84_vm2, %v4979_v14 }
 0x68d   :  { %v4981_v29 = vpop.eup %4980 }
 0x68e   :  { %3706 = vst.msk [vmem:[%s6176_s10 + $0x18] sm:$0xff] %vm84_vm2, %v4981_v29 }

</bundles_post_ra>
